<compile_context>
chip_gen: v6e
topology: v6e:2x2x1
jax: 0.10.0
libtpu: 0.0.40
codegen_flags: <defaults>
</compile_context>

<pallas_src>
import numpy as np

import jax
import jax.numpy as jnp
from jax.experimental import pallas as pl
from jax.experimental.pallas import tpu as pltpu

_BN_EPS = 1e-5
_CP = 4   # conv_1 channels (3) padded to 4 -> output slab width W2*4 (=128 here)


# ----------------------------- fused Pallas kernel -------------------------- #

def _fused_kernel(x_ref, u1_ref, u2_ref, m1_ref, m2_ref,
                  a0_ref, a1_ref, a2_ref, a3_ref, a4_ref, a5_ref,
                  b0_ref, b1_ref, b2_ref, b3_ref, b4_ref,
                  o_ref):
    f32, bf16 = jnp.float32, jnp.bfloat16

    def taps_from_rolls(y, m_ref):
        # y: (M, L) f32.  Returns (M, 3L) bf16 = [y[i-1] | y[i] | y[i+1]] with
        # per-image boundary rows zeroed (masks precomputed in the wrapper;
        # batch is stacked into M so interior image boundaries need zeroing too).
        m = y.shape[0]
        prev_rows = pltpu.roll(y, shift=1, axis=0) * m_ref[0]        # y[i-1]
        next_rows = pltpu.roll(y, shift=m - 1, axis=0) * m_ref[1]    # y[i+1]
        return jnp.concatenate(
            [prev_rows.astype(bf16), y.astype(bf16), next_rows.astype(bf16)],
            axis=1)

    def taps_from_upsample(y, u_ref):
        # y: (Min, L) f32; u_ref: (3, Mout, Min) f32 = blockdiag(S_d @ MH) per
        # vertical tap (x2 H-upsample fused with the stage's first conv;
        # boundary rows of S_d are already zero -> no masks needed here).
        taps = [jnp.dot(u_ref[d], y, preferred_element_type=f32).astype(bf16)
                for d in range(3)]
        return jnp.concatenate(taps, axis=1)

    def conv(xcat, a_ref, b_ref, act):
        # xcat: (M, 3K) bf16; a_ref: (3K, N) bf16 tap-concat band matrix with
        # the BN scale pre-folded into its columns (f32 fold, then bf16 cast).
        acc = jnp.dot(xcat, a_ref[...], preferred_element_type=f32)
        if b_ref is not None:
            acc = acc + b_ref[...]
        if act == "relu":
            return jnp.maximum(acc, 0.0)
        return jax.nn.sigmoid(acc)

    x0 = x_ref[...]                                          # (M0, W0*32) f32

    # stage 1: x2 bilinear upsample (H fused into u1, W folded into a0) + conv_0
    y = conv(taps_from_upsample(x0, u1_ref), a0_ref, b0_ref, "relu")
    y = conv(taps_from_rolls(y, m1_ref), a1_ref, b1_ref, "relu")
    y = conv(taps_from_rolls(y, m1_ref), a2_ref, b2_ref, "relu")

    # stage 2: x2 upsample (fused into u2 / a3) + conv_1 + sigmoid
    y = conv(taps_from_upsample(y, u2_ref), a3_ref, b3_ref, "relu")
    y = conv(taps_from_rolls(y, m2_ref), a4_ref, b4_ref, "relu")
    y = conv(taps_from_rolls(y, m2_ref), a5_ref, None, "sigmoid")

    o_ref[...] = y


def _const_spec(arr):
    zeros = (0,) * arr.ndim
    return pl.BlockSpec(arr.shape, lambda i, _z=zeros: _z)


def _recovery_fused_call(x_slab, operands, n_chunks):
    m_total, k0 = x_slab.shape
    chunk_m0 = m_total // n_chunks

    u1, u2 = operands[0], operands[1]
    a0, a1, a2, a3, a4, a5 = operands[4:10]
    chunk_m1, chunk_m2 = u1.shape[1], u2.shape[1]
    out_cols = a5.shape[1]
    out_rows = chunk_m2 * n_chunks

    if n_chunks > 1:
        assert chunk_m0 % 8 == 0 and chunk_m2 % 8 == 0, (
            "per-chunk row counts must be sublane aligned when chunking")

    in_specs = [pl.BlockSpec((chunk_m0, k0), lambda i: (i, 0))]
    in_specs += [_const_spec(a) for a in operands]
    # TODO(synk): at real PSMNet resolutions the (3K, N) band matrices are
    # block-tridiagonal and O((W*C)^2); tile them along W (each output W-chunk
    # needs only its 3 adjacent input W-blocks) before they outgrow v7x VMEM.

    flops_chunk = (
        2 * 3 * chunk_m1 * chunk_m0 * k0
        + 2 * chunk_m1 * (a0.shape[0] * a0.shape[1]
                          + a1.shape[0] * a1.shape[1]
                          + a2.shape[0] * a2.shape[1])
        + 2 * 3 * chunk_m2 * chunk_m1 * a2.shape[1]
        + 2 * chunk_m2 * (a3.shape[0] * a3.shape[1]
                          + a4.shape[0] * a4.shape[1]
                          + a5.shape[0] * a5.shape[1]))
    op_bytes = sum(int(np.prod(o.shape)) * o.dtype.itemsize for o in operands)
    cost = pl.CostEstimate(
        flops=int(flops_chunk * n_chunks),
        transcendentals=int(out_rows * out_cols),
        bytes_accessed=int(x_slab.size * 4 + out_rows * out_cols * 4 + op_bytes))

    return pl.pallas_call(
        _fused_kernel,
        out_shape=jax.ShapeDtypeStruct((out_rows, out_cols), jnp.float32),
        grid_spec=pltpu.PrefetchScalarGridSpec(
            num_scalar_prefetch=0,
            grid=(n_chunks,),
            in_specs=in_specs,
            out_specs=pl.BlockSpec((chunk_m2, out_cols), lambda i: (i, 0)),
        ),
        compiler_params=pltpu.CompilerParams(
            dimension_semantics=("parallel",),        # v7x: chunks over the 2 TCs
            vmem_limit_bytes=32 * 1024 * 1024),
        cost_estimate=cost,
    )(x_slab, *operands)


# -------------------- wrapper-side operand preparation ---------------------- #

def _interp_matrix_np(n_in, n_out):
    """(n_out, n_in) bilinear interpolation matrix, align_corners=True."""
    if n_in == 1:
        return np.ones((n_out, 1), np.float32)
    src = np.arange(n_out, dtype=np.float64) * (n_in - 1) / (n_out - 1)
    lo = np.clip(np.floor(src).astype(np.int64), 0, n_in - 2)
    frac = src - lo
    m = np.zeros((n_out, n_in), np.float64)
    m[np.arange(n_out), lo] += 1.0 - frac
    m[np.arange(n_out), lo + 1] += frac
    return m.astype(np.float32)


def _shift_matrix_np(h, d):
    """(h, h) 0/1 matrix with (S @ X)[i] = X[i + d] (zero when out of range)."""
    s = np.zeros((h, h), np.float32)
    i = np.arange(h)
    keep = (i + d >= 0) & (i + d < h)
    s[i[keep], i[keep] + d] = 1.0
    return s


def _upsample_tap_stack(h_in, h_out, chunk):
    """(3, chunk*h_out, chunk*h_in): per vertical tap d, blockdiag(S_{d-1} @ MH)."""
    mh = _interp_matrix_np(h_in, h_out)
    eye = np.eye(chunk, dtype=np.float32)
    taps = [np.kron(eye, _shift_matrix_np(h_out, d - 1) @ mh) for d in range(3)]
    return jnp.asarray(np.stack(taps))


def _boundary_masks(h, chunk):
    """(2, chunk*h, 1): [0] zeros the first row of each image (y[i-1] tap),
    [1] zeros the last row of each image (y[i+1] tap)."""
    top = np.ones((chunk, h), np.float32); top[:, 0] = 0.0
    bot = np.ones((chunk, h), np.float32); bot[:, h - 1] = 0.0
    return jnp.asarray(np.stack([top.reshape(-1, 1), bot.reshape(-1, 1)]))


def _band_matrices_np(w, width):
    """3x3 weights (3,3,Cin,Cout) -> (3, width*Cin, width*Cout) band matrices.

    A[dh, wi*Cin+ci, wo*Cout+co] = w[dh, wi-wo+1, ci, co] (0 outside the band),
    so conv_out = sum_dh rowshift_dh(X) @ A[dh]; SAME W-padding is implicit.
    """
    wi = np.arange(width)[:, None]
    wo = np.arange(width)[None, :]
    masks = np.stack([(wi == wo + dw - 1) for dw in range(3)]).astype(np.float32)
    a = np.einsum("dxy,hdio->hxiyo", masks, w)
    cin, cout = w.shape[2], w.shape[3]
    return a.reshape(3, width * cin, width * cout)


def _w_upsample_matrix_np(mw, c):
    """Expand a (W_out, W_in) interp matrix to (W_in*c, W_out*c) acting on the
    lane-dense (.., W*c) layout (per-channel identity)."""
    w_out, w_in = mw.shape
    e = np.einsum("ow,ij->wioj", mw, np.eye(c, dtype=np.float32))
    return e.reshape(w_in * c, w_out * c)


def _conv_tap_matrix(w, width, scale, wup=None):
    """(3K, width*Cout) bf16 tap-concatenated band matrix; optional x2
    W-upsample fold on the input side and BN scale folded into the output
    columns.  All folds happen in f32 before the single bf16 cast."""
    band = _band_matrices_np(np.asarray(w, np.float32), width)
    if wup is not None:
        band = np.einsum("km,hmn->hkn", wup, band)
    band = band * np.tile(np.asarray(scale, np.float32), width)[None, None, :]
    k = band.shape[1]
    return jnp.asarray(band.reshape(3 * k, band.shape[2]), dtype=jnp.bfloat16)


def _bias_row(bias, width):
    return jnp.asarray(np.tile(np.asarray(bias, np.float32), width)[None, :])


def prepare_recovery_operands(params, n, h0, w0, batch_chunks=1):
    """One-time host-side operand preparation (hoisted out of the per-call jit)."""
    assert n % batch_chunks == 0
    chunk = n // batch_chunks
    h1, h2 = 2 * h0, 4 * h0
    w1, w2 = 2 * w0, 4 * w0

    u1 = _upsample_tap_stack(h0, h1, chunk)          # (3, chunk*H1, chunk*H0)
    u2 = _upsample_tap_stack(h1, h2, chunk)          # (3, chunk*H2, chunk*H1)
    m1 = _boundary_masks(h1, chunk)                  # (2, chunk*H1, 1)
    m2 = _boundary_masks(h2, chunk)                  # (2, chunk*H2, 1)

    (w00, s00, b00), (w01, s01, b01), (w02, s02, b02) = params["conv_0"]
    (w10, s10, b10), (w11, s11, b11), (w12, _, _) = params["conv_1"]

    wup1 = _w_upsample_matrix_np(_interp_matrix_np(w0, w1), 32)
    wup2 = _w_upsample_matrix_np(_interp_matrix_np(w1, w2), 16)

    def pad_w(w, cin_t, cout_t):
        w = np.asarray(w, np.float32)
        return np.pad(w, ((0, 0), (0, 0),
                          (0, cin_t - w.shape[2]), (0, cout_t - w.shape[3])))

    pad1 = lambda v: np.pad(np.asarray(v, np.float32),
                            (0, _CP - v.shape[0]), constant_values=1.0)
    pad0 = lambda v: np.pad(np.asarray(v, np.float32),
                            (0, _CP - v.shape[0]), constant_values=0.0)

    a0 = _conv_tap_matrix(w00, w1, s00, wup=wup1)               # (3*W0*32, W1*16)
    a1 = _conv_tap_matrix(w01, w1, s01)                         # (3*W1*16, W1*16)
    a2 = _conv_tap_matrix(w02, w1, s02)
    a3 = _conv_tap_matrix(pad_w(w10, 16, _CP), w2, pad1(s10), wup=wup2)
    a4 = _conv_tap_matrix(pad_w(w11, _CP, _CP), w2, pad1(s11))
    a5 = _conv_tap_matrix(pad_w(w12, _CP, _CP), w2, np.ones((_CP,), np.float32))

    b0, b1, b2 = (_bias_row(b, w1) for b in (b00, b01, b02))
    b3, b4 = _bias_row(pad0(b10), w2), _bias_row(pad0(b11), w2)

    return (u1, u2, m1, m2, a0, a1, a2, a3, a4, a5, b0, b1, b2, b3, b4)


# --------------------------------- forward ----------------------------------- #

@jax.jit
def recovery_size_forward(x_nchw, operands):
    n, c, h0, w0 = x_nchw.shape
    chunk = operands[0].shape[2] // h0          # u1: (3, chunk*H1, chunk*H0)
    assert n % chunk == 0
    n_chunks = n // chunk

    x = jnp.transpose(x_nchw, (0, 2, 3, 1)).astype(jnp.float32)   # NHWC
    x = x.reshape(n * h0, w0 * c)               # batch stacked into sublanes (M)

    out = _recovery_fused_call(x, operands, n_chunks)             # (N*H2, W2*CP)
    h2, w2 = 4 * h0, 4 * w0
    out = out.reshape(n, h2, w2, _CP)[..., :3]
    return jnp.transpose(out, (0, 3, 1, 2))                       # NCHW


# ------------------------------ parameters ----------------------------------- #

def _init_conv_bn(key, cin, cout, with_bn=True):
    kw, kg, kb = jax.random.split(key, 3)
    w = jax.random.normal(kw, (3, 3, cin, cout), jnp.float32) * 0.1
    if with_bn:
        gamma = 1.0 + 0.1 * jax.random.normal(kg, (cout,), jnp.float32)
        beta = 0.05 * jax.random.normal(kb, (cout,), jnp.float32)
        running_mean = jnp.zeros((cout,), jnp.float32)
        running_var = jnp.ones((cout,), jnp.float32)
        scale = gamma / jnp.sqrt(running_var + _BN_EPS)
        bias = beta - running_mean * scale
    else:
        scale = jnp.ones((cout,), jnp.float32)
        bias = jnp.zeros((cout,), jnp.float32)
    return w, scale, bias


def init_recovery_size_params(key):
    keys = jax.random.split(key, 6)
    conv_0 = [_init_conv_bn(keys[0], 32, 16),
              _init_conv_bn(keys[1], 16, 16),
              _init_conv_bn(keys[2], 16, 16)]
    conv_1 = [_init_conv_bn(keys[3], 16, 3),
              _init_conv_bn(keys[4], 3, 3),
              _init_conv_bn(keys[5], 3, 3, with_bn=False)]   # plain Conv2d, no BN
    return {"conv_0": conv_0, "conv_1": conv_1}


# ------------------------- plain-JAX f32 reference --------------------------- #

@jax.jit
def _reference_forward(x_nchw, params):
    x = jnp.transpose(x_nchw, (0, 2, 3, 1)).astype(jnp.float32)

    def upsample(t):
        _, h, w, _ = t.shape
        mh = jnp.asarray(_interp_matrix_np(h, 2 * h))
        mw = jnp.asarray(_interp_matrix_np(w, 2 * w))
        t = jnp.einsum("oh,nhwc->nowc", mh, t)
        return jnp.einsum("pw,nowc->nopc", mw, t)

    def conv_bn(t, w, s, b, act):
        y = jax.lax.conv_general_dilated(
            t, w, window_strides=(1, 1), padding="SAME",
            dimension_numbers=("NHWC", "HWIO", "NHWC"))
        y = y * s + b
        return jnp.maximum(y, 0.0) if act == "relu" else jax.nn.sigmoid(y)

    x = upsample(x)
    for (w, s, b) in params["conv_0"]:
        x = conv_bn(x, w, s, b, "relu")
    x = upsample(x)
    w, s, b = params["conv_1"][0]; x = conv_bn(x, w, s, b, "relu")
    w, s, b = params["conv_1"][1]; x = conv_bn(x, w, s, b, "relu")
    w, s, b = params["conv_1"][2]; x = conv_bn(x, w, s, b, "sigmoid")
    return jnp.transpose(x, (0, 3, 1, 2))


# ----------------------------------- main ------------------------------------ #

if __name__ == "__main__":
    key = jax.random.PRNGKey(0)
    k_x, k_p = jax.random.split(key)

    # Module expects 32 input channels; spatial 8x8 -> 16x16 -> 32x32.
    x = jax.random.normal(k_x, (2, 32, 8, 8), jnp.float32)
    params = init_recovery_size_params(k_p)

    # One-time operand prep (hoisted out of the per-call jit).
    # On v7x, pass batch_chunks=2 to shard the batch over the two TensorCores.
    operands = prepare_recovery_operands(params, n=2, h0=8, w0=8, batch_chunks=1)

    out = jax.block_until_ready(recovery_size_forward(x, operands))

    assert out.shape == (2, 3, 32, 32), out.shape
    assert bool(jnp.all(jnp.isfinite(out)))
    assert bool(jnp.all((out >= 0.0) & (out <= 1.0)))     # post-sigmoid range

    ref = jax.block_until_ready(_reference_forward(x, params))
    max_err = float(jnp.max(jnp.abs(out - ref)))
    assert max_err < 8e-2, max_err     # bf16 MXU inputs, f32 accumulate/epilogue

    print("KERNEL_OK")
</pallas_src>

<mosaic_0001>
module attributes {stable_mosaic.version = 11 : i64} {
  func.func @_fused_kernel(%arg0: i32, %arg1: memref<16x256xf32, #tpu.memory_space<vmem>>, %arg2: memref<3x32x16xf32, #tpu.memory_space<vmem>>, %arg3: memref<3x64x32xf32, #tpu.memory_space<vmem>>, %arg4: memref<2x32x1xf32, #tpu.memory_space<vmem>>, %arg5: memref<2x64x1xf32, #tpu.memory_space<vmem>>, %arg6: memref<768x256xbf16, #tpu.memory_space<vmem>>, %arg7: memref<768x256xbf16, #tpu.memory_space<vmem>>, %arg8: memref<768x256xbf16, #tpu.memory_space<vmem>>, %arg9: memref<768x128xbf16, #tpu.memory_space<vmem>>, %arg10: memref<384x128xbf16, #tpu.memory_space<vmem>>, %arg11: memref<384x128xbf16, #tpu.memory_space<vmem>>, %arg12: memref<1x256xf32, #tpu.memory_space<vmem>>, %arg13: memref<1x256xf32, #tpu.memory_space<vmem>>, %arg14: memref<1x256xf32, #tpu.memory_space<vmem>>, %arg15: memref<1x128xf32, #tpu.memory_space<vmem>>, %arg16: memref<1x128xf32, #tpu.memory_space<vmem>>, %arg17: memref<64x128xf32, #tpu.memory_space<vmem>>) attributes {dimension_semantics = [#tpu.dimension_semantics<parallel>], iteration_bounds = array<i64: 1>, scalar_prefetch = 0 : i64, scratch_operands = 0 : i64, tpu.core_type = #tpu.core_type<tc>, window_params = [{transform_indices = @transform_0, window_bounds = array<i64: 16, 256>}, {pipeline_mode = #tpu.pipeline_mode<synchronous>, transform_indices = @transform_1, window_bounds = array<i64: 3, 32, 16>}, {pipeline_mode = #tpu.pipeline_mode<synchronous>, transform_indices = @transform_2, window_bounds = array<i64: 3, 64, 32>}, {pipeline_mode = #tpu.pipeline_mode<synchronous>, transform_indices = @transform_3, window_bounds = array<i64: 2, 32, 1>}, {pipeline_mode = #tpu.pipeline_mode<synchronous>, transform_indices = @transform_4, window_bounds = array<i64: 2, 64, 1>}, {pipeline_mode = #tpu.pipeline_mode<synchronous>, transform_indices = @transform_5, window_bounds = array<i64: 768, 256>}, {pipeline_mode = #tpu.pipeline_mode<synchronous>, transform_indices = @transform_6, window_bounds = array<i64: 768, 256>}, {pipeline_mode = #tpu.pipeline_mode<synchronous>, transform_indices = @transform_7, window_bounds = array<i64: 768, 256>}, {pipeline_mode = #tpu.pipeline_mode<synchronous>, transform_indices = @transform_8, window_bounds = array<i64: 768, 128>}, {pipeline_mode = #tpu.pipeline_mode<synchronous>, transform_indices = @transform_9, window_bounds = array<i64: 384, 128>}, {pipeline_mode = #tpu.pipeline_mode<synchronous>, transform_indices = @transform_10, window_bounds = array<i64: 384, 128>}, {pipeline_mode = #tpu.pipeline_mode<synchronous>, transform_indices = @transform_11, window_bounds = array<i64: 1, 256>}, {pipeline_mode = #tpu.pipeline_mode<synchronous>, transform_indices = @transform_12, window_bounds = array<i64: 1, 256>}, {pipeline_mode = #tpu.pipeline_mode<synchronous>, transform_indices = @transform_13, window_bounds = array<i64: 1, 256>}, {pipeline_mode = #tpu.pipeline_mode<synchronous>, transform_indices = @transform_14, window_bounds = array<i64: 1, 128>}, {pipeline_mode = #tpu.pipeline_mode<synchronous>, transform_indices = @transform_15, window_bounds = array<i64: 1, 128>}, {transform_indices = @transform_16, window_bounds = array<i64: 64, 128>}]} {
    %c0 = arith.constant 0 : index
    %c0_0 = arith.constant 0 : index
    %0 = vector.load %arg1[%c0, %c0_0] : memref<16x256xf32, #tpu.memory_space<vmem>>, vector<16x256xf32>
    %c0_1 = arith.constant 0 : index
    %c0_2 = arith.constant 0 : index
    %c0_3 = arith.constant 0 : index
    %1 = vector.load %arg2[%c0_1, %c0_2, %c0_3] : memref<3x32x16xf32, #tpu.memory_space<vmem>>, vector<1x32x16xf32>
    %2 = vector.shape_cast %1 : vector<1x32x16xf32> to vector<32x16xf32>
    %cst = arith.constant dense<0.000000e+00> : vector<32x256xf32>
    %3 = tpu.matmul %2, %0, %cst {dimension_numbers = #tpu.dot_dimension_numbers<[1], [0], [0], [1], [0, 0, 1, 1], [], []>} : vector<32x16xf32>, vector<16x256xf32>, vector<32x256xf32> -> vector<32x256xf32>
    %4 = arith.truncf %3 : vector<32x256xf32> to vector<32x256xbf16>
    %c1 = arith.constant 1 : index
    %c0_4 = arith.constant 0 : index
    %c0_5 = arith.constant 0 : index
    %5 = vector.load %arg2[%c1, %c0_4, %c0_5] : memref<3x32x16xf32, #tpu.memory_space<vmem>>, vector<1x32x16xf32>
    %6 = vector.shape_cast %5 : vector<1x32x16xf32> to vector<32x16xf32>
    %cst_6 = arith.constant dense<0.000000e+00> : vector<32x256xf32>
    %7 = tpu.matmul %6, %0, %cst_6 {dimension_numbers = #tpu.dot_dimension_numbers<[1], [0], [0], [1], [0, 0, 1, 1], [], []>} : vector<32x16xf32>, vector<16x256xf32>, vector<32x256xf32> -> vector<32x256xf32>
    %8 = arith.truncf %7 : vector<32x256xf32> to vector<32x256xbf16>
    %c2 = arith.constant 2 : index
    %c0_7 = arith.constant 0 : index
    %c0_8 = arith.constant 0 : index
    %9 = vector.load %arg2[%c2, %c0_7, %c0_8] : memref<3x32x16xf32, #tpu.memory_space<vmem>>, vector<1x32x16xf32>
    %10 = vector.shape_cast %9 : vector<1x32x16xf32> to vector<32x16xf32>
    %cst_9 = arith.constant dense<0.000000e+00> : vector<32x256xf32>
    %11 = tpu.matmul %10, %0, %cst_9 {dimension_numbers = #tpu.dot_dimension_numbers<[1], [0], [0], [1], [0, 0, 1, 1], [], []>} : vector<32x16xf32>, vector<16x256xf32>, vector<32x256xf32> -> vector<32x256xf32>
    %12 = arith.truncf %11 : vector<32x256xf32> to vector<32x256xbf16>
    %13 = tpu.concatenate %4, %8, %12 in 1 : vector<32x256xbf16>, vector<32x256xbf16>, vector<32x256xbf16> -> vector<32x768xbf16>
    %c0_10 = arith.constant 0 : index
    %c0_11 = arith.constant 0 : index
    %14 = vector.load %arg6[%c0_10, %c0_11] : memref<768x256xbf16, #tpu.memory_space<vmem>>, vector<768x256xbf16>
    %cst_12 = arith.constant dense<0.000000e+00> : vector<32x256xf32>
    %15 = tpu.matmul %13, %14, %cst_12 {dimension_numbers = #tpu.dot_dimension_numbers<[1], [0], [0], [1], [0, 0, 1, 1], [], []>} : vector<32x768xbf16>, vector<768x256xbf16>, vector<32x256xf32> -> vector<32x256xf32>
    %c0_13 = arith.constant 0 : index
    %c0_14 = arith.constant 0 : index
    %16 = vector.load %arg12[%c0_13, %c0_14] : memref<1x256xf32, #tpu.memory_space<vmem>>, vector<1x256xf32>
    %17 = vector.broadcast %16 : vector<1x256xf32> to vector<32x256xf32>
    %18 = arith.addf %15, %17 : vector<32x256xf32>
    %cst_15 = arith.constant 0.000000e+00 : f32
    %19 = vector.broadcast %cst_15 : f32 to vector<32x256xf32>
    %20 = arith.maximumf %18, %19 : vector<32x256xf32>
    %c1_i32 = arith.constant 1 : i32
    %21 = tpu.dynamic_rotate %20 by %c1_i32 dim 0 : vector<32x256xf32>, i32 -> vector<32x256xf32>
    %c0_16 = arith.constant 0 : index
    %c0_17 = arith.constant 0 : index
    %c0_18 = arith.constant 0 : index
    %22 = vector.load %arg4[%c0_16, %c0_17, %c0_18] : memref<2x32x1xf32, #tpu.memory_space<vmem>>, vector<1x32x1xf32>
    %23 = vector.shape_cast %22 : vector<1x32x1xf32> to vector<32x1xf32>
    %24 = vector.broadcast %23 : vector<32x1xf32> to vector<32x256xf32>
    %25 = arith.mulf %21, %24 : vector<32x256xf32>
    %c31_i32 = arith.constant 31 : i32
    %26 = tpu.dynamic_rotate %20 by %c31_i32 dim 0 : vector<32x256xf32>, i32 -> vector<32x256xf32>
    %c1_19 = arith.constant 1 : index
    %c0_20 = arith.constant 0 : index
    %c0_21 = arith.constant 0 : index
    %27 = vector.load %arg4[%c1_19, %c0_20, %c0_21] : memref<2x32x1xf32, #tpu.memory_space<vmem>>, vector<1x32x1xf32>
    %28 = vector.shape_cast %27 : vector<1x32x1xf32> to vector<32x1xf32>
    %29 = vector.broadcast %28 : vector<32x1xf32> to vector<32x256xf32>
    %30 = arith.mulf %26, %29 : vector<32x256xf32>
    %31 = arith.truncf %25 : vector<32x256xf32> to vector<32x256xbf16>
    %32 = arith.truncf %20 : vector<32x256xf32> to vector<32x256xbf16>
    %33 = arith.truncf %30 : vector<32x256xf32> to vector<32x256xbf16>
    %34 = tpu.concatenate %31, %32, %33 in 1 : vector<32x256xbf16>, vector<32x256xbf16>, vector<32x256xbf16> -> vector<32x768xbf16>
    %c0_22 = arith.constant 0 : index
    %c0_23 = arith.constant 0 : index
    %35 = vector.load %arg7[%c0_22, %c0_23] : memref<768x256xbf16, #tpu.memory_space<vmem>>, vector<768x256xbf16>
    %cst_24 = arith.constant dense<0.000000e+00> : vector<32x256xf32>
    %36 = tpu.matmul %34, %35, %cst_24 {dimension_numbers = #tpu.dot_dimension_numbers<[1], [0], [0], [1], [0, 0, 1, 1], [], []>} : vector<32x768xbf16>, vector<768x256xbf16>, vector<32x256xf32> -> vector<32x256xf32>
    %c0_25 = arith.constant 0 : index
    %c0_26 = arith.constant 0 : index
    %37 = vector.load %arg13[%c0_25, %c0_26] : memref<1x256xf32, #tpu.memory_space<vmem>>, vector<1x256xf32>
    %38 = vector.broadcast %37 : vector<1x256xf32> to vector<32x256xf32>
    %39 = arith.addf %36, %38 : vector<32x256xf32>
    %cst_27 = arith.constant 0.000000e+00 : f32
    %40 = vector.broadcast %cst_27 : f32 to vector<32x256xf32>
    %41 = arith.maximumf %39, %40 : vector<32x256xf32>
    %c1_i32_28 = arith.constant 1 : i32
    %42 = tpu.dynamic_rotate %41 by %c1_i32_28 dim 0 : vector<32x256xf32>, i32 -> vector<32x256xf32>
    %c0_29 = arith.constant 0 : index
    %c0_30 = arith.constant 0 : index
    %c0_31 = arith.constant 0 : index
    %43 = vector.load %arg4[%c0_29, %c0_30, %c0_31] : memref<2x32x1xf32, #tpu.memory_space<vmem>>, vector<1x32x1xf32>
    %44 = vector.shape_cast %43 : vector<1x32x1xf32> to vector<32x1xf32>
    %45 = vector.broadcast %44 : vector<32x1xf32> to vector<32x256xf32>
    %46 = arith.mulf %42, %45 : vector<32x256xf32>
    %c31_i32_32 = arith.constant 31 : i32
    %47 = tpu.dynamic_rotate %41 by %c31_i32_32 dim 0 : vector<32x256xf32>, i32 -> vector<32x256xf32>
    %c1_33 = arith.constant 1 : index
    %c0_34 = arith.constant 0 : index
    %c0_35 = arith.constant 0 : index
    %48 = vector.load %arg4[%c1_33, %c0_34, %c0_35] : memref<2x32x1xf32, #tpu.memory_space<vmem>>, vector<1x32x1xf32>
    %49 = vector.shape_cast %48 : vector<1x32x1xf32> to vector<32x1xf32>
    %50 = vector.broadcast %49 : vector<32x1xf32> to vector<32x256xf32>
    %51 = arith.mulf %47, %50 : vector<32x256xf32>
    %52 = arith.truncf %46 : vector<32x256xf32> to vector<32x256xbf16>
    %53 = arith.truncf %41 : vector<32x256xf32> to vector<32x256xbf16>
    %54 = arith.truncf %51 : vector<32x256xf32> to vector<32x256xbf16>
    %55 = tpu.concatenate %52, %53, %54 in 1 : vector<32x256xbf16>, vector<32x256xbf16>, vector<32x256xbf16> -> vector<32x768xbf16>
    %c0_36 = arith.constant 0 : index
    %c0_37 = arith.constant 0 : index
    %56 = vector.load %arg8[%c0_36, %c0_37] : memref<768x256xbf16, #tpu.memory_space<vmem>>, vector<768x256xbf16>
    %cst_38 = arith.constant dense<0.000000e+00> : vector<32x256xf32>
    %57 = tpu.matmul %55, %56, %cst_38 {dimension_numbers = #tpu.dot_dimension_numbers<[1], [0], [0], [1], [0, 0, 1, 1], [], []>} : vector<32x768xbf16>, vector<768x256xbf16>, vector<32x256xf32> -> vector<32x256xf32>
    %c0_39 = arith.constant 0 : index
    %c0_40 = arith.constant 0 : index
    %58 = vector.load %arg14[%c0_39, %c0_40] : memref<1x256xf32, #tpu.memory_space<vmem>>, vector<1x256xf32>
    %59 = vector.broadcast %58 : vector<1x256xf32> to vector<32x256xf32>
    %60 = arith.addf %57, %59 : vector<32x256xf32>
    %cst_41 = arith.constant 0.000000e+00 : f32
    %61 = vector.broadcast %cst_41 : f32 to vector<32x256xf32>
    %62 = arith.maximumf %60, %61 : vector<32x256xf32>
    %c0_42 = arith.constant 0 : index
    %c0_43 = arith.constant 0 : index
    %c0_44 = arith.constant 0 : index
    %63 = vector.load %arg3[%c0_42, %c0_43, %c0_44] : memref<3x64x32xf32, #tpu.memory_space<vmem>>, vector<1x64x32xf32>
    %64 = vector.shape_cast %63 : vector<1x64x32xf32> to vector<64x32xf32>
    %cst_45 = arith.constant dense<0.000000e+00> : vector<64x256xf32>
    %65 = tpu.matmul %64, %62, %cst_45 {dimension_numbers = #tpu.dot_dimension_numbers<[1], [0], [0], [1], [0, 0, 1, 1], [], []>} : vector<64x32xf32>, vector<32x256xf32>, vector<64x256xf32> -> vector<64x256xf32>
    %66 = arith.truncf %65 : vector<64x256xf32> to vector<64x256xbf16>
    %c1_46 = arith.constant 1 : index
    %c0_47 = arith.constant 0 : index
    %c0_48 = arith.constant 0 : index
    %67 = vector.load %arg3[%c1_46, %c0_47, %c0_48] : memref<3x64x32xf32, #tpu.memory_space<vmem>>, vector<1x64x32xf32>
    %68 = vector.shape_cast %67 : vector<1x64x32xf32> to vector<64x32xf32>
    %cst_49 = arith.constant dense<0.000000e+00> : vector<64x256xf32>
    %69 = tpu.matmul %68, %62, %cst_49 {dimension_numbers = #tpu.dot_dimension_numbers<[1], [0], [0], [1], [0, 0, 1, 1], [], []>} : vector<64x32xf32>, vector<32x256xf32>, vector<64x256xf32> -> vector<64x256xf32>
    %70 = arith.truncf %69 : vector<64x256xf32> to vector<64x256xbf16>
    %c2_50 = arith.constant 2 : index
    %c0_51 = arith.constant 0 : index
    %c0_52 = arith.constant 0 : index
    %71 = vector.load %arg3[%c2_50, %c0_51, %c0_52] : memref<3x64x32xf32, #tpu.memory_space<vmem>>, vector<1x64x32xf32>
    %72 = vector.shape_cast %71 : vector<1x64x32xf32> to vector<64x32xf32>
    %cst_53 = arith.constant dense<0.000000e+00> : vector<64x256xf32>
    %73 = tpu.matmul %72, %62, %cst_53 {dimension_numbers = #tpu.dot_dimension_numbers<[1], [0], [0], [1], [0, 0, 1, 1], [], []>} : vector<64x32xf32>, vector<32x256xf32>, vector<64x256xf32> -> vector<64x256xf32>
    %74 = arith.truncf %73 : vector<64x256xf32> to vector<64x256xbf16>
    %75 = tpu.concatenate %66, %70, %74 in 1 : vector<64x256xbf16>, vector<64x256xbf16>, vector<64x256xbf16> -> vector<64x768xbf16>
    %c0_54 = arith.constant 0 : index
    %c0_55 = arith.constant 0 : index
    %76 = vector.load %arg9[%c0_54, %c0_55] : memref<768x128xbf16, #tpu.memory_space<vmem>>, vector<768x128xbf16>
    %cst_56 = arith.constant dense<0.000000e+00> : vector<64x128xf32>
    %77 = tpu.matmul %75, %76, %cst_56 {dimension_numbers = #tpu.dot_dimension_numbers<[1], [0], [0], [1], [0, 0, 1, 1], [], []>} : vector<64x768xbf16>, vector<768x128xbf16>, vector<64x128xf32> -> vector<64x128xf32>
    %c0_57 = arith.constant 0 : index
    %c0_58 = arith.constant 0 : index
    %78 = vector.load %arg15[%c0_57, %c0_58] : memref<1x128xf32, #tpu.memory_space<vmem>>, vector<1x128xf32>
    %79 = vector.broadcast %78 : vector<1x128xf32> to vector<64x128xf32>
    %80 = arith.addf %77, %79 : vector<64x128xf32>
    %cst_59 = arith.constant 0.000000e+00 : f32
    %81 = vector.broadcast %cst_59 : f32 to vector<64x128xf32>
    %82 = arith.maximumf %80, %81 : vector<64x128xf32>
    %c1_i32_60 = arith.constant 1 : i32
    %83 = tpu.dynamic_rotate %82 by %c1_i32_60 dim 0 : vector<64x128xf32>, i32 -> vector<64x128xf32>
    %c0_61 = arith.constant 0 : index
    %c0_62 = arith.constant 0 : index
    %c0_63 = arith.constant 0 : index
    %84 = vector.load %arg5[%c0_61, %c0_62, %c0_63] : memref<2x64x1xf32, #tpu.memory_space<vmem>>, vector<1x64x1xf32>
    %85 = vector.shape_cast %84 : vector<1x64x1xf32> to vector<64x1xf32>
    %86 = vector.broadcast %85 : vector<64x1xf32> to vector<64x128xf32>
    %87 = arith.mulf %83, %86 : vector<64x128xf32>
    %c63_i32 = arith.constant 63 : i32
    %88 = tpu.dynamic_rotate %82 by %c63_i32 dim 0 : vector<64x128xf32>, i32 -> vector<64x128xf32>
    %c1_64 = arith.constant 1 : index
    %c0_65 = arith.constant 0 : index
    %c0_66 = arith.constant 0 : index
    %89 = vector.load %arg5[%c1_64, %c0_65, %c0_66] : memref<2x64x1xf32, #tpu.memory_space<vmem>>, vector<1x64x1xf32>
    %90 = vector.shape_cast %89 : vector<1x64x1xf32> to vector<64x1xf32>
    %91 = vector.broadcast %90 : vector<64x1xf32> to vector<64x128xf32>
    %92 = arith.mulf %88, %91 : vector<64x128xf32>
    %93 = arith.truncf %87 : vector<64x128xf32> to vector<64x128xbf16>
    %94 = arith.truncf %82 : vector<64x128xf32> to vector<64x128xbf16>
    %95 = arith.truncf %92 : vector<64x128xf32> to vector<64x128xbf16>
    %96 = tpu.concatenate %93, %94, %95 in 1 : vector<64x128xbf16>, vector<64x128xbf16>, vector<64x128xbf16> -> vector<64x384xbf16>
    %c0_67 = arith.constant 0 : index
    %c0_68 = arith.constant 0 : index
    %97 = vector.load %arg10[%c0_67, %c0_68] : memref<384x128xbf16, #tpu.memory_space<vmem>>, vector<384x128xbf16>
    %cst_69 = arith.constant dense<0.000000e+00> : vector<64x128xf32>
    %98 = tpu.matmul %96, %97, %cst_69 {dimension_numbers = #tpu.dot_dimension_numbers<[1], [0], [0], [1], [0, 0, 1, 1], [], []>} : vector<64x384xbf16>, vector<384x128xbf16>, vector<64x128xf32> -> vector<64x128xf32>
    %c0_70 = arith.constant 0 : index
    %c0_71 = arith.constant 0 : index
    %99 = vector.load %arg16[%c0_70, %c0_71] : memref<1x128xf32, #tpu.memory_space<vmem>>, vector<1x128xf32>
    %100 = vector.broadcast %99 : vector<1x128xf32> to vector<64x128xf32>
    %101 = arith.addf %98, %100 : vector<64x128xf32>
    %cst_72 = arith.constant 0.000000e+00 : f32
    %102 = vector.broadcast %cst_72 : f32 to vector<64x128xf32>
    %103 = arith.maximumf %101, %102 : vector<64x128xf32>
    %c1_i32_73 = arith.constant 1 : i32
    %104 = tpu.dynamic_rotate %103 by %c1_i32_73 dim 0 : vector<64x128xf32>, i32 -> vector<64x128xf32>
    %c0_74 = arith.constant 0 : index
    %c0_75 = arith.constant 0 : index
    %c0_76 = arith.constant 0 : index
    %105 = vector.load %arg5[%c0_74, %c0_75, %c0_76] : memref<2x64x1xf32, #tpu.memory_space<vmem>>, vector<1x64x1xf32>
    %106 = vector.shape_cast %105 : vector<1x64x1xf32> to vector<64x1xf32>
    %107 = vector.broadcast %106 : vector<64x1xf32> to vector<64x128xf32>
    %108 = arith.mulf %104, %107 : vector<64x128xf32>
    %c63_i32_77 = arith.constant 63 : i32
    %109 = tpu.dynamic_rotate %103 by %c63_i32_77 dim 0 : vector<64x128xf32>, i32 -> vector<64x128xf32>
    %c1_78 = arith.constant 1 : index
    %c0_79 = arith.constant 0 : index
    %c0_80 = arith.constant 0 : index
    %110 = vector.load %arg5[%c1_78, %c0_79, %c0_80] : memref<2x64x1xf32, #tpu.memory_space<vmem>>, vector<1x64x1xf32>
    %111 = vector.shape_cast %110 : vector<1x64x1xf32> to vector<64x1xf32>
    %112 = vector.broadcast %111 : vector<64x1xf32> to vector<64x128xf32>
    %113 = arith.mulf %109, %112 : vector<64x128xf32>
    %114 = arith.truncf %108 : vector<64x128xf32> to vector<64x128xbf16>
    %115 = arith.truncf %103 : vector<64x128xf32> to vector<64x128xbf16>
    %116 = arith.truncf %113 : vector<64x128xf32> to vector<64x128xbf16>
    %117 = tpu.concatenate %114, %115, %116 in 1 : vector<64x128xbf16>, vector<64x128xbf16>, vector<64x128xbf16> -> vector<64x384xbf16>
    %c0_81 = arith.constant 0 : index
    %c0_82 = arith.constant 0 : index
    %118 = vector.load %arg11[%c0_81, %c0_82] : memref<384x128xbf16, #tpu.memory_space<vmem>>, vector<384x128xbf16>
    %cst_83 = arith.constant dense<0.000000e+00> : vector<64x128xf32>
    %119 = tpu.matmul %117, %118, %cst_83 {dimension_numbers = #tpu.dot_dimension_numbers<[1], [0], [0], [1], [0, 0, 1, 1], [], []>} : vector<64x384xbf16>, vector<384x128xbf16>, vector<64x128xf32> -> vector<64x128xf32>
    %120 = arith.negf %119 : vector<64x128xf32>
    %121 = math.exp %120 : vector<64x128xf32>
    %cst_84 = arith.constant 1.000000e+00 : f32
    %122 = vector.broadcast %cst_84 : f32 to vector<64x128xf32>
    %123 = arith.addf %122, %121 : vector<64x128xf32>
    %124 = arith.divf %122, %123 : vector<64x128xf32>
    %c0_85 = arith.constant 0 : index
    %c0_86 = arith.constant 0 : index
    %125 = vector.load %arg17[%c0_85, %c0_86] : memref<64x128xf32, #tpu.memory_space<vmem>>, vector<64x128xf32>
    tpu.vector_store %arg17[%c0_85, %c0_86], %124 {strides = array<i32>} : memref<64x128xf32, #tpu.memory_space<vmem>>, vector<64x128xf32>,
    return
  }
  func.func @transform_0(%arg0: i32) -> (i32, i32) {
    %c0_i32 = arith.constant 0 : i32
    %c0_i32_0 = arith.constant 0 : i32
    return %arg0, %c0_i32 : i32, i32
  }
  func.func @transform_1(%arg0: i32) -> (i32, i32, i32) {
    %c0_i32 = arith.constant 0 : i32
    %c0_i32_0 = arith.constant 0 : i32
    %c0_i32_1 = arith.constant 0 : i32
    %c0_i32_2 = arith.constant 0 : i32
    return %c0_i32, %c0_i32_0, %c0_i32_1 : i32, i32, i32
  }
  func.func @transform_2(%arg0: i32) -> (i32, i32, i32) {
    %c0_i32 = arith.constant 0 : i32
    %c0_i32_0 = arith.constant 0 : i32
    %c0_i32_1 = arith.constant 0 : i32
    %c0_i32_2 = arith.constant 0 : i32
    return %c0_i32, %c0_i32_0, %c0_i32_1 : i32, i32, i32
  }
  func.func @transform_3(%arg0: i32) -> (i32, i32, i32) {
    %c0_i32 = arith.constant 0 : i32
    %c0_i32_0 = arith.constant 0 : i32
    %c0_i32_1 = arith.constant 0 : i32
    %c0_i32_2 = arith.constant 0 : i32
    return %c0_i32, %c0_i32_0, %c0_i32_1 : i32, i32, i32
  }
  func.func @transform_4(%arg0: i32) -> (i32, i32, i32) {
    %c0_i32 = arith.constant 0 : i32
    %c0_i32_0 = arith.constant 0 : i32
    %c0_i32_1 = arith.constant 0 : i32
    %c0_i32_2 = arith.constant 0 : i32
    return %c0_i32, %c0_i32_0, %c0_i32_1 : i32, i32, i32
  }
  func.func @transform_5(%arg0: i32) -> (i32, i32) {
    %c0_i32 = arith.constant 0 : i32
    %c0_i32_0 = arith.constant 0 : i32
    %c0_i32_1 = arith.constant 0 : i32
    return %c0_i32, %c0_i32_0 : i32, i32
  }
  func.func @transform_6(%arg0: i32) -> (i32, i32) {
    %c0_i32 = arith.constant 0 : i32
    %c0_i32_0 = arith.constant 0 : i32
    %c0_i32_1 = arith.constant 0 : i32
    return %c0_i32, %c0_i32_0 : i32, i32
  }
  func.func @transform_7(%arg0: i32) -> (i32, i32) {
    %c0_i32 = arith.constant 0 : i32
    %c0_i32_0 = arith.constant 0 : i32
    %c0_i32_1 = arith.constant 0 : i32
    return %c0_i32, %c0_i32_0 : i32, i32
  }
  func.func @transform_8(%arg0: i32) -> (i32, i32) {
    %c0_i32 = arith.constant 0 : i32
    %c0_i32_0 = arith.constant 0 : i32
    %c0_i32_1 = arith.constant 0 : i32
    return %c0_i32, %c0_i32_0 : i32, i32
  }
  func.func @transform_9(%arg0: i32) -> (i32, i32) {
    %c0_i32 = arith.constant 0 : i32
    %c0_i32_0 = arith.constant 0 : i32
    %c0_i32_1 = arith.constant 0 : i32
    return %c0_i32, %c0_i32_0 : i32, i32
  }
  func.func @transform_10(%arg0: i32) -> (i32, i32) {
    %c0_i32 = arith.constant 0 : i32
    %c0_i32_0 = arith.constant 0 : i32
    %c0_i32_1 = arith.constant 0 : i32
    return %c0_i32, %c0_i32_0 : i32, i32
  }
  func.func @transform_11(%arg0: i32) -> (i32, i32) {
    %c0_i32 = arith.constant 0 : i32
    %c0_i32_0 = arith.constant 0 : i32
    %c0_i32_1 = arith.constant 0 : i32
    return %c0_i32, %c0_i32_0 : i32, i32
  }
  func.func @transform_12(%arg0: i32) -> (i32, i32) {
    %c0_i32 = arith.constant 0 : i32
    %c0_i32_0 = arith.constant 0 : i32
    %c0_i32_1 = arith.constant 0 : i32
    return %c0_i32, %c0_i32_0 : i32, i32
  }
  func.func @transform_13(%arg0: i32) -> (i32, i32) {
    %c0_i32 = arith.constant 0 : i32
    %c0_i32_0 = arith.constant 0 : i32
    %c0_i32_1 = arith.constant 0 : i32
    return %c0_i32, %c0_i32_0 : i32, i32
  }
  func.func @transform_14(%arg0: i32) -> (i32, i32) {
    %c0_i32 = arith.constant 0 : i32
    %c0_i32_0 = arith.constant 0 : i32
    %c0_i32_1 = arith.constant 0 : i32
    return %c0_i32, %c0_i32_0 : i32, i32
  }
  func.func @transform_15(%arg0: i32) -> (i32, i32) {
    %c0_i32 = arith.constant 0 : i32
    %c0_i32_0 = arith.constant 0 : i32
    %c0_i32_1 = arith.constant 0 : i32
    return %c0_i32, %c0_i32_0 : i32, i32
  }
  func.func @transform_16(%arg0: i32) -> (i32, i32) {
    %c0_i32 = arith.constant 0 : i32
    %c0_i32_0 = arith.constant 0 : i32
    return %arg0, %c0_i32 : i32, i32
  }
}

</mosaic_0001>

<bundles_post_ra>
// kernel: recovery_size_forward.1
= control target key start
LH: loop header
LB: loop body
LE: loop exit
PB: predicated region body
PF: predicated region fallthrough
CT: control target
= control target key end

     0   :  { %s7520_s0 = inlined_call_operand.vmem [shape: f32[16,256], index: 0, kind: input, shape index: {}]   ;;  %s7521_s1 = inlined_call_operand.vmem [shape: f32[3,32,16], index: 1, kind: input, shape index: {}]   ;;  %s7522_s2 = inlined_call_operand.vmem [shape: f32[3,64,32], index: 2, kind: input, shape index: {}]   ;;  %s7523_s3 = inlined_call_operand.vmem [shape: f32[2,32,1], index: 3, kind: input, shape index: {}]   ;;  %s7524_s4 = inlined_call_operand.vmem [shape: f32[2,64,1], index: 4, kind: input, shape index: {}]   ;;  %s7525_s5 = inlined_call_operand.vmem [shape: bf16[768,256], index: 5, kind: input, shape index: {}]   ;;  %s7526_s6 = inlined_call_operand.hbm [shape: bf16[768,256], index: 6, kind: input, shape index: {}]   ;;  %s7527_s7 = inlined_call_operand.hbm [shape: bf16[768,256], index: 7, kind: input, shape index: {}]   ;;  %s7528_s8 = inlined_call_operand.hbm [shape: bf16[768,128], index: 8, kind: input, shape index: {}]   ;;  %s7529_s9 = inlined_call_operand.hbm [shape: bf16[384,128], index: 9, kind: input, shape index: {}]   ;;  %s7530_s10 = inlined_call_operand.hbm [shape: bf16[384,128], index: 10, kind: input, shape index: {}]   ;;  %s7531_s11 = inlined_call_operand.vmem [shape: f32[1,256], index: 11, kind: input, shape index: {}]   ;;  %s7532_s12 = inlined_call_operand.vmem [shape: f32[1,256], index: 12, kind: input, shape index: {}]   ;;  %s7533_s13 = inlined_call_operand.vmem [shape: f32[1,256], index: 13, kind: input, shape index: {}]   ;;  %s7534_s14 = inlined_call_operand.vmem [shape: f32[1,128], index: 14, kind: input, shape index: {}]   ;;  %s7535_s15 = inlined_call_operand.vmem [shape: f32[1,128], index: 15, kind: input, shape index: {}]   ;;  %s7536_s16 = inlined_call_operand.vmem [shape: f32[64,128], index: 16, kind: output, shape index: {}]  }
   0x1   :  { %7538 = sst [smem:[#allocation13_spill]] %s7520_s0 }
   0x2   :  { %21 = vsyncpa [#allocation3], 0 }
   0x3   :  { %22 = vsyncpa [#allocation5], 0 }
   0x4   :  { %23 = vsyncpa [#allocation8], 0  ;;  %s6306_s21 = smov [#allocation4]  }
   0x5   :  { %s53_s22 = sshll.u32 %s6306_s21, 4  ;;  %s54_s22 = int_to_ptr.vmem [resolvable:$true] %s53_s22 }
   0x6   :  { %s6208_s23 = scalar_lea.vmem %s54_s22, 12288  ;;  %p6213_p1 = scmp.lt.s32.totalorder %s54_s22, %s54_s22 }
   0x7   :  { %p6209_p0 = scmp.ne.s32.totalorder %s54_s22, %s6208_s23  ;;  %p6214_p2 = scmp.lt.s32.totalorder %s6208_s23, %s6208_s23 }
   0x9   :  { %p6215_p3 = por %p6214_p2, %p6213_p1 }
   0xb   :  { %p6216_p4 = pnand %p6215_p3, %p6209_p0 }
   0xd   :  { %6219 = shalt.err (!%p6216_p4)
}
   0xe   :  { %s6307_s24 = smov 128   ;;  %s6308_s25 = smov 8  }
   0xf   :  { %59 = dma.hbm_to_vmem [thread:$0]  %s7527_s7, 12288, %s54_s22, [#allocation5], %s6307_s24, %s6307_s24, %s6308_s25  }
  0x10   :  { %s6309_s28 = smov [#allocation7]   ;;  %s6310_s30 = smov [#allocation2]  }
  0x11   :  { %s77_s29 = sshll.u32 %s6309_s28, 4  ;;  %s41_s0 = sshll.u32 %s6310_s30, 4  ;;  %s78_s29 = int_to_ptr.vmem [resolvable:$true] %s77_s29  ;;  %s42_s0 = int_to_ptr.vmem [resolvable:$true] %s41_s0 }
  0x12   :  { %s6228_s17 = scalar_lea.vmem %s78_s29, 3072  ;;  %p6233_p6 = scmp.lt.s32.totalorder %s78_s29, %s78_s29 }
  0x13   :  { %p6229_p5 = scmp.ne.s32.totalorder %s78_s29, %s6228_s17  ;;  %p6234_p7 = scmp.lt.s32.totalorder %s6228_s17, %s6228_s17 }
  0x15   :  { %p6235_p8 = por %p6234_p7, %p6233_p6 }
  0x17   :  { %p6236_p9 = pnand %p6235_p8, %p6229_p5 }
  0x19   :  { %6239 = shalt.err (!%p6236_p9)
}
  0x1a   :  { %s6311_s18 = smov 64   ;;  %s6312_s19 = smov 4  }
  0x1b   :  { %83 = dma.hbm_to_vmem [thread:$0]  %s7529_s9, 3072, %s78_s29, [#allocation8], %s6311_s18, %s6311_s18, %s6312_s19  }
  0x1c   :  { %s6248_s7 = scalar_lea.vmem %s42_s0, 12288  ;;  %p6253_p11 = scmp.lt.s32.totalorder %s42_s0, %s42_s0 }
  0x1d   :  { %p6249_p10 = scmp.ne.s32.totalorder %s42_s0, %s6248_s7  ;;  %p6254_p12 = scmp.lt.s32.totalorder %s6248_s7, %s6248_s7 }
  0x1f   :  { %p6255_p13 = por %p6254_p12, %p6253_p11 }
  0x21   :  { %p6256_p0 = pnand %p6255_p13, %p6249_p10 }
  0x23   :  { %6259 = shalt.err (!%p6256_p0)
}
  0x24   :  { %47 = dma.hbm_to_vmem [thread:$0]  %s7526_s6, 12288, %s42_s0, [#allocation3], %s6307_s24, %s6307_s24, %s6308_s25  }
  0x25   :  { %s6313_s26 = smov [#allocation6]   ;;  %s6314_s28 = smov [#allocation9]  }
  0x26   :  { %s65_s27 = sshll.u32 %s6313_s26, 4  ;;  %s89_s30 = sshll.u32 %s6314_s28, 4  ;;  %s66_s27 = int_to_ptr.vmem [resolvable:$true] %s65_s27  ;;  %s90_s30 = int_to_ptr.vmem [resolvable:$true] %s89_s30 }
  0x27   :  { %s6268_s17 = scalar_lea.vmem %s66_s27, 6144  ;;  %p6273_p2 = scmp.lt.s32.totalorder %s66_s27, %s66_s27 }
  0x28   :  { %p6269_p1 = scmp.ne.s32.totalorder %s66_s27, %s6268_s17  ;;  %p6274_p3 = scmp.lt.s32.totalorder %s6268_s17, %s6268_s17 }
  0x2a   :  { %p6275_p4 = por %p6274_p3, %p6273_p2 }
  0x2c   :  { %p6276_p5 = pnand %p6275_p4, %p6269_p1 }
  0x2e   :  { %6279 = shalt.err (!%p6276_p5)
}
  0x2f   :  { %71 = dma.hbm_to_vmem [thread:$0]  %s7528_s8, 6144, %s66_s27, [#allocation5], %s6311_s18, %s6311_s18, %s6312_s19  }
  0x30   :  { %s6288_s6 = scalar_lea.vmem %s90_s30, 3072  ;;  %p6293_p7 = scmp.lt.s32.totalorder %s90_s30, %s90_s30 }
  0x31   :  { %p6289_p6 = scmp.ne.s32.totalorder %s90_s30, %s6288_s6  ;;  %p6294_p8 = scmp.lt.s32.totalorder %s6288_s6, %s6288_s6 }
  0x33   :  { %p6295_p9 = por %p6294_p8, %p6293_p7 }
  0x35   :  { %p6296_p10 = pnand %p6295_p9, %p6289_p6 }
  0x37   :  { %6299 = shalt.err (!%p6296_p10)
}
  0x38   :  { %95 = dma.hbm_to_vmem [thread:$0]  %s7530_s10, 3072, %s90_s30, [#allocation8], %s6311_s18, %s6311_s18, %s6312_s19  }
  0x39   :  { %6300 = dma.done.wait [#allocation3], 12288  }
  0x3a   :  { %6301 = vsyncadd [#allocation3], 4294955008 }
  0x3b   :  { %6302 = dma.done.wait [#allocation5], 18432  }
  0x3c   :  { %6303 = vsyncadd [#allocation5], 4294948864 }
  0x3d   :  { %6304 = dma.done.wait [#allocation8], 6144  }
  0x3e   :  { %6305 = vsyncadd [#allocation8], 4294961152  ;;  %v6315_v0 = vmov 0.0   ;;  %s7539_s20 = sld [smem:[#allocation13_spill]]  ;;  %v126_v5 = vld [vmem:[%s7521_s1] sm:$0xff]  ;;  %vm130_vm0 = vcmask 130048  }
  0x3f   :  { %207 = vmatprep.mubr.f32.mxu0 %v6315_v0  ;;  %317 = vmatprep.mubr.f32.mxu1 %v6315_v0  ;;  %v4893_v6 = vld [vmem:[%s7521_s1 + $0x20] sm:$0xff]  ;;  %v127_v7 = vld [vmem:[%s7521_s1 + $0x8] sm:$0xff]  ;;  %v5642_v9 = vld [vmem:[%s7525_s5 + $0x74] ss:$8 sps:$4 sm:$0xff]   ;;  %vm2902_vm3 = vcmask 261120  }
  0x40   :  { %v4894_v8 = vld [vmem:[%s7521_s1 + $0x28] sm:$0xff]  ;;  %v5640_v10 = vld [vmem:[%s7525_s5 + $0x70] ss:$8 sps:$4 sm:$0xff]   ;;  %v5645_v14 = vld [vmem:[%s7525_s5 + $0x174] ss:$8 sps:$4 sm:$0xff]  }
  0x41   :  { %v5648_v11 = vld [vmem:[%s7525_s5 + $0x64] ss:$8 sps:$4 sm:$0xff]   ;;  %v128_v12 = vld [vmem:[%s7521_s1 + $0x10] sm:$0xff]  ;;  %v5646_v15 = vld [vmem:[%s7525_s5 + $0x60] ss:$8 sps:$4 sm:$0xff]  }
  0x42   :  { %v4895_v13 = vld [vmem:[%s7521_s1 + $0x30] sm:$0xff]  ;;  %v129_v17 = vld [vmem:[%s7521_s1 + $0x18] sm:$0xff]  ;;  %v5660_v20 = vld [vmem:[%s7525_s5 + $0x44] ss:$8 sps:$4 sm:$0xff]  }
  0x43   :  { %v5654_v16 = vld [vmem:[%s7525_s5 + $0x54] ss:$8 sps:$4 sm:$0xff]   ;;  %v5652_v19 = vld [vmem:[%s7525_s5 + $0x50] ss:$8 sps:$4 sm:$0xff]   ;;  %v4901_v21 = vld [vmem:[%s7521_s1 + $0x40] sm:$0xff] }
  0x44   :  { %v125_v1 = vld [vmem:[%s7539_s20 + $0x18] sm:$0xff]  ;;  %v124_v2 = vld [vmem:[%s7539_s20 + $0x10] sm:$0xff]  ;;  %v123_v3 = vld [vmem:[%s7539_s20 + $0x8] sm:$0xff] }
  0x45   :  { %171 = vmatprep.subr.mxu0 %v125_v1  ;;  %281 = vmatprep.subr.mxu1 %v125_v1  ;;  %v122_v4 = vld [vmem:[%s7539_s20] sm:$0xff]  ;;  %v4896_v18 = vld [vmem:[%s7521_s1 + $0x38] sm:$0xff]  ;;  %v4902_v26 = vld [vmem:[%s7521_s1 + $0x48] sm:$0xff] }
  0x46   :  { %172 = vmatpush1.msra.mxu0 %v124_v2  ;;  %282 = vmatpush1.msra.mxu1 %v124_v2  ;;  %v5643_v22 = vld [vmem:[%s7525_s5 + $0x170] ss:$8 sps:$4 sm:$0xff]   ;;  %v5651_v23 = vld [vmem:[%s7525_s5 + $0x164] ss:$8 sps:$4 sm:$0xff]   ;;  %v5658_v24 = vld [vmem:[%s7525_s5 + $0x40] ss:$8 sps:$4 sm:$0xff]  }
  0x47   :  { %173 = vmatprep.subr.mxu0 %v123_v3  ;;  %283 = vmatprep.subr.mxu1 %v123_v3  ;;  %v5666_v25 = vld [vmem:[%s7525_s5 + $0x34] ss:$8 sps:$4 sm:$0xff]   ;;  %v5649_v27 = vld [vmem:[%s7525_s5 + $0x160] ss:$8 sps:$4 sm:$0xff]   ;;  %v5664_v29 = vld [vmem:[%s7525_s5 + $0x30] ss:$8 sps:$4 sm:$0xff]  }
  0x48   :  { %174 = vmatpush1.msra.mxu0 %v122_v4  ;;  %284 = vmatpush1.msra.mxu1 %v122_v4  ;;  %v5657_v28 = vld [vmem:[%s7525_s5 + $0x154] ss:$8 sps:$4 sm:$0xff]   ;;  %v5672_v30 = vld [vmem:[%s7525_s5 + $0x24] ss:$8 sps:$4 sm:$0xff]   ;;  %v5655_v32 = vld [vmem:[%s7525_s5 + $0x150] ss:$8 sps:$4 sm:$0xff]  }
  0x49   :  { %4889 = vmatmul.mubr.msk.f32.vlgmr.msra.gmra.mxu0 %vm130_vm0, %v126_v5  ;;  %4897 = vmatmul.mubr.msk.f32.vlgmr.msra.gmra.mxu1 %vm130_vm0, %v4893_v6  ;;  %v4903_v31 = vld [vmem:[%s7521_s1 + $0x50] sm:$0xff]  ;;  %v5663_v33 = vld [vmem:[%s7525_s5 + $0x144] ss:$8 sps:$4 sm:$0xff]   ;;  %v5670_v34 = vld [vmem:[%s7525_s5 + $0x20] ss:$8 sps:$4 sm:$0xff]  }
  0x4a   :  { %213 = vmatprep.mubr.f32.mxu0 %v6315_v0  ;;  %323 = vmatprep.mubr.f32.mxu1 %v6315_v0  ;;  %v5678_v35 = vld [vmem:[%s7525_s5 + $0x14] ss:$8 sps:$4 sm:$0xff]   ;;  %v5661_v37 = vld [vmem:[%s7525_s5 + $0x140] ss:$8 sps:$4 sm:$0xff]   ;;  %v5676_v39 = vld [vmem:[%s7525_s5 + $0x10] ss:$8 sps:$4 sm:$0xff]  }
  0x4b   :  { %391 = vmatprep.subr.mxu0 %v125_v1  ;;  %1044 = vmatprep.subr.bf16.mxu1 %v5642_v9  ;;  %v4904_v36 = vld [vmem:[%s7521_s1 + $0x58] sm:$0xff]  ;;  %v5684_v40 = vld [vmem:[%s7525_s5 + $0x4] ss:$8 sps:$4 sm:$0xff]   ;;  %v5682_v43 = vld [vmem:[%s7525_s5] ss:$8 sps:$4 sm:$0xff]  }
  0x4c   :  { %392 = vmatpush1.msra.mxu0 %v124_v2  ;;  %1045 = vmatpush1.bf16.msra.mxu1 %v5640_v10  ;;  %v5669_v38 = vld [vmem:[%s7525_s5 + $0x134] ss:$8 sps:$4 sm:$0xff]   ;;  %v5667_v41 = vld [vmem:[%s7525_s5 + $0x130] ss:$8 sps:$4 sm:$0xff]   ;;  %v5675_v42 = vld [vmem:[%s7525_s5 + $0x124] ss:$8 sps:$4 sm:$0xff]  }
  0x4d   :  { %4890 = vmatmul.mubr.msk.f32.gmra.mxu0 %vm130_vm0, %v127_v7  ;;  %4898 = vmatmul.mubr.msk.f32.gmra.mxu1 %vm130_vm0, %v4894_v8  ;;  %v5690_v44 = vld [vmem:[%s7525_s5 + $0xf4] ss:$8 sps:$4 sm:$0xff]   ;;  %v5673_v45 = vld [vmem:[%s7525_s5 + $0x120] ss:$8 sps:$4 sm:$0xff]   ;;  %v5688_v47 = vld [vmem:[%s7525_s5 + $0xf0] ss:$8 sps:$4 sm:$0xff]  }
  0x4e   :  { %219 = vmatprep.mubr.f32.mxu0 %v6315_v0  ;;  %329 = vmatprep.mubr.f32.mxu1 %v6315_v0  ;;  %v5681_v46 = vld [vmem:[%s7525_s5 + $0x114] ss:$8 sps:$4 sm:$0xff]   ;;  %v5679_v48 = vld [vmem:[%s7525_s5 + $0x110] ss:$8 sps:$4 sm:$0xff]   ;;  %v5696_v49 = vld [vmem:[%s7525_s5 + $0xe4] ss:$8 sps:$4 sm:$0xff]  }
  0x4f   :  { %393 = vmatprep.subr.mxu0 %v123_v3  ;;  %1046 = vmatprep.subr.bf16.mxu1 %v5648_v11  ;;  %v5687_v50 = vld [vmem:[%s7525_s5 + $0x104] ss:$8 sps:$4 sm:$0xff]   ;;  %v5694_v51 = vld [vmem:[%s7525_s5 + $0xe0] ss:$8 sps:$4 sm:$0xff]   ;;  %v5702_v52 = vld [vmem:[%s7525_s5 + $0xd4] ss:$8 sps:$4 sm:$0xff]  }
  0x50   :  { %394 = vmatpush1.msra.mxu0 %v122_v4  ;;  %1047 = vmatpush1.bf16.msra.mxu1 %v5646_v15  ;;  %v5685_v53 = vld [vmem:[%s7525_s5 + $0x100] ss:$8 sps:$4 sm:$0xff]   ;;  %v5693_v54 = vld [vmem:[%s7525_s5 + $0x1f4] ss:$8 sps:$4 sm:$0xff]   ;;  %v5700_v55 = vld [vmem:[%s7525_s5 + $0xd0] ss:$8 sps:$4 sm:$0xff]  }
  0x51   :  { %4891 = vmatmul.mubr.msk.f32.gmra.mxu0 %vm130_vm0, %v128_v12  ;;  %4899 = vmatmul.mubr.msk.f32.gmra.mxu1 %vm130_vm0, %v4895_v13  ;;  %v5708_v56 = vld [vmem:[%s7525_s5 + $0xc4] ss:$8 sps:$4 sm:$0xff]   ;;  %v5691_v57 = vld [vmem:[%s7525_s5 + $0x1f0] ss:$8 sps:$4 sm:$0xff]   ;;  %v5706_v59 = vld [vmem:[%s7525_s5 + $0xc0] ss:$8 sps:$4 sm:$0xff]  }
  0x52   :  { %225 = vmatprep.mubr.f32.mxu0 %v6315_v0  ;;  %335 = vmatprep.mubr.f32.mxu1 %v6315_v0  ;;  %v5699_v58 = vld [vmem:[%s7525_s5 + $0x1e4] ss:$8 sps:$4 sm:$0xff]   ;;  %v5714_v60 = vld [vmem:[%s7525_s5 + $0xb4] ss:$8 sps:$4 sm:$0xff]   ;;  %v5697_v61 = vld [vmem:[%s7525_s5 + $0x1e0] ss:$8 sps:$4 sm:$0xff]  }
  0x53   :  { %1097 = vmatprep.subr.bf16.mxu0 %v5645_v14  ;;  %1048 = vmatprep.subr.bf16.mxu1 %v5654_v16  ;;  %v5705_v62 = vld [vmem:[%s7525_s5 + $0x1d4] ss:$8 sps:$4 sm:$0xff]   ;;  %v5712_v63 = vld [vmem:[%s7525_s5 + $0xb0] ss:$8 sps:$4 sm:$0xff]   ;;  %v5720_v1 = vld [vmem:[%s7525_s5 + $0xa4] ss:$8 sps:$4 sm:$0xff]  }
  0x54   :  { %1049 = vmatpush1.bf16.msra.mxu1 %v5652_v19  ;;  %v5703_v2 = vld [vmem:[%s7525_s5 + $0x1d0] ss:$8 sps:$4 sm:$0xff]   ;;  %v5711_v3 = vld [vmem:[%s7525_s5 + $0x1c4] ss:$8 sps:$4 sm:$0xff]   ;;  %v5718_v4 = vld [vmem:[%s7525_s5 + $0xa0] ss:$8 sps:$4 sm:$0xff]  }
  0x55   :  { %4892 = vmatmul.mubr.msk.f32.gmra.mxu0 %vm130_vm0, %v129_v17  ;;  %4900 = vmatmul.mubr.msk.f32.gmra.mxu1 %vm130_vm0, %v4896_v18  ;;  %v5709_v5 = vld [vmem:[%s7525_s5 + $0x1c0] ss:$8 sps:$4 sm:$0xff]   ;;  %v5717_v6 = vld [vmem:[%s7525_s5 + $0x1b4] ss:$8 sps:$4 sm:$0xff]   ;;  %v5715_v7 = vld [vmem:[%s7525_s5 + $0x1b0] ss:$8 sps:$4 sm:$0xff]  }
  0x56   :  { %427 = vmatprep.mubr.f32.mxu0 %v6315_v0  ;;  %1050 = vmatprep.subr.bf16.mxu1 %v5660_v20  ;;  %v5723_v8 = vld [vmem:[%s7525_s5 + $0x1a4] ss:$8 sps:$4 sm:$0xff]   ;;  %v5721_v9 = vld [vmem:[%s7525_s5 + $0x1a0] ss:$8 sps:$4 sm:$0xff]   ;;  %v5726_v10 = vld [vmem:[%s7525_s5 + $0x94] ss:$8 sps:$4 sm:$0xff]  }
  0x57   :  { %v5724_v11 = vld [vmem:[%s7525_s5 + $0x90] ss:$8 sps:$4 sm:$0xff]   ;;  %v5729_v12 = vld [vmem:[%s7525_s5 + $0x194] ss:$8 sps:$4 sm:$0xff]   ;;  %v5732_v14 = vld [vmem:[%s7525_s5 + $0x84] ss:$8 sps:$4 sm:$0xff]  }
  0x58   :  { %1051 = vmatpush1.bf16.msra.mxu1 %v5658_v24  ;;  %v5727_v13 = vld [vmem:[%s7525_s5 + $0x190] ss:$8 sps:$4 sm:$0xff]   ;;  %v5730_v15 = vld [vmem:[%s7525_s5 + $0x80] ss:$8 sps:$4 sm:$0xff]   ;;  %v5735_v16 = vld [vmem:[%s7525_s5 + $0x184] ss:$8 sps:$4 sm:$0xff]  }
  0x59   :  { %4905 = vmatmul.mubr.msk.f32.vlgmr.msra.gmra.mxu0 %vm130_vm0, %v4901_v21  ;;  %1052 = vmatprep.subr.bf16.mxu1 %v5666_v25  ;;  %v5738_v17 = vld [vmem:[%s7525_s5 + $0x274] ss:$8 sps:$4 sm:$0xff]   ;;  %v5733_v18 = vld [vmem:[%s7525_s5 + $0x180] ss:$8 sps:$4 sm:$0xff]   ;;  %v6316_v20 = vmov 0  }
  0x5a   :  { %433 = vmatprep.mubr.f32.mxu0 %v6315_v0  ;;  %1098 = vmatpush1.bf16.msra.mxu0 %v5643_v22  ;;  %v1230_v19 = vld [vmem:[%s7523_s3] sm:$0xff]  ;;  %v1231_v21 = vld [vmem:[%s7523_s3 + $0x8] sm:$0xff]  ;;  %v1232_v22 = vld [vmem:[%s7523_s3 + $0x10] sm:$0xff] }
  0x5b   :  { %1099 = vmatprep.subr.bf16.mxu0 %v5651_v23  ;;  %5638 = vset.pattern.permute.xlu0 %v6316_v20  ;;  %v1233_v23 = vld [vmem:[%s7523_s3 + $0x18] sm:$0xff]  ;;  %v5005_v24 = vld [vmem:[%s7523_s3 + $0x20] sm:$0xff]  ;;  %v5006_v25 = vld [vmem:[%s7523_s3 + $0x28] sm:$0xff] }
  0x5c   :  { %1053 = vmatpush1.bf16.msra.mxu1 %v5664_v29  ;;  %5639 = vset.pattern.permute.xlu1 %v6316_v20  ;;  %v3967_v29 = vld [vmem:[%s7524_s4 + $0x8] sm:$0xff] }
  0x5d   :  { %4906 = vmatmul.mubr.msk.f32.gmra.mxu0 %vm130_vm0, %v4902_v26  ;;  %1054 = vmatprep.subr.bf16.mxu1 %v5672_v30  ;;  %v5007_v26 = vld [vmem:[%s7523_s3 + $0x30] sm:$0xff]  ;;  %v5759_v20 = vld [vmem:[%s7525_s5 + $0x204] ss:$8 sps:$4 sm:$0xff]  }
  0x5e   :  { %439 = vmatprep.mubr.f32.mxu0 %v6315_v0  ;;  %1100 = vmatpush1.bf16.msra.mxu0 %v5649_v27  ;;  %v5008_v27 = vld [vmem:[%s7523_s3 + $0x38] sm:$0xff]  ;;  %v3968_v30 = vld [vmem:[%s7524_s4 + $0x10] sm:$0xff] }
  0x5f   :  { %1101 = vmatprep.subr.bf16.mxu0 %v5657_v28  ;;  %1236 = vperm.xlu0 %5638, %v1230_v19   ;;  %v3966_v28 = vld [vmem:[%s7524_s4] sm:$0xff]  ;;  %v5754_v19 = vld [vmem:[%s7525_s5 + $0x210] ss:$8 sps:$4 sm:$0xff]  }
  0x60   :  { %1055 = vmatpush1.bf16.msra.mxu1 %v5670_v34  ;;  %1246 = vperm.xlu1 %5639, %v1232_v22   ;;  %v5290_v34 = vld [vmem:[%s7524_s4 + $0x40] sm:$0xff]  ;;  %v5762_v22 = vld [vmem:[%s7525_s5 + $0x2f4] ss:$8 sps:$4 sm:$0xff]  }
  0x61   :  { %4907 = vmatmul.mubr.msk.f32.gmra.mxu0 %vm130_vm0, %v4903_v31  ;;  %1056 = vmatprep.subr.bf16.mxu1 %v5678_v35  ;;  %v3969_v31 = vld [vmem:[%s7524_s4 + $0x18] sm:$0xff]  ;;  %v5291_v35 = vld [vmem:[%s7524_s4 + $0x48] sm:$0xff] }
  0x62   :  { %445 = vmatprep.mubr.f32.mxu0 %v6315_v0  ;;  %1102 = vmatpush1.bf16.msra.mxu0 %v5655_v32  ;;  %v3970_v32 = vld [vmem:[%s7524_s4 + $0x20] sm:$0xff] }
  0x63   :  { %1103 = vmatprep.subr.bf16.mxu0 %v5663_v33  ;;  %1241 = vperm.xlu0 %5638, %v1231_v21   ;;  %v3971_v33 = vld [vmem:[%s7524_s4 + $0x28] sm:$0xff] }
  0x64   :  { %1057 = vmatpush1.bf16.msra.mxu1 %v5676_v39  ;;  %1251 = vperm.xlu1 %5639, %v1233_v23   ;;  %v5294_v39 = vld [vmem:[%s7524_s4 + $0x60] sm:$0xff]  ;;  %v5760_v23 = vld [vmem:[%s7525_s5 + $0x2f0] ss:$8 sps:$4 sm:$0xff]  }
  0x65   :  { %4908 = vmatmul.mubr.msk.f32.gmra.mxu0 %vm130_vm0, %v4904_v36  ;;  %1058 = vmatprep.subr.bf16.mxu1 %v5684_v40  ;;  %v5292_v36 = vld [vmem:[%s7524_s4 + $0x50] sm:$0xff]  ;;  %v5757_v21 = vld [vmem:[%s7525_s5 + $0x200] ss:$8 sps:$4 sm:$0xff]  }
  0x66   :  { %1104 = vmatpush1.bf16.msra.mxu0 %v5661_v37  ;;  %v5293_v37 = vld [vmem:[%s7524_s4 + $0x58] sm:$0xff]  ;;  %v5296_v40 = vld [vmem:[%s7524_s4 + $0x70] sm:$0xff] }
  0x67   :  { %1105 = vmatprep.subr.bf16.mxu0 %v5669_v38  ;;  %1286 = vperm.xlu0 %5638, %v5005_v24   ;;  %v3972_v38 = vld [vmem:[%s7524_s4 + $0x30] sm:$0xff]  ;;  %v5765_v24 = vld [vmem:[%s7525_s5 + $0x2e4] ss:$8 sps:$4 sm:$0xff]  }
  0x68   :  { %1059 = vmatpush1.bf16.msra.mxu1 %v5682_v43  ;;  %1291 = vperm.xlu1 %5639, %v5006_v25   ;;  %v5763_v25 = vld [vmem:[%s7525_s5 + $0x2e0] ss:$8 sps:$4 sm:$0xff]  }
  0x69   :  { %1060 = vmatprep.subr.bf16.mxu1 %v5690_v44 }
  0x6a   :  { %1106 = vmatpush1.bf16.msra.mxu0 %v5667_v41 }
  0x6b   :  { %1107 = vmatprep.subr.bf16.mxu0 %v5675_v42  ;;  %1296 = vperm.xlu0 %5638, %v5007_v26   ;;  %v5768_v26 = vld [vmem:[%s7525_s5 + $0x2d4] ss:$8 sps:$4 sm:$0xff]  }
  0x6c   :  { %1061 = vmatpush2.bf16.msra.mxu1 %v5688_v47  ;;  %1301 = vperm.xlu1 %5639, %v5008_v27   ;;  %v5766_v27 = vld [vmem:[%s7525_s5 + $0x2d0] ss:$8 sps:$4 sm:$0xff]  }
  0x6d   :  { %1062 = vmatprep.subr.bf16.mxu1 %v5696_v49 }
  0x6e   :  { %1108 = vmatpush1.bf16.msra.mxu0 %v5673_v45 }
  0x6f   :  { %1109 = vmatprep.subr.bf16.mxu0 %v5681_v46  ;;  %3976 = vperm.xlu0 %5638, %v3966_v28   ;;  %v5771_v28 = vld [vmem:[%s7525_s5 + $0x2c4] ss:$8 sps:$4 sm:$0xff]  }
  0x70   :  { %1063 = vmatpush2.bf16.msra.mxu1 %v5694_v51  ;;  %3981 = vperm.xlu1 %5639, %v3967_v29   ;;  %v5769_v29 = vld [vmem:[%s7525_s5 + $0x2c0] ss:$8 sps:$4 sm:$0xff]  }
  0x71   :  { %1064 = vmatprep.subr.bf16.mxu1 %v5702_v52  ;;  %v5736_v52 = vld [vmem:[%s7525_s5 + $0x270] ss:$8 sps:$4 sm:$0xff]  }
  0x72   :  { %1110 = vmatpush1.bf16.msra.mxu0 %v5679_v48 }
  0x73   :  { %1111 = vmatprep.subr.bf16.mxu0 %v5687_v50  ;;  %3986 = vperm.xlu0 %5638, %v3968_v30   ;;  %v5774_v30 = vld [vmem:[%s7525_s5 + $0x2b4] ss:$8 sps:$4 sm:$0xff]  }
  0x74   :  { %1065 = vmatpush2.bf16.msra.mxu1 %v5700_v55  ;;  %3991 = vperm.xlu1 %5639, %v3969_v31   ;;  %v5772_v31 = vld [vmem:[%s7525_s5 + $0x2b0] ss:$8 sps:$4 sm:$0xff]  }
  0x75   :  { %1066 = vmatprep.subr.bf16.mxu1 %v5708_v56 }
  0x76   :  { %1112 = vmatpush1.bf16.msra.mxu0 %v5685_v53 }
  0x77   :  { %1113 = vmatprep.subr.bf16.mxu0 %v5693_v54  ;;  %3996 = vperm.xlu0 %5638, %v3970_v32   ;;  %v5741_v54 = vld [vmem:[%s7525_s5 + $0x264] ss:$8 sps:$4 sm:$0xff]  }
  0x78   :  { %1067 = vmatpush2.bf16.msra.mxu1 %v5706_v59  ;;  %4001 = vperm.xlu1 %5639, %v3971_v33   ;;  %v5739_v59 = vld [vmem:[%s7525_s5 + $0x260] ss:$8 sps:$4 sm:$0xff]   ;;  %v5777_v32 = vld [vmem:[%s7525_s5 + $0x2a4] ss:$8 sps:$4 sm:$0xff]  }
  0x79   :  { %1068 = vmatprep.subr.bf16.mxu1 %v5714_v60  ;;  %v5744_v60 = vld [vmem:[%s7525_s5 + $0x254] ss:$8 sps:$4 sm:$0xff]  }
  0x7a   :  { %1114 = vmatpush2.bf16.msra.mxu0 %v5691_v57 }
  0x7b   :  { %1115 = vmatprep.subr.bf16.mxu0 %v5699_v58  ;;  %4049 = vperm.xlu0 %5638, %v5290_v34   ;;  %v5775_v34 = vld [vmem:[%s7525_s5 + $0x2a0] ss:$8 sps:$4 sm:$0xff]  }
  0x7c   :  { %1069 = vmatpush2.bf16.msra.mxu1 %v5712_v63  ;;  %4054 = vperm.xlu1 %5639, %v5291_v35   ;;  %v5780_v35 = vld [vmem:[%s7525_s5 + $0x294] ss:$8 sps:$4 sm:$0xff]  }
  0x7d   :  { %1070 = vmatprep.subr.bf16.mxu1 %v5720_v1 }
  0x7e   :  { %1116 = vmatpush2.bf16.msra.mxu0 %v5697_v61 }
  0x7f   :  { %1117 = vmatprep.subr.bf16.mxu0 %v5705_v62  ;;  %4059 = vperm.xlu0 %5638, %v5292_v36  }
  0x80   :  { %1071 = vmatpush2.bf16.msra.mxu1 %v5718_v4  ;;  %4064 = vperm.xlu1 %5639, %v5293_v37   ;;  %v5742_v4 = vld [vmem:[%s7525_s5 + $0x250] ss:$8 sps:$4 sm:$0xff]  }
  0x81   :  { %1072 = vmatprep.subr.bf16.mxu1 %v5726_v10  ;;  %v5745_v10 = vld [vmem:[%s7525_s5 + $0x240] ss:$8 sps:$4 sm:$0xff]   ;;  %v5778_v37 = vld [vmem:[%s7525_s5 + $0x290] ss:$8 sps:$4 sm:$0xff]  }
  0x82   :  { %1118 = vmatpush2.bf16.msra.mxu0 %v5703_v2 }
  0x83   :  { %1119 = vmatprep.subr.bf16.mxu0 %v5711_v3  ;;  %4006 = vperm.xlu0 %5638, %v3972_v38  }
  0x84   :  { %1073 = vmatpush2.bf16.msra.mxu1 %v5724_v11  ;;  %v5750_v11 = vld [vmem:[%s7525_s5 + $0x234] ss:$8 sps:$4 sm:$0xff]  }
  0x85   :  { %1074 = vmatprep.subr.bf16.mxu1 %v5732_v14  ;;  %v5748_v14 = vld [vmem:[%s7525_s5 + $0x230] ss:$8 sps:$4 sm:$0xff]  }
  0x86   :  { %1120 = vmatpush2.bf16.msra.mxu0 %v5709_v5 }
  0x87   :  { %1121 = vmatprep.subr.bf16.mxu0 %v5717_v6  ;;  %4069 = vperm.xlu0 %5638, %v5294_v39   ;;  %v5783_v39 = vld [vmem:[%s7525_s5 + $0x284] ss:$8 sps:$4 sm:$0xff]  }
  0x88   :  { %1075 = vmatpush2.bf16.msra.mxu1 %v5730_v15 }
  0x89   :  { %1150 = vmatprep.subr.bf16.mxu1 %v5738_v17  ;;  %v5751_v17 = vld [vmem:[%s7525_s5 + $0x220] ss:$8 sps:$4 sm:$0xff]  }
  0x8a   :  { %1122 = vmatpush2.bf16.msra.mxu0 %v5715_v7  ;;  %v5747_v7 = vld [vmem:[%s7525_s5 + $0x244] ss:$8 sps:$4 sm:$0xff]  }
  0x8b   :  { %1123 = vmatprep.subr.bf16.mxu0 %v5723_v8  ;;  %4079 = vperm.xlu0 %5638, %v5296_v40   ;;  %v5781_v40 = vld [vmem:[%s7525_s5 + $0x280] ss:$8 sps:$4 sm:$0xff]  }
  0x8e   :  { %1124 = vmatpush2.bf16.msra.mxu0 %v5721_v9 }
  0x8f   :  { %1125 = vmatprep.subr.bf16.mxu0 %v5729_v12 }
  0x92   :  { %1126 = vmatpush2.bf16.msra.mxu0 %v5727_v13 }
  0x93   :  { %1127 = vmatprep.subr.bf16.mxu0 %v5735_v16  ;;  %v5753_v16 = vld [vmem:[%s7525_s5 + $0x224] ss:$8 sps:$4 sm:$0xff]  }
  0x96   :  { %1128 = vmatpush2.bf16.msra.mxu0 %v5733_v18  ;;  %v5756_v18 = vld [vmem:[%s7525_s5 + $0x214] ss:$8 sps:$4 sm:$0xff]  }
 0x109   :  { %v209_v41 = vpop.f32.mrf.mxu0  ;;  %v319_v42 = vpop.f32.mrf.mxu1 }
 0x10b   :  { %v211_v43 = vpop.f32.mrf.mxu0  ;;  %v321_v44 = vpop.f32.mrf.mxu1 }
 0x10d   :  { %v215_v45 = vpop.f32.mrf.mxu0  ;;  %v325_v46 = vpop.f32.mrf.mxu1 }
 0x10e   :  { %v342_v48 = vpack.c.bf16 %v325_v46, %v319_v42  ;;  %v232_v53 = vpack.c.bf16 %v215_v45, %v209_v41  ;;  %v5295_v46 = vld [vmem:[%s7524_s4 + $0x68] sm:$0xff] }
 0x10f   :  { %v217_v47 = vpop.f32.mrf.mxu0  ;;  %v327_v49 = vpop.f32.mrf.mxu1 }
 0x110   :  { %v233_v50 = vpack.c.bf16 %v217_v47, %v211_v43  ;;  %v343_v51 = vpack.c.bf16 %v327_v49, %v321_v44  ;;  %v3973_v44 = vld [vmem:[%s7524_s4 + $0x38] sm:$0xff] }
 0x111   :  { %v221_v55 = vpop.f32.mrf.mxu0  ;;  %v331_v56 = vpop.f32.mrf.mxu1  ;;  %4011 = vperm.xlu1 %5639, %v3973_v44   ;;  %v5297_v47 = vld [vmem:[%s7524_s4 + $0x78] sm:$0xff]  ;;  %v5871_v44 = vld [vmem:[#allocation2 + $0xa0] ss:$8 sps:$4 sm:$0xff]  }
 0x112   :  { %1076 = vmatprep.mubr.bf16.mxu1 %v233_v50  ;;  %1129 = vmatprep.mubr.bf16.mxu0 %v343_v51  ;;  %v5786_v49 = vld [vmem:[#allocation2 + $0x174] ss:$8 sps:$4 sm:$0xff]   ;;  %v5789_v50 = vld [vmem:[#allocation2 + $0x164] ss:$8 sps:$4 sm:$0xff]   ;;  %v5793_v51 = vld [vmem:[#allocation2 + $0x70] ss:$8 sps:$4 sm:$0xff]  }
 0x113   :  { %1077 = vmatmul.mubr.bf16.vlgmr.msra.gmra.mxu1 %v232_v53  ;;  %1130 = vmatmul.mubr.bf16.vlgmr.msra.gmra.mxu0 %v342_v48  ;;  %v223_v57 = vpop.f32.mrf.mxu0  ;;  %v333_v58 = vpop.f32.mrf.mxu1  ;;  %v5784_v48 = vld [vmem:[#allocation2 + $0x170] ss:$8 sps:$4 sm:$0xff]   ;;  %v5787_v53 = vld [vmem:[#allocation2 + $0x160] ss:$8 sps:$4 sm:$0xff]  }
 0x114   :  { %1151 = vmatpush1.bf16.msra.mxu1 %v5736_v52  ;;  %v5795_v52 = vld [vmem:[#allocation2 + $0x74] ss:$8 sps:$4 sm:$0xff]  }
 0x115   :  { %1152 = vmatprep.subr.bf16.mxu1 %v5741_v54  ;;  %v227_v61 = vpop.f32.mrf.mxu0  ;;  %v337_v62 = vpop.f32.mrf.mxu1  ;;  %4074 = vperm.xlu1 %5639, %v5295_v46   ;;  %v5792_v54 = vld [vmem:[#allocation2 + $0x154] ss:$8 sps:$4 sm:$0xff]   ;;  %v5874_v46 = vld [vmem:[#allocation2 + $0x90] ss:$8 sps:$4 sm:$0xff]  }
 0x116   :  { %v234_v63 = vpack.c.bf16 %v227_v61, %v221_v55  ;;  %v344_v2 = vpack.c.bf16 %v337_v62, %v331_v56  ;;  %1912 = vmatprep.subr.bf16.mxu0 %v5795_v52  ;;  %v5801_v55 = vld [vmem:[#allocation2 + $0x64] ss:$8 sps:$4 sm:$0xff]   ;;  %v5799_v56 = vld [vmem:[#allocation2 + $0x60] ss:$8 sps:$4 sm:$0xff]   ;;  %v554_v52 = vlaneseq }
 0x117   :  { %v229_v1 = vpop.f32.mrf.mxu0  ;;  %v339_v3 = vpop.f32.mrf.mxu1  ;;  %1913 = vmatpush1.bf16.msra.mxu0 %v5793_v51  ;;  %v5813_v61 = vld [vmem:[#allocation2 + $0x44] ss:$8 sps:$4 sm:$0xff]   ;;  %v5796_v62 = vld [vmem:[#allocation2 + $0x140] ss:$8 sps:$4 sm:$0xff]  }
 0x118   :  { %1153 = vmatpush1.bf16.msra.mxu1 %v5739_v59  ;;  %v235_v5 = vpack.c.bf16 %v229_v1, %v223_v57  ;;  %v345_v6 = vpack.c.bf16 %v339_v3, %v333_v58  ;;  %1914 = vmatprep.subr.bf16.mxu0 %v5801_v55  ;;  %v5807_v57 = vld [vmem:[#allocation2 + $0x54] ss:$8 sps:$4 sm:$0xff]   ;;  %v5790_v58 = vld [vmem:[#allocation2 + $0x150] ss:$8 sps:$4 sm:$0xff]   ;;  %v5798_v59 = vld [vmem:[#allocation2 + $0x144] ss:$8 sps:$4 sm:$0xff]  }
 0x119   :  { %1154 = vmatprep.subr.bf16.mxu1 %v5744_v60  ;;  %v6774_v8 = vpop.f32.mrf.mxu0  ;;  %4084 = vperm.xlu1 %5639, %v5297_v47   ;;  %v5805_v60 = vld [vmem:[#allocation2 + $0x50] ss:$8 sps:$4 sm:$0xff]   ;;  %v5811_v1 = vld [vmem:[#allocation2 + $0x40] ss:$8 sps:$4 sm:$0xff]  }
 0x11a   :  { %1086 = vmatprep.mubr.bf16.mxu1 %v235_v5  ;;  %1139 = vmatprep.mubr.bf16.mxu0 %v345_v6  ;;  %v5802_v3 = vld [vmem:[#allocation2 + $0x130] ss:$8 sps:$4 sm:$0xff]   ;;  %v5825_v6 = vld [vmem:[#allocation2 + $0x24] ss:$8 sps:$4 sm:$0xff]   ;;  %v5877_v47 = vld [vmem:[#allocation2 + $0x80] ss:$8 sps:$4 sm:$0xff]  }
 0x11b   :  { %1087 = vmatmul.mubr.bf16.gmra.mxu1 %v234_v63  ;;  %1140 = vmatmul.mubr.bf16.gmra.mxu0 %v344_v2  ;;  %v431_v9 = vpop.f32.mrf.mxu0  ;;  %v5804_v63 = vld [vmem:[#allocation2 + $0x134] ss:$8 sps:$4 sm:$0xff]   ;;  %v5817_v5 = vld [vmem:[#allocation2 + $0x30] ss:$8 sps:$4 sm:$0xff]  }
 0x11c   :  { %1155 = vmatpush1.bf16.msra.mxu1 %v5742_v4  ;;  %1915 = vmatpush1.bf16.msra.mxu0 %v5799_v56  ;;  %v5819_v2 = vld [vmem:[#allocation2 + $0x34] ss:$8 sps:$4 sm:$0xff]   ;;  %v5810_v4 = vld [vmem:[#allocation2 + $0x124] ss:$8 sps:$4 sm:$0xff]  }
 0x11d   :  { %1156 = vmatprep.subr.bf16.mxu1 %v5747_v7  ;;  %v435_v12 = vpop.f32.mrf.mxu0  ;;  %1916 = vmatprep.subr.bf16.mxu0 %v5807_v57  ;;  %v5808_v7 = vld [vmem:[#allocation2 + $0x120] ss:$8 sps:$4 sm:$0xff]  }
 0x11e   :  { %v452_v43 = vpack.c.bf16 %v435_v12, %v6774_v8  ;;  %v5816_v8 = vld [vmem:[#allocation2 + $0x114] ss:$8 sps:$4 sm:$0xff]   ;;  %v5822_v12 = vld [vmem:[#allocation2 + $0x104] ss:$8 sps:$4 sm:$0xff]  }
 0x11f   :  { %v437_v13 = vpop.f32.mrf.mxu0 }
 0x120   :  { %1157 = vmatpush1.bf16.msra.mxu1 %v5745_v10  ;;  %v453_v15 = vpack.c.bf16 %v437_v13, %v431_v9  ;;  %1917 = vmatpush1.bf16.msra.mxu0 %v5805_v60  ;;  %v5823_v9 = vld [vmem:[#allocation2 + $0x20] ss:$8 sps:$4 sm:$0xff]   ;;  %v5831_v10 = vld [vmem:[#allocation2 + $0x14] ss:$8 sps:$4 sm:$0xff]   ;;  %v5829_v13 = vld [vmem:[#allocation2 + $0x10] ss:$8 sps:$4 sm:$0xff]  }
 0x121   :  { %1158 = vmatprep.subr.bf16.mxu1 %v5750_v11  ;;  %v441_v33 = vpop.f32.mrf.mxu0  ;;  %1918 = vmatprep.subr.bf16.mxu0 %v5813_v61  ;;  %v5814_v11 = vld [vmem:[#allocation2 + $0x110] ss:$8 sps:$4 sm:$0xff]  }
 0x122   :  { %1182 = vmatprep.mubr.bf16.mxu1 %v453_v15  ;;  %v5820_v15 = vld [vmem:[#allocation2 + $0x100] ss:$8 sps:$4 sm:$0xff]  }
 0x123   :  { %v443_v36 = vpop.f32.mrf.mxu0 }
 0x124   :  { %1159 = vmatpush1.bf16.msra.mxu1 %v5748_v14  ;;  %1919 = vmatpush1.bf16.msra.mxu0 %v5811_v1  ;;  %v5837_v14 = vld [vmem:[#allocation2 + $0x4] ss:$8 sps:$4 sm:$0xff]  }
 0x125   :  { %1160 = vmatprep.subr.bf16.mxu1 %v5753_v16  ;;  %v447_v38 = vpop.f32.mrf.mxu0  ;;  %1920 = vmatprep.subr.bf16.mxu0 %v5819_v2  ;;  %v5828_v16 = vld [vmem:[#allocation2 + $0x1f4] ss:$8 sps:$4 sm:$0xff]  }
 0x126   :  { %v454_v45 = vpack.c.bf16 %v447_v38, %v441_v33  ;;  %v5853_v33 = vld [vmem:[#allocation2 + $0xd0] ss:$8 sps:$4 sm:$0xff]  }
 0x127   :  { %v449_v41 = vpop.f32.mrf.mxu0  ;;  %v5862_v38 = vld [vmem:[#allocation2 + $0x190] ss:$8 sps:$4 sm:$0xff]  }
 0x128   :  { %1161 = vmatpush1.bf16.msra.mxu1 %v5751_v17  ;;  %v455_v42 = vpack.c.bf16 %v449_v41, %v443_v36  ;;  %1921 = vmatpush1.bf16.msra.mxu0 %v5817_v5  ;;  %v5835_v17 = vld [vmem:[#allocation2] ss:$8 sps:$4 sm:$0xff]   ;;  %v5864_v36 = vld [vmem:[#allocation2 + $0x194] ss:$8 sps:$4 sm:$0xff]   ;;  %v5865_v41 = vld [vmem:[#allocation2 + $0xb0] ss:$8 sps:$4 sm:$0xff]  }
 0x129   :  { %1162 = vmatprep.subr.bf16.mxu1 %v5756_v18  ;;  %1922 = vmatprep.subr.bf16.mxu0 %v5825_v6  ;;  %v5843_v18 = vld [vmem:[#allocation2 + $0xf4] ss:$8 sps:$4 sm:$0xff]  }
 0x12c   :  { %1163 = vmatpush1.bf16.msra.mxu1 %v5754_v19  ;;  %1923 = vmatpush1.bf16.msra.mxu0 %v5823_v9  ;;  %v5826_v19 = vld [vmem:[#allocation2 + $0x1f0] ss:$8 sps:$4 sm:$0xff]  }
 0x12d   :  { %1164 = vmatprep.subr.bf16.mxu1 %v5759_v20  ;;  %1924 = vmatprep.subr.bf16.mxu0 %v5831_v10  ;;  %v5834_v20 = vld [vmem:[#allocation2 + $0x1e4] ss:$8 sps:$4 sm:$0xff]  }
 0x130   :  { %1165 = vmatpush1.bf16.msra.mxu1 %v5757_v21  ;;  %1925 = vmatpush1.bf16.msra.mxu0 %v5829_v13  ;;  %v5841_v21 = vld [vmem:[#allocation2 + $0xf0] ss:$8 sps:$4 sm:$0xff]  }
 0x131   :  { %1166 = vmatprep.subr.bf16.mxu1 %v5762_v22  ;;  %1926 = vmatprep.subr.bf16.mxu0 %v5837_v14  ;;  %v5849_v22 = vld [vmem:[#allocation2 + $0xe4] ss:$8 sps:$4 sm:$0xff]   ;;  %v6874_v14 = vpop.permute.xlu1 %1246 }
 0x134   :  { %1167 = vmatpush2.bf16.msra.mxu1 %v5760_v23  ;;  %1927 = vmatpush1.bf16.msra.mxu0 %v5835_v17  ;;  %v5832_v23 = vld [vmem:[#allocation2 + $0x1e0] ss:$8 sps:$4 sm:$0xff]  }
 0x135   :  { %1168 = vmatprep.subr.bf16.mxu1 %v5765_v24  ;;  %1928 = vmatprep.subr.bf16.mxu0 %v5843_v18  ;;  %v5840_v24 = vld [vmem:[#allocation2 + $0x1d4] ss:$8 sps:$4 sm:$0xff]  }
 0x138   :  { %1169 = vmatpush2.bf16.msra.mxu1 %v5763_v25  ;;  %1929 = vmatpush2.bf16.msra.mxu0 %v5841_v21  ;;  %v5847_v25 = vld [vmem:[#allocation2 + $0xe0] ss:$8 sps:$4 sm:$0xff]  }
 0x139   :  { %1170 = vmatprep.subr.bf16.mxu1 %v5768_v26  ;;  %1930 = vmatprep.subr.bf16.mxu0 %v5849_v22  ;;  %v5838_v26 = vld [vmem:[#allocation2 + $0x1d0] ss:$8 sps:$4 sm:$0xff]   ;;  %v6876_v22 = vpop.permute.xlu0 %1236 }
 0x13c   :  { %1171 = vmatpush2.bf16.msra.mxu1 %v5766_v27  ;;  %v5846_v27 = vld [vmem:[#allocation2 + $0x1c4] ss:$8 sps:$4 sm:$0xff]   ;;  %1931 = vmatpush2.bf16.msra.mxu0 %v5847_v25 }
 0x13d   :  { %1172 = vmatprep.subr.bf16.mxu1 %v5771_v28  ;;  %v5844_v28 = vld [vmem:[#allocation2 + $0x1c0] ss:$8 sps:$4 sm:$0xff]  }
 0x140   :  { %1173 = vmatpush2.bf16.msra.mxu1 %v5769_v29  ;;  %v5852_v29 = vld [vmem:[#allocation2 + $0x1b4] ss:$8 sps:$4 sm:$0xff]  }
 0x141   :  { %1174 = vmatprep.subr.bf16.mxu1 %v5774_v30  ;;  %v5850_v30 = vld [vmem:[#allocation2 + $0x1b0] ss:$8 sps:$4 sm:$0xff]  }
 0x144   :  { %1175 = vmatpush2.bf16.msra.mxu1 %v5772_v31  ;;  %v5855_v31 = vld [vmem:[#allocation2 + $0xd4] ss:$8 sps:$4 sm:$0xff]  }
 0x145   :  { %1176 = vmatprep.subr.bf16.mxu1 %v5777_v32  ;;  %v5858_v32 = vld [vmem:[#allocation2 + $0x1a4] ss:$8 sps:$4 sm:$0xff]   ;;  %1932 = vmatprep.subr.bf16.mxu0 %v5855_v31 }
 0x146   :  { %1933 = vmatpush2.bf16.msra.mxu0 %v5853_v33 }
 0x148   :  { %1177 = vmatpush2.bf16.msra.mxu1 %v5775_v34  ;;  %v5856_v34 = vld [vmem:[#allocation2 + $0x1a0] ss:$8 sps:$4 sm:$0xff]  }
 0x149   :  { %1178 = vmatprep.subr.bf16.mxu1 %v5780_v35  ;;  %v5861_v35 = vld [vmem:[#allocation2 + $0xc4] ss:$8 sps:$4 sm:$0xff]  }
 0x14a   :  { %1934 = vmatprep.subr.bf16.mxu0 %v5861_v35 }
 0x14c   :  { %1179 = vmatpush2.bf16.msra.mxu1 %v5778_v37  ;;  %v5859_v37 = vld [vmem:[#allocation2 + $0xc0] ss:$8 sps:$4 sm:$0xff]  }
 0x14d   :  { %1180 = vmatprep.subr.bf16.mxu1 %v5783_v39  ;;  %1935 = vmatpush2.bf16.msra.mxu0 %v5859_v37  ;;  %v5867_v39 = vld [vmem:[#allocation2 + $0xb4] ss:$8 sps:$4 sm:$0xff]  }
 0x14e   :  { %1936 = vmatprep.subr.bf16.mxu0 %v5867_v39 }
 0x150   :  { %1181 = vmatpush2.bf16.msra.mxu1 %v5781_v40  ;;  %v5870_v40 = vld [vmem:[#allocation2 + $0x184] ss:$8 sps:$4 sm:$0xff]  }
 0x151   :  { %1965 = vmatprep.subr.bf16.mxu1 %v5786_v49  ;;  %1937 = vmatpush2.bf16.msra.mxu0 %v5865_v41  ;;  %v5882_v49 = vld [vmem:[#allocation2 + $0x274] ss:$8 sps:$4 sm:$0xff]  }
 0x153   :  { %1183 = vmatmul.mubr.bf16.vlgmr.msra.gmra.mxu1 %v452_v43  ;;  %v5873_v43 = vld [vmem:[#allocation2 + $0xa4] ss:$8 sps:$4 sm:$0xff]  }
 0x154   :  { %1192 = vmatprep.mubr.bf16.mxu1 %v455_v42  ;;  %1966 = vmatpush1.bf16.msra.mxu1 %v5784_v48  ;;  %v5868_v42 = vld [vmem:[#allocation2 + $0x180] ss:$8 sps:$4 sm:$0xff]   ;;  %v5879_v48 = vld [vmem:[#allocation2 + $0x84] ss:$8 sps:$4 sm:$0xff]  }
 0x155   :  { %1967 = vmatprep.subr.bf16.mxu1 %v5789_v50  ;;  %1938 = vmatprep.subr.bf16.mxu0 %v5873_v43 }
 0x156   :  { %1939 = vmatpush2.bf16.msra.mxu0 %v5871_v44  ;;  %v6888_v44 = vpop.permute.xlu0 %1241 }
 0x158   :  { %1968 = vmatpush1.bf16.msra.mxu1 %v5787_v53 }
 0x159   :  { %1969 = vmatprep.subr.bf16.mxu1 %v5792_v54  ;;  %v6861_v54 = vshrl.u32 %v554_v52, 7 }
 0x15b   :  { %1193 = vmatmul.mubr.bf16.gmra.mxu1 %v454_v45  ;;  %v5876_v45 = vld [vmem:[#allocation2 + $0x94] ss:$8 sps:$4 sm:$0xff]   ;;  %vm1270_vm1 = vcmp.lt.s32.totalorder %v6861_v54, 7  ;;  %vm1221_vm2 = vcmp.lt.s32.totalorder %v6861_v54, 1 }
 0x15c   :  { %1970 = vmatpush1.bf16.msra.mxu1 %v5790_v58  ;;  %1940 = vmatprep.subr.bf16.mxu0 %v5876_v45  ;;  %v6864_v58 = vsub.s32 0, %v6861_v54 }
 0x15d   :  { %1971 = vmatprep.subr.bf16.mxu1 %v5798_v59  ;;  %1941 = vmatpush2.bf16.msra.mxu0 %v5874_v46  ;;  %v552_v59 = vld [vmem:[%s7531_s11] sm:$0x3] }
 0x15e   :  { %1942 = vmatprep.subr.bf16.mxu0 %v5879_v48 }
 0x160   :  { %1972 = vmatpush1.bf16.msra.mxu1 %v5796_v62  ;;  %v557_v62 = vrot.slane %v552_v59, %v6864_v58 }
 0x161   :  { %1973 = vmatprep.subr.bf16.mxu1 %v5804_v63  ;;  %1943 = vmatpush2.bf16.msra.mxu0 %v5877_v47  ;;  %v6871_v63 = vsub.s32 1, %v6861_v54 }
 0x162   :  { %2018 = vmatprep.subr.bf16.mxu0 %v5882_v49 }
 0x164   :  { %1974 = vmatpush1.bf16.msra.mxu1 %v5802_v3 }
 0x165   :  { %1975 = vmatprep.subr.bf16.mxu1 %v5810_v4  ;;  %v561_v4 = vrot.slane %v552_v59, %v6871_v63 }
 0x168   :  { %1976 = vmatpush1.bf16.msra.mxu1 %v5808_v7 }
 0x169   :  { %1977 = vmatprep.subr.bf16.mxu1 %v5816_v8 }
 0x16c   :  { %1978 = vmatpush1.bf16.msra.mxu1 %v5814_v11 }
 0x16d   :  { %1979 = vmatprep.subr.bf16.mxu1 %v5822_v12 }
 0x170   :  { %1980 = vmatpush1.bf16.msra.mxu1 %v5820_v15 }
 0x171   :  { %1981 = vmatprep.subr.bf16.mxu1 %v5828_v16 }
 0x174   :  { %1982 = vmatpush2.bf16.msra.mxu1 %v5826_v19 }
 0x175   :  { %1983 = vmatprep.subr.bf16.mxu1 %v5834_v20 }
 0x178   :  { %1984 = vmatpush2.bf16.msra.mxu1 %v5832_v23 }
 0x179   :  { %1985 = vmatprep.subr.bf16.mxu1 %v5840_v24 }
 0x17c   :  { %1986 = vmatpush2.bf16.msra.mxu1 %v5838_v26 }
 0x17d   :  { %1987 = vmatprep.subr.bf16.mxu1 %v5846_v27 }
 0x180   :  { %1988 = vmatpush2.bf16.msra.mxu1 %v5844_v28 }
 0x181   :  { %1989 = vmatprep.subr.bf16.mxu1 %v5852_v29 }
 0x184   :  { %1990 = vmatpush2.bf16.msra.mxu1 %v5850_v30 }
 0x185   :  { %1991 = vmatprep.subr.bf16.mxu1 %v5858_v32 }
 0x188   :  { %1992 = vmatpush2.bf16.msra.mxu1 %v5856_v34  ;;  %v6881_v34 = vpop.permute.xlu1 %1251 }
 0x189   :  { %1993 = vmatprep.subr.bf16.mxu1 %v5864_v36 }
 0x18c   :  { %1994 = vmatpush2.bf16.msra.mxu1 %v5862_v38  ;;  %v6901_v59 = vpop.permute.xlu1 %1291 }
 0x18d   :  { %1995 = vmatprep.subr.bf16.mxu1 %v5870_v40 }
 0x190   :  { %1996 = vmatpush2.bf16.msra.mxu1 %v5868_v42 }
 0x1d3   :  { %v1078_v50 = vpop.f32.mrf.mxu1  ;;  %v1131_v55 = vpop.f32.mrf.mxu0 }
 0x1d4   :  { %v1079_v3 = vadd.f32 %v1078_v50, %v557_v62 }
 0x1d5   :  { %v1080_v51 = vpop.f32.mrf.mxu1  ;;  %v1133_v60 = vpop.f32.mrf.mxu0 }
 0x1d6   :  { %v1132_v8 = vadd.f32 %v1131_v55, %v1079_v3  ;;  %v1081_v10 = vadd.f32 %v1080_v51, %v561_v4 }
 0x1d7   :  { %v1082_v53 = vpop.f32.mrf.mxu1  ;;  %v1135_v1 = vpop.f32.mrf.mxu0 }
 0x1d8   :  { %v1083_v9 = vadd.f32 %v1082_v53, %v557_v62  ;;  %v1134_v18 = vadd.f32 %v1133_v60, %v1081_v10 }
 0x1d9   :  { %v1084_v56 = vpop.f32.mrf.mxu1  ;;  %v1137_v5 = vpop.f32.mrf.mxu0 }
 0x1da   :  { %v1085_v12 = vadd.f32 %v1084_v56, %v561_v4  ;;  %v1136_v17 = vadd.f32 %v1135_v1, %v1083_v9 }
 0x1db   :  { %v1088_v57 = vpop.f32.mrf.mxu1  ;;  %v1141_v6 = vpop.f32.mrf.mxu0 }
 0x1dc   :  { %v1089_v19 = vadd.f32 %v1088_v57, %v557_v62  ;;  %v1138_v21 = vadd.f32 %v1137_v5, %v1085_v12 }
 0x1dd   :  { %v1090_v61 = vpop.f32.mrf.mxu1  ;;  %v1143_v15 = vpop.f32.mrf.mxu0 }
 0x1de   :  { %v1091_v25 = vadd.f32 %v1090_v61, %v561_v4  ;;  %v1142_v32 = vadd.f32 %v1141_v6, %v1089_v19  ;;  %v6909_v6 = vpop.permute.xlu0 %1286 }
 0x1df   :  { %v1092_v2 = vpop.f32.mrf.mxu1  ;;  %v1145_v26 = vpop.f32.mrf.mxu0 }
 0x1e0   :  { %v1093_v29 = vadd.f32 %v1092_v2, %v557_v62  ;;  %v1144_v39 = vadd.f32 %v1143_v15, %v1091_v25 }
 0x1e1   :  { %v1094_v7 = vpop.f32.mrf.mxu1  ;;  %v1147_v40 = vpop.f32.mrf.mxu0 }
 0x1e2   :  { %v1095_v35 = vadd.f32 %v1094_v7, %v561_v4  ;;  %v1146_v45 = vadd.f32 %v1145_v26, %v1093_v29 }
 0x1e4   :  { %v1148_v51 = vadd.f32 %v1147_v40, %v1095_v35 }
 0x213   :  { %v1184_v11 = vpop.f32.mrf.mxu1 }
 0x214   :  { %v1185_v13 = vadd.f32 %v1184_v11, %v1132_v8 }
 0x215   :  { %v1186_v16 = vpop.f32.mrf.mxu1 }
 0x216   :  { %v1203_v23 = vmax.f32 %v1185_v13, 0.0  ;;  %v1187_v27 = vadd.f32 %v1186_v16, %v1134_v18  ;;  %v6928_v18 = vpop.permute.xlu1 %1301 }
 0x217   :  { %v1188_v20 = vpop.f32.mrf.mxu1 }
 0x218   :  { %v1189_v24 = vadd.f32 %v1188_v20, %v1136_v17  ;;  %v1262_v36 = vrot.slane %v1203_v23, 1  ;;  %v6886_v41 = vmax.f32 %v1187_v27, 0.0  ;;  %v1211_v2 = vrot.slane %v1203_v23, 7 }
 0x219   :  { %v1190_v28 = vpop.f32.mrf.mxu1 }
 0x21a   :  { %v6878_v30 = vmax.f32 %v1189_v24, 0.0  ;;  %v1191_v31 = vadd.f32 %v1190_v28, %v1138_v21  ;;  %v1212_v3 = vrot.slane %v6886_v41, 7 }
 0x21b   :  { %v1194_v33 = vpop.f32.mrf.mxu1 }
 0x21c   :  { %v1264_v37 = vrot.slane %v6878_v30, 1  ;;  %v6884_v38 = vmax.f32 %v1191_v31, 0.0  ;;  %v1195_v42 = vadd.f32 %v1194_v33, %v1142_v32  ;;  %v1316_v52 = vpack.c.bf16 %v6878_v30, %v1203_v23  ;;  %v6950_v33 = vpop.permute.xlu0 %1296 }
 0x21d   :  { %v1196_v43 = vpop.f32.mrf.mxu1  ;;  %v1213_v60 = vrot.slane %v6878_v30, 7 }
 0x21e   :  { %v1275_v46 = vsel %vm1270_vm1, %v1262_v36, %v1264_v37  ;;  %v6892_v47 = vmax.f32 %v1195_v42, 0.0  ;;  %v1197_v48 = vadd.f32 %v1196_v43, %v1144_v39  ;;  %v1317_v50 = vpack.c.bf16 %v6884_v38, %v6886_v41 }
 0x21f   :  { %v1198_v49 = vpop.f32.mrf.mxu1  ;;  %v1214_v61 = vrot.slane %v6884_v38, 7  ;;  %v6917_v11 = vmul.f32 %v6909_v6, %v1275_v46  ;;  %v1226_v12 = vsel %vm1221_vm2, %v1211_v2, %v1213_v60  ;;  %v1265_v42 = vrot.slane %v6884_v38, 1 }
 0x220   :  { %v1199_v53 = vadd.f32 %v1198_v49, %v1146_v45  ;;  %v1266_v55 = vrot.slane %v6892_v47, 1  ;;  %v6899_v56 = vmax.f32 %v1197_v48, 0.0  ;;  %1997 = vmatprep.mubr.bf16.mxu1 %v1317_v50  ;;  %v1256_v29 = vmul.f32 %v6888_v44, %v1226_v12  ;;  %v5885_v45 = vld [vmem:[#allocation2 + $0x264] ss:$8 sps:$4 sm:$0xff]  }
 0x221   :  { %v1200_v57 = vpop.f32.mrf.mxu1  ;;  %1998 = vmatmul.mubr.bf16.vlgmr.msra.gmra.mxu1 %v1316_v52  ;;  %v1227_v16 = vsel %vm1221_vm2, %v1212_v3, %v1214_v61  ;;  %v1215_v35 = vrot.slane %v6892_v47, 7  ;;  %v5897_v12 = vld [vmem:[#allocation2 + $0x224] ss:$8 sps:$4 sm:$0xff]  }
 0x222   :  { %v1209_v62 = vmax.f32 %v1199_v53, 0.0  ;;  %v1201_v1 = vadd.f32 %v1200_v57, %v1148_v51  ;;  %v1216_v4 = vrot.slane %v6899_v56, 7  ;;  %v1273_v5 = vsel %vm1270_vm1, %v1264_v37, %v1266_v55  ;;  %v5880_v37 = vld [vmem:[#allocation2 + $0x270] ss:$8 sps:$4 sm:$0xff]   ;;  %v5883_v51 = vld [vmem:[#allocation2 + $0x260] ss:$8 sps:$4 sm:$0xff]  }
 0x223   :  { %v6914_v10 = vmul.f32 %v6901_v59, %v1273_v5  ;;  %v1257_v28 = vmul.f32 %v6888_v44, %v1227_v16  ;;  %v1267_v30 = vrot.slane %v6899_v56, 1  ;;  %v1224_v52 = vsel %vm1221_vm2, %v1213_v60, %v1215_v35  ;;  %v5888_v53 = vld [vmem:[#allocation2 + $0x254] ss:$8 sps:$4 sm:$0xff]   ;;  %v5891_v60 = vld [vmem:[#allocation2 + $0x244] ss:$8 sps:$4 sm:$0xff]  }
 0x224   :  { %v1217_v7 = vrot.slane %v1209_v62, 7  ;;  %v1268_v8 = vrot.slane %v1209_v62, 1  ;;  %v6911_v9 = vmax.f32 %v1201_v1, 0.0  ;;  %v1318_v21 = vpack.c.bf16 %v1209_v62, %v6892_v47  ;;  %v5886_v1 = vld [vmem:[#allocation2 + $0x250] ss:$8 sps:$4 sm:$0xff]  }
 0x225   :  { %v1320_v17 = vpack.c.bf16 %v6914_v10, %v6917_v11  ;;  %v1225_v26 = vsel %vm1221_vm2, %v1214_v61, %v1216_v4  ;;  %v1263_v47 = vrot.slane %v6886_v41, 1  ;;  %v1274_v50 = vsel %vm1270_vm1, %v1265_v42, %v1267_v30  ;;  %v5889_v5 = vld [vmem:[#allocation2 + $0x240] ss:$8 sps:$4 sm:$0xff]   ;;  %v5898_v16 = vld [vmem:[#allocation2 + $0x210] ss:$8 sps:$4 sm:$0xff]  }
 0x226   :  { %v1228_v13 = vsel %vm1221_vm2, %v1217_v7, %v1211_v2  ;;  %v1218_v15 = vrot.slane %v6911_v9, 7  ;;  %v1277_v19 = vsel %vm1270_vm1, %v1268_v8, %v1262_v36  ;;  %v1319_v20 = vpack.c.bf16 %v6911_v9, %v6899_v56  ;;  %v5928_v41 = vld [vmem:[#allocation4 + $0x170] ss:$8 sps:$4 sm:$0xff]   ;;  %v5930_v56 = vld [vmem:[#allocation4 + $0x174] ss:$8 sps:$4 sm:$0xff]  }
 0x227   :  { %v1254_v23 = vmul.f32 %v6876_v22, %v1228_v13  ;;  %v6947_v31 = vmul.f32 %v6928_v18, %v1277_v19  ;;  %v1259_v39 = vmul.f32 %v6874_v14, %v1225_v26  ;;  %v1271_v40 = vsel %vm1270_vm1, %v1266_v55, %v1268_v8  ;;  %v5892_v8 = vld [vmem:[#allocation2 + $0x230] ss:$8 sps:$4 sm:$0xff]   ;;  %v5895_v13 = vld [vmem:[#allocation2 + $0x220] ss:$8 sps:$4 sm:$0xff]   ;;  %v5903_v19 = vld [vmem:[#allocation2 + $0x204] ss:$8 sps:$4 sm:$0xff]  }
 0x228   :  { %v1229_v24 = vsel %vm1221_vm2, %v1218_v15, %v1212_v3  ;;  %v1223_v25 = vsel %vm1221_vm2, %v1216_v4, %v1218_v15  ;;  %2007 = vmatprep.mubr.bf16.mxu1 %v1319_v20  ;;  %v6958_v46 = vmul.f32 %v6950_v33, %v1271_v40  ;;  %v1222_v49 = vsel %vm1221_vm2, %v1215_v35, %v1217_v7  ;;  %v5894_v7 = vld [vmem:[#allocation2 + $0x234] ss:$8 sps:$4 sm:$0xff]   ;;  %v5901_v20 = vld [vmem:[#allocation2 + $0x200] ss:$8 sps:$4 sm:$0xff]   ;;  %v5916_v35 = vld [vmem:[#allocation2 + $0x2b0] ss:$8 sps:$4 sm:$0xff]  }
 0x229   :  { %v1255_v27 = vmul.f32 %v6876_v22, %v1229_v24  ;;  %2008 = vmatmul.mubr.bf16.gmra.mxu1 %v1318_v21  ;;  %v1261_v32 = vmul.f32 %v6881_v34, %v1223_v25  ;;  %v1312_v43 = vpack.c.bf16 %v1256_v29, %v1254_v23  ;;  %v1260_v55 = vmul.f32 %v6881_v34, %v1222_v49  ;;  %v5900_v15 = vld [vmem:[#allocation2 + $0x214] ss:$8 sps:$4 sm:$0xff]   ;;  %v5904_v23 = vld [vmem:[#allocation2 + $0x2f0] ss:$8 sps:$4 sm:$0xff]   ;;  %v5909_v24 = vld [vmem:[#allocation2 + $0x2e4] ss:$8 sps:$4 sm:$0xff]  }
 0x22a   :  { %v1322_v38 = vpack.c.bf16 %v6947_v31, %v6958_v46  ;;  %v1276_v57 = vsel %vm1270_vm1, %v1263_v47, %v1265_v42  ;;  %v1307_v61 = vmul.f32 %v6901_v59, %v1274_v50  ;;  %v1258_v62 = vmul.f32 %v6874_v14, %v1224_v52  ;;  %v5906_v21 = vld [vmem:[#allocation2 + $0x2f4] ss:$8 sps:$4 sm:$0xff]   ;;  %v5907_v25 = vld [vmem:[#allocation2 + $0x2e0] ss:$8 sps:$4 sm:$0xff]   ;;  %v5922_v42 = vld [vmem:[#allocation2 + $0x290] ss:$8 sps:$4 sm:$0xff]  }
 0x22b   :  { %v1313_v36 = vpack.c.bf16 %v1257_v28, %v1255_v27  ;;  %v1315_v48 = vpack.c.bf16 %v1261_v32, %v1259_v39  ;;  %v1305_v2 = vmul.f32 %v6909_v6, %v1276_v57  ;;  %v5912_v26 = vld [vmem:[#allocation2 + $0x2d4] ss:$8 sps:$4 sm:$0xff]   ;;  %v5910_v27 = vld [vmem:[#allocation2 + $0x2d0] ss:$8 sps:$4 sm:$0xff]   ;;  %v5915_v28 = vld [vmem:[#allocation2 + $0x2c4] ss:$8 sps:$4 sm:$0xff]  }
 0x22c   :  { %v1314_v3 = vpack.c.bf16 %v1260_v55, %v1258_v62  ;;  %v5913_v29 = vld [vmem:[#allocation2 + $0x2c0] ss:$8 sps:$4 sm:$0xff]   ;;  %v5918_v32 = vld [vmem:[#allocation2 + $0x2b4] ss:$8 sps:$4 sm:$0xff]   ;;  %v1269_v40 = vrot.slane %v6911_v9, 1 }
 0x22d   :  { %1944 = vmatprep.mubr.bf16.mxu0 %v1313_v36  ;;  %v1321_v4 = vpack.c.bf16 %v1307_v61, %v1305_v2  ;;  %v5921_v36 = vld [vmem:[#allocation2 + $0x2a4] ss:$8 sps:$4 sm:$0xff]   ;;  %v5924_v39 = vld [vmem:[#allocation2 + $0x294] ss:$8 sps:$4 sm:$0xff]   ;;  %v5925_v49 = vld [vmem:[#allocation2 + $0x280] ss:$8 sps:$4 sm:$0xff]  }
 0x22e   :  { %1945 = vmatmul.mubr.bf16.vlgmr.msra.gmra.mxu0 %v1312_v43  ;;  %v5927_v43 = vld [vmem:[#allocation2 + $0x284] ss:$8 sps:$4 sm:$0xff]   ;;  %v5937_v52 = vld [vmem:[#allocation4 + $0x70] ss:$8 sps:$4 sm:$0xff]   ;;  %v5936_v55 = vld [vmem:[#allocation4 + $0x154] ss:$8 sps:$4 sm:$0xff]  }
 0x22f   :  { %2019 = vmatpush1.bf16.msra.mxu0 %v5880_v37  ;;  %1954 = vmatprep.mubr.bf16.mxu0 %v1315_v48  ;;  %v5919_v37 = vld [vmem:[#allocation2 + $0x2a0] ss:$8 sps:$4 sm:$0xff]   ;;  %v1272_v48 = vsel %vm1270_vm1, %v1267_v30, %v1269_v40  ;;  %v5933_v30 = vld [vmem:[#allocation4 + $0x164] ss:$8 sps:$4 sm:$0xff]   ;;  %v5934_v11 = vld [vmem:[#allocation4 + $0x150] ss:$8 sps:$4 sm:$0xff]  }
 0x230   :  { %2020 = vmatprep.subr.bf16.mxu0 %v5885_v45  ;;  %v1278_v45 = vsel %vm1270_vm1, %v1269_v40, %v1263_v47  ;;  %v1309_v9 = vmul.f32 %v6950_v33, %v1272_v48  ;;  %v5931_v47 = vld [vmem:[#allocation4 + $0x160] ss:$8 sps:$4 sm:$0xff]   ;;  %v5945_v57 = vld [vmem:[#allocation4 + $0x64] ss:$8 sps:$4 sm:$0xff]   ;;  %v5949_v46 = vld [vmem:[#allocation4 + $0x50] ss:$8 sps:$4 sm:$0xff]  }
 0x231   :  { %v1311_v50 = vmul.f32 %v6928_v18, %v1278_v45  ;;  %v5943_v10 = vld [vmem:[#allocation4 + $0x60] ss:$8 sps:$4 sm:$0xff]   ;;  %v5942_v31 = vld [vmem:[#allocation4 + $0x144] ss:$8 sps:$4 sm:$0xff]   ;;  %v5948_v62 = vld [vmem:[#allocation4 + $0x134] ss:$8 sps:$4 sm:$0xff]  }
 0x232   :  { %v5957_v61 = vld [vmem:[#allocation4 + $0x44] ss:$8 sps:$4 sm:$0xff]   ;;  %v5946_v2 = vld [vmem:[#allocation4 + $0x130] ss:$8 sps:$4 sm:$0xff]   ;;  %v5988_v40 = vld [vmem:[#allocation4 + $0x1c0] ss:$8 sps:$4 sm:$0xff]  }
 0x233   :  { %2021 = vmatpush1.bf16.msra.mxu0 %v5883_v51  ;;  %v1323_v51 = vpack.c.bf16 %v1311_v50, %v1309_v9  ;;  %v5999_v45 = vld [vmem:[#allocation4 + $0xd4] ss:$8 sps:$4 sm:$0xff]   ;;  %v6002_v48 = vld [vmem:[#allocation4 + $0x1a4] ss:$8 sps:$4 sm:$0xff]   ;;  %v6000_v50 = vld [vmem:[#allocation4 + $0x1a0] ss:$8 sps:$4 sm:$0xff]  }
 0x234   :  { %2022 = vmatprep.subr.bf16.mxu0 %v5888_v53  ;;  %v5939_v53 = vld [vmem:[#allocation4 + $0x74] ss:$8 sps:$4 sm:$0xff]   ;;  %v6005_v9 = vld [vmem:[#allocation4 + $0xc4] ss:$8 sps:$4 sm:$0xff]  }
 0x235   :  { %2727 = vmatprep.subr.bf16.mxu1 %v5939_v53  ;;  %v6012_v53 = vld [vmem:[#allocation4 + $0x180] ss:$8 sps:$4 sm:$0xff]  }
 0x236   :  { %1955 = vmatmul.mubr.bf16.gmra.mxu0 %v1314_v3  ;;  %2728 = vmatpush1.bf16.msra.mxu1 %v5937_v52  ;;  %v5963_v3 = vld [vmem:[#allocation4 + $0x34] ss:$8 sps:$4 sm:$0xff]   ;;  %v6009_v52 = vld [vmem:[#allocation4 + $0xb0] ss:$8 sps:$4 sm:$0xff]  }
 0x237   :  { %2023 = vmatpush1.bf16.msra.mxu0 %v5886_v1  ;;  %2050 = vmatprep.mubr.bf16.mxu0 %v1321_v4  ;;  %v5955_v1 = vld [vmem:[#allocation4 + $0x40] ss:$8 sps:$4 sm:$0xff]   ;;  %v5961_v4 = vld [vmem:[#allocation4 + $0x30] ss:$8 sps:$4 sm:$0xff]  }
 0x238   :  { %2024 = vmatprep.subr.bf16.mxu0 %v5891_v60  ;;  %2729 = vmatprep.subr.bf16.mxu1 %v5945_v57  ;;  %v5954_v60 = vld [vmem:[#allocation4 + $0x124] ss:$8 sps:$4 sm:$0xff]   ;;  %v6015_v57 = vld [vmem:[#allocation4 + $0xa0] ss:$8 sps:$4 sm:$0xff]  }
 0x23a   :  { %2730 = vmatpush1.bf16.msra.mxu1 %v5943_v10  ;;  %v6018_v10 = vld [vmem:[#allocation4 + $0x90] ss:$8 sps:$4 sm:$0xff]  }
 0x23b   :  { %2025 = vmatpush1.bf16.msra.mxu0 %v5889_v5  ;;  %v5952_v5 = vld [vmem:[#allocation4 + $0x120] ss:$8 sps:$4 sm:$0xff]  }
 0x23c   :  { %2026 = vmatprep.subr.bf16.mxu0 %v5894_v7  ;;  %v5969_v7 = vld [vmem:[#allocation4 + $0x24] ss:$8 sps:$4 sm:$0xff]  }
 0x23f   :  { %2027 = vmatpush1.bf16.msra.mxu0 %v5892_v8  ;;  %v5960_v8 = vld [vmem:[#allocation4 + $0x114] ss:$8 sps:$4 sm:$0xff]  }
 0x240   :  { %2028 = vmatprep.subr.bf16.mxu0 %v5897_v12  ;;  %v5967_v12 = vld [vmem:[#allocation4 + $0x20] ss:$8 sps:$4 sm:$0xff]  }
 0x243   :  { %2029 = vmatpush1.bf16.msra.mxu0 %v5895_v13  ;;  %v5958_v13 = vld [vmem:[#allocation4 + $0x110] ss:$8 sps:$4 sm:$0xff]  }
 0x244   :  { %2030 = vmatprep.subr.bf16.mxu0 %v5900_v15  ;;  %v5975_v15 = vld [vmem:[#allocation4 + $0x14] ss:$8 sps:$4 sm:$0xff]  }
 0x247   :  { %2031 = vmatpush1.bf16.msra.mxu0 %v5898_v16  ;;  %v5966_v16 = vld [vmem:[#allocation4 + $0x104] ss:$8 sps:$4 sm:$0xff]  }
 0x248   :  { %2032 = vmatprep.subr.bf16.mxu0 %v5903_v19  ;;  %v5973_v19 = vld [vmem:[#allocation4 + $0x10] ss:$8 sps:$4 sm:$0xff]  }
 0x24b   :  { %2033 = vmatpush1.bf16.msra.mxu0 %v5901_v20  ;;  %v5964_v20 = vld [vmem:[#allocation4 + $0x100] ss:$8 sps:$4 sm:$0xff]  }
 0x24c   :  { %2034 = vmatprep.subr.bf16.mxu0 %v5906_v21  ;;  %v5981_v21 = vld [vmem:[#allocation4 + $0x4] ss:$8 sps:$4 sm:$0xff]  }
 0x24f   :  { %2035 = vmatpush2.bf16.msra.mxu0 %v5904_v23  ;;  %v5972_v23 = vld [vmem:[#allocation4 + $0x1f4] ss:$8 sps:$4 sm:$0xff]  }
 0x250   :  { %2036 = vmatprep.subr.bf16.mxu0 %v5909_v24  ;;  %v5979_v24 = vld [vmem:[#allocation4] ss:$8 sps:$4 sm:$0xff]  }
 0x253   :  { %2037 = vmatpush2.bf16.msra.mxu0 %v5907_v25  ;;  %v5970_v25 = vld [vmem:[#allocation4 + $0x1f0] ss:$8 sps:$4 sm:$0xff]  }
 0x254   :  { %2038 = vmatprep.subr.bf16.mxu0 %v5912_v26  ;;  %v5987_v26 = vld [vmem:[#allocation4 + $0xf4] ss:$8 sps:$4 sm:$0xff]  }
 0x257   :  { %2039 = vmatpush2.bf16.msra.mxu0 %v5910_v27  ;;  %v5978_v27 = vld [vmem:[#allocation4 + $0x1e4] ss:$8 sps:$4 sm:$0xff]  }
 0x258   :  { %2040 = vmatprep.subr.bf16.mxu0 %v5915_v28  ;;  %v5985_v28 = vld [vmem:[#allocation4 + $0xf0] ss:$8 sps:$4 sm:$0xff]  }
 0x25b   :  { %2041 = vmatpush2.bf16.msra.mxu0 %v5913_v29  ;;  %v5976_v29 = vld [vmem:[#allocation4 + $0x1e0] ss:$8 sps:$4 sm:$0xff]  }
 0x25c   :  { %2042 = vmatprep.subr.bf16.mxu0 %v5918_v32  ;;  %v5993_v32 = vld [vmem:[#allocation4 + $0xe4] ss:$8 sps:$4 sm:$0xff]  }
 0x25f   :  { %2043 = vmatpush2.bf16.msra.mxu0 %v5916_v35  ;;  %v5984_v35 = vld [vmem:[#allocation4 + $0x1d4] ss:$8 sps:$4 sm:$0xff]  }
 0x260   :  { %2044 = vmatprep.subr.bf16.mxu0 %v5921_v36  ;;  %v5991_v36 = vld [vmem:[#allocation4 + $0xe0] ss:$8 sps:$4 sm:$0xff]  }
 0x263   :  { %2045 = vmatpush2.bf16.msra.mxu0 %v5919_v37  ;;  %v5982_v37 = vld [vmem:[#allocation4 + $0x1d0] ss:$8 sps:$4 sm:$0xff]  }
 0x264   :  { %2046 = vmatprep.subr.bf16.mxu0 %v5924_v39  ;;  %v5990_v39 = vld [vmem:[#allocation4 + $0x1c4] ss:$8 sps:$4 sm:$0xff]  }
 0x267   :  { %2047 = vmatpush2.bf16.msra.mxu0 %v5922_v42  ;;  %v5996_v42 = vld [vmem:[#allocation4 + $0x1b4] ss:$8 sps:$4 sm:$0xff]  }
 0x268   :  { %2048 = vmatprep.subr.bf16.mxu0 %v5927_v43  ;;  %v5994_v43 = vld [vmem:[#allocation4 + $0x1b0] ss:$8 sps:$4 sm:$0xff]  }
 0x26b   :  { %2049 = vmatpush2.bf16.msra.mxu0 %v5925_v49  ;;  %v5997_v49 = vld [vmem:[#allocation4 + $0xd0] ss:$8 sps:$4 sm:$0xff]  }
 0x26c   :  { %2780 = vmatprep.subr.bf16.mxu0 %v5930_v56  ;;  %v6006_v56 = vld [vmem:[#allocation4 + $0x190] ss:$8 sps:$4 sm:$0xff]  }
 0x26e   :  { %2051 = vmatmul.mubr.bf16.vlgmr.msra.gmra.mxu0 %v1320_v17  ;;  %v5951_v17 = vld [vmem:[#allocation4 + $0x54] ss:$8 sps:$4 sm:$0xff]  }
 0x26f   :  { %2060 = vmatprep.mubr.bf16.mxu0 %v1323_v51  ;;  %2781 = vmatpush1.bf16.msra.mxu0 %v5928_v41  ;;  %v6008_v51 = vld [vmem:[#allocation4 + $0x194] ss:$8 sps:$4 sm:$0xff]   ;;  %v6003_v41 = vld [vmem:[#allocation4 + $0xc0] ss:$8 sps:$4 sm:$0xff]  }
 0x270   :  { %2782 = vmatprep.subr.bf16.mxu0 %v5933_v30  ;;  %2731 = vmatprep.subr.bf16.mxu1 %v5951_v17  ;;  %v6011_v30 = vld [vmem:[#allocation4 + $0xb4] ss:$8 sps:$4 sm:$0xff]   ;;  %v6023_v17 = vld [vmem:[#allocation4 + $0x84] ss:$8 sps:$4 sm:$0xff]  }
 0x271   :  { %2732 = vmatpush1.bf16.msra.mxu1 %v5949_v46  ;;  %v6026_v46 = vld [vmem:[#allocation4 + $0x274] ss:$8 sps:$4 sm:$0xff]  }
 0x272   :  { %2733 = vmatprep.subr.bf16.mxu1 %v5957_v61 }
 0x273   :  { %2783 = vmatpush1.bf16.msra.mxu0 %v5931_v47  ;;  %v6014_v47 = vld [vmem:[#allocation4 + $0x184] ss:$8 sps:$4 sm:$0xff]  }
 0x274   :  { %2784 = vmatprep.subr.bf16.mxu0 %v5936_v55  ;;  %v6017_v55 = vld [vmem:[#allocation4 + $0xa4] ss:$8 sps:$4 sm:$0xff]  }
 0x275   :  { %2734 = vmatpush1.bf16.msra.mxu1 %v5955_v1 }
 0x276   :  { %2061 = vmatmul.mubr.bf16.gmra.mxu0 %v1322_v38  ;;  %v5940_v38 = vld [vmem:[#allocation4 + $0x140] ss:$8 sps:$4 sm:$0xff]   ;;  %2735 = vmatprep.subr.bf16.mxu1 %v5963_v3 }
 0x277   :  { %2785 = vmatpush1.bf16.msra.mxu0 %v5934_v11  ;;  %v6020_v11 = vld [vmem:[#allocation4 + $0x94] ss:$8 sps:$4 sm:$0xff]  }
 0x278   :  { %2786 = vmatprep.subr.bf16.mxu0 %v5942_v31  ;;  %v6021_v31 = vld [vmem:[#allocation4 + $0x80] ss:$8 sps:$4 sm:$0xff]  }
 0x279   :  { %2736 = vmatpush1.bf16.msra.mxu1 %v5961_v4  ;;  %v1420_v4 = vld [vmem:[%s7532_s12] sm:$0x3] }
 0x27a   :  { %2737 = vmatprep.subr.bf16.mxu1 %v5969_v7  ;;  %v1425_v7 = vrot.slane %v1420_v4, %v6864_v58 }
 0x27b   :  { %2787 = vmatpush1.bf16.msra.mxu0 %v5940_v38 }
 0x27c   :  { %2788 = vmatprep.subr.bf16.mxu0 %v5948_v62 }
 0x27d   :  { %2738 = vmatpush1.bf16.msra.mxu1 %v5967_v12 }
 0x27e   :  { %2739 = vmatprep.subr.bf16.mxu1 %v5975_v15 }
 0x27f   :  { %2789 = vmatpush1.bf16.msra.mxu0 %v5946_v2 }
 0x280   :  { %2790 = vmatprep.subr.bf16.mxu0 %v5954_v60 }
 0x281   :  { %2740 = vmatpush1.bf16.msra.mxu1 %v5973_v19 }
 0x282   :  { %2741 = vmatprep.subr.bf16.mxu1 %v5981_v21 }
 0x283   :  { %2791 = vmatpush1.bf16.msra.mxu0 %v5952_v5 }
 0x284   :  { %2792 = vmatprep.subr.bf16.mxu0 %v5960_v8 }
 0x285   :  { %2742 = vmatpush1.bf16.msra.mxu1 %v5979_v24 }
 0x286   :  { %2743 = vmatprep.subr.bf16.mxu1 %v5987_v26 }
 0x287   :  { %2793 = vmatpush1.bf16.msra.mxu0 %v5958_v13 }
 0x288   :  { %2794 = vmatprep.subr.bf16.mxu0 %v5966_v16  ;;  %v1429_v16 = vrot.slane %v1420_v4, %v6871_v63 }
 0x289   :  { %2744 = vmatpush2.bf16.msra.mxu1 %v5985_v28 }
 0x28a   :  { %2745 = vmatprep.subr.bf16.mxu1 %v5993_v32 }
 0x28b   :  { %2795 = vmatpush1.bf16.msra.mxu0 %v5964_v20 }
 0x28c   :  { %2796 = vmatprep.subr.bf16.mxu0 %v5972_v23 }
 0x28d   :  { %2746 = vmatpush2.bf16.msra.mxu1 %v5991_v36 }
 0x28e   :  { %2747 = vmatprep.subr.bf16.mxu1 %v5999_v45 }
 0x28f   :  { %2797 = vmatpush2.bf16.msra.mxu0 %v5970_v25 }
 0x290   :  { %2798 = vmatprep.subr.bf16.mxu0 %v5978_v27 }
 0x291   :  { %2748 = vmatpush2.bf16.msra.mxu1 %v5997_v49 }
 0x292   :  { %2749 = vmatprep.subr.bf16.mxu1 %v6005_v9 }
 0x293   :  { %2799 = vmatpush2.bf16.msra.mxu0 %v5976_v29 }
 0x294   :  { %2800 = vmatprep.subr.bf16.mxu0 %v5984_v35 }
 0x295   :  { %2750 = vmatpush2.bf16.msra.mxu1 %v6003_v41 }
 0x296   :  { %2751 = vmatprep.subr.bf16.mxu1 %v6011_v30 }
 0x297   :  { %2801 = vmatpush2.bf16.msra.mxu0 %v5982_v37 }
 0x298   :  { %2802 = vmatprep.subr.bf16.mxu0 %v5990_v39 }
 0x299   :  { %2752 = vmatpush2.bf16.msra.mxu1 %v6009_v52 }
 0x29a   :  { %2753 = vmatprep.subr.bf16.mxu1 %v6017_v55 }
 0x29b   :  { %2803 = vmatpush2.bf16.msra.mxu0 %v5988_v40 }
 0x29c   :  { %2804 = vmatprep.subr.bf16.mxu0 %v5996_v42 }
 0x29d   :  { %2754 = vmatpush2.bf16.msra.mxu1 %v6015_v57 }
 0x29e   :  { %2755 = vmatprep.subr.bf16.mxu1 %v6020_v11 }
 0x29f   :  { %2805 = vmatpush2.bf16.msra.mxu0 %v5994_v43 }
 0x2a0   :  { %2806 = vmatprep.subr.bf16.mxu0 %v6002_v48 }
 0x2a1   :  { %2756 = vmatpush2.bf16.msra.mxu1 %v6018_v10 }
 0x2a2   :  { %2757 = vmatprep.subr.bf16.mxu1 %v6023_v17 }
 0x2a3   :  { %2807 = vmatpush2.bf16.msra.mxu0 %v6000_v50 }
 0x2a4   :  { %2808 = vmatprep.subr.bf16.mxu0 %v6008_v51 }
 0x2a5   :  { %2758 = vmatpush2.bf16.msra.mxu1 %v6021_v31 }
 0x2a6   :  { %2833 = vmatprep.subr.bf16.mxu1 %v6026_v46 }
 0x2a7   :  { %2809 = vmatpush2.bf16.msra.mxu0 %v6006_v56 }
 0x2a8   :  { %2810 = vmatprep.subr.bf16.mxu0 %v6014_v47 }
 0x2ab   :  { %2811 = vmatpush2.bf16.msra.mxu0 %v6012_v53 }
 0x2e1   :  { %v1999_v2 = vpop.f32.mrf.mxu1 }
 0x2e3   :  { %v2001_v60 = vpop.f32.mrf.mxu1 }
 0x2e5   :  { %v2003_v8 = vpop.f32.mrf.mxu1 }
 0x2e7   :  { %v2005_v15 = vpop.f32.mrf.mxu1 }
 0x2e9   :  { %v2009_v23 = vpop.f32.mrf.mxu1 }
 0x2eb   :  { %v2011_v32 = vpop.f32.mrf.mxu1 }
 0x2ed   :  { %v2013_v51 = vpop.f32.mrf.mxu1 }
 0x2ee   :  { %v1946_v38 = vpop.f32.mrf.mxu0 }
 0x2ef   :  { %v1947_v13 = vadd.f32 %v1946_v38, %v1425_v7  ;;  %v2015_v46 = vpop.f32.mrf.mxu1 }
 0x2f0   :  { %v1948_v61 = vpop.f32.mrf.mxu0 }
 0x2f1   :  { %v2000_v21 = vadd.f32 %v1999_v2, %v1947_v13  ;;  %v1949_v25 = vadd.f32 %v1948_v61, %v1429_v16 }
 0x2f2   :  { %v1950_v62 = vpop.f32.mrf.mxu0 }
 0x2f3   :  { %v1951_v20 = vadd.f32 %v1950_v62, %v1425_v7  ;;  %v2002_v39 = vadd.f32 %v2001_v60, %v1949_v25 }
 0x2f4   :  { %v1952_v1 = vpop.f32.mrf.mxu0 }
 0x2f5   :  { %v1953_v26 = vadd.f32 %v1952_v1, %v1429_v16  ;;  %v2004_v29 = vadd.f32 %v2003_v8, %v1951_v20 }
 0x2f6   :  { %v1956_v3 = vpop.f32.mrf.mxu0 }
 0x2f7   :  { %v1957_v35 = vadd.f32 %v1956_v3, %v1425_v7  ;;  %v2006_v42 = vadd.f32 %v2005_v15, %v1953_v26 }
 0x2f8   :  { %v1958_v5 = vpop.f32.mrf.mxu0 }
 0x2f9   :  { %v1959_v43 = vadd.f32 %v1958_v5, %v1429_v16  ;;  %v2010_v41 = vadd.f32 %v2009_v23, %v1957_v35 }
 0x2fa   :  { %v1960_v12 = vpop.f32.mrf.mxu0 }
 0x2fb   :  { %v1961_v48 = vadd.f32 %v1960_v12, %v1425_v7  ;;  %v2012_v57 = vadd.f32 %v2011_v32, %v1959_v43 }
 0x2fc   :  { %v1962_v19 = vpop.f32.mrf.mxu0 }
 0x2fd   :  { %v1963_v30 = vadd.f32 %v1962_v19, %v1429_v16  ;;  %v2014_v31 = vadd.f32 %v2013_v51, %v1961_v48 }
 0x2ff   :  { %v2016_v3 = vadd.f32 %v2015_v46, %v1963_v30 }
 0x32e   :  { %v2052_v24 = vpop.f32.mrf.mxu0 }
 0x32f   :  { %v2053_v27 = vadd.f32 %v2052_v24, %v2000_v21 }
 0x330   :  { %v2054_v28 = vpop.f32.mrf.mxu0 }
 0x331   :  { %v7001_v37 = vmax.f32 %v2053_v27, 0.0  ;;  %v2055_v49 = vadd.f32 %v2054_v28, %v2002_v39 }
 0x332   :  { %v2056_v36 = vpop.f32.mrf.mxu0 }
 0x333   :  { %v2057_v40 = vadd.f32 %v2056_v36, %v2004_v29  ;;  %v2103_v47 = vrot.slane %v7001_v37, 1  ;;  %v7009_v11 = vmax.f32 %v2055_v49, 0.0  ;;  %v2079_v21 = vrot.slane %v7001_v37, 7 }
 0x334   :  { %v2058_v45 = vpop.f32.mrf.mxu0 }
 0x335   :  { %v7003_v50 = vmax.f32 %v2057_v40, 0.0  ;;  %v2059_v9 = vadd.f32 %v2058_v45, %v2006_v42  ;;  %v2080_v15 = vrot.slane %v7009_v11, 7 }
 0x336   :  { %v2062_v56 = vpop.f32.mrf.mxu0 }
 0x337   :  { %v2105_v52 = vrot.slane %v7003_v50, 1  ;;  %v7007_v53 = vmax.f32 %v2059_v9, 0.0  ;;  %v2063_v55 = vadd.f32 %v2062_v56, %v2010_v41  ;;  %v2131_v60 = vpack.c.bf16 %v7003_v50, %v7001_v37 }
 0x338   :  { %v2064_v10 = vpop.f32.mrf.mxu0  ;;  %v2081_v16 = vrot.slane %v7003_v50, 7 }
 0x339   :  { %v2115_v17 = vsel %vm1270_vm1, %v2103_v47, %v2105_v52  ;;  %v7013_v38 = vmax.f32 %v2063_v55, 0.0  ;;  %v2065_v61 = vadd.f32 %v2064_v10, %v2012_v57  ;;  %v2132_v2 = vpack.c.bf16 %v7007_v53, %v7009_v11  ;;  %v6029_v10 = vld [vmem:[#allocation4 + $0x264] ss:$8 sps:$4 sm:$0xff]  }
 0x33a   :  { %v2066_v62 = vpop.f32.mrf.mxu0  ;;  %v2082_v4 = vrot.slane %v7007_v53, 7  ;;  %v7035_v26 = vmul.f32 %v2115_v17, %v6909_v6  ;;  %v2091_v36 = vsel %vm1221_vm2, %v2079_v21, %v2081_v16 }
 0x33b   :  { %v2067_v1 = vadd.f32 %v2066_v62, %v2014_v31  ;;  %v2107_v5 = vrot.slane %v7013_v38, 1  ;;  %v7021_v7 = vmax.f32 %v2065_v61, 0.0  ;;  %2812 = vmatprep.mubr.bf16.mxu0 %v2132_v2  ;;  %v2097_v9 = vmul.f32 %v2091_v36, %v6888_v44  ;;  %v6027_v61 = vld [vmem:[#allocation4 + $0x260] ss:$8 sps:$4 sm:$0xff]   ;;  %v6032_v2 = vld [vmem:[#allocation4 + $0x254] ss:$8 sps:$4 sm:$0xff]  }
 0x33c   :  { %v2068_v8 = vpop.f32.mrf.mxu0  ;;  %2813 = vmatmul.mubr.bf16.vlgmr.msra.gmra.mxu0 %v2131_v60  ;;  %v2092_v27 = vsel %vm1221_vm2, %v2080_v15, %v2082_v4  ;;  %v2083_v56 = vrot.slane %v7013_v38, 7  ;;  %v6056_v36 = vld [vmem:[#allocation4 + $0x2d4] ss:$8 sps:$4 sm:$0xff]  }
 0x33d   :  { %v2077_v12 = vmax.f32 %v2067_v1, 0.0  ;;  %v2069_v13 = vadd.f32 %v2068_v8, %v2016_v3  ;;  %v2113_v19 = vsel %vm1270_vm1, %v2105_v52, %v2107_v5  ;;  %v2084_v20 = vrot.slane %v7021_v7, 7  ;;  %v6024_v52 = vld [vmem:[#allocation4 + $0x270] ss:$8 sps:$4 sm:$0xff]  }
 0x33e   :  { %v7030_v23 = vmul.f32 %v2113_v19, %v6901_v59  ;;  %v2098_v49 = vmul.f32 %v2092_v27, %v6888_v44  ;;  %v2108_v51 = vrot.slane %v7021_v7, 1  ;;  %v2089_v62 = vsel %vm1221_vm2, %v2081_v16, %v2083_v56  ;;  %v6030_v8 = vld [vmem:[#allocation4 + $0x250] ss:$8 sps:$4 sm:$0xff]   ;;  %v6038_v19 = vld [vmem:[#allocation4 + $0x234] ss:$8 sps:$4 sm:$0xff]  }
 0x33f   :  { %v2085_v24 = vrot.slane %v2077_v12, 7  ;;  %v7032_v25 = vmax.f32 %v2069_v13, 0.0  ;;  %v2109_v29 = vrot.slane %v2077_v12, 1  ;;  %v2090_v37 = vsel %vm1221_vm2, %v2082_v4, %v2084_v20  ;;  %v6045_v27 = vld [vmem:[#allocation4 + $0x200] ss:$8 sps:$4 sm:$0xff]  }
 0x340   :  { %v2135_v43 = vpack.c.bf16 %v7030_v23, %v7035_v26  ;;  %v2133_v45 = vpack.c.bf16 %v2077_v12, %v7013_v38  ;;  %v2100_v55 = vmul.f32 %v2090_v37, %v6874_v14  ;;  %v6054_v37 = vld [vmem:[#allocation4 + $0x2d0] ss:$8 sps:$4 sm:$0xff]  }
 0x341   :  { %v2093_v28 = vsel %vm1221_vm2, %v2085_v24, %v2079_v21  ;;  %v2086_v32 = vrot.slane %v7032_v25, 7  ;;  %v2134_v35 = vpack.c.bf16 %v7032_v25, %v7021_v7  ;;  %v2111_v41 = vsel %vm1270_vm1, %v2107_v5, %v2109_v29  ;;  %v6044_v21 = vld [vmem:[#allocation4 + $0x214] ss:$8 sps:$4 sm:$0xff]  }
 0x342   :  { %v2095_v39 = vmul.f32 %v2093_v28, %v6876_v22  ;;  %v2117_v17 = vsel %vm1270_vm1, %v2109_v29, %v2103_v47  ;;  %v7069_v44 = vmul.f32 %v2111_v41, %v6950_v33  ;;  %v2087_v46 = vsel %vm1221_vm2, %v2083_v56, %v2085_v24  ;;  %v6047_v24 = vld [vmem:[#allocation4 + $0x204] ss:$8 sps:$4 sm:$0xff]   ;;  %v6050_v28 = vld [vmem:[#allocation4 + $0x2f4] ss:$8 sps:$4 sm:$0xff]   ;;  %v6048_v29 = vld [vmem:[#allocation4 + $0x2f0] ss:$8 sps:$4 sm:$0xff]  }
 0x343   :  { %2822 = vmatprep.mubr.bf16.mxu0 %v2134_v35  ;;  %v2094_v40 = vsel %vm1221_vm2, %v2086_v32, %v2080_v15  ;;  %v2088_v42 = vsel %vm1221_vm2, %v2084_v20, %v2086_v32  ;;  %v7075_v38 = vmul.f32 %v2117_v17, %v6928_v18  ;;  %v2101_v3 = vmul.f32 %v2087_v46, %v6881_v34  ;;  %v6035_v15 = vld [vmem:[#allocation4 + $0x244] ss:$8 sps:$4 sm:$0xff]   ;;  %v6036_v20 = vld [vmem:[#allocation4 + $0x230] ss:$8 sps:$4 sm:$0xff]   ;;  %v6051_v35 = vld [vmem:[#allocation4 + $0x2e0] ss:$8 sps:$4 sm:$0xff]  }
 0x344   :  { %v2096_v48 = vmul.f32 %v2094_v40, %v6876_v22  ;;  %v2102_v50 = vmul.f32 %v2088_v42, %v6881_v34  ;;  %2823 = vmatmul.mubr.bf16.gmra.mxu0 %v2133_v45  ;;  %v2106_v22 = vrot.slane %v7007_v53, 1  ;;  %v2127_v57 = vpack.c.bf16 %v2097_v9, %v2095_v39  ;;  %v6033_v34 = vld [vmem:[#allocation4 + $0x240] ss:$8 sps:$4 sm:$0xff]   ;;  %v6053_v32 = vld [vmem:[#allocation4 + $0x2e4] ss:$8 sps:$4 sm:$0xff]  }
 0x345   :  { %2991 = vmatprep.mubr.f32.mxu0 %v6315_v0  ;;  %v2104_v53 = vrot.slane %v7009_v11, 1  ;;  %v2137_v1 = vpack.c.bf16 %v7075_v38, %v7069_v44  ;;  %v2099_v5 = vmul.f32 %v2089_v62, %v6874_v14  ;;  %v6039_v14 = vld [vmem:[#allocation4 + $0x220] ss:$8 sps:$4 sm:$0xff]   ;;  %v6059_v39 = vld [vmem:[#allocation4 + $0x2c4] ss:$8 sps:$4 sm:$0xff]   ;;  %v2110_v9 = vrot.slane %v7032_v25, 1 }
 0x346   :  { %v2128_v30 = vpack.c.bf16 %v2098_v49, %v2096_v48  ;;  %v2130_v31 = vpack.c.bf16 %v2102_v50, %v2100_v55  ;;  %v2114_v47 = vsel %vm1270_vm1, %v2106_v22, %v2108_v51  ;;  %v6057_v40 = vld [vmem:[#allocation4 + $0x2c0] ss:$8 sps:$4 sm:$0xff]   ;;  %v6062_v42 = vld [vmem:[#allocation4 + $0x2b4] ss:$8 sps:$4 sm:$0xff]   ;;  %v6060_v45 = vld [vmem:[#allocation4 + $0x2b0] ss:$8 sps:$4 sm:$0xff]  }
 0x347   :  { %v2116_v60 = vsel %vm1270_vm1, %v2104_v53, %v2106_v22  ;;  %v2122_v4 = vmul.f32 %v2114_v47, %v6901_v59  ;;  %v2129_v13 = vpack.c.bf16 %v2101_v3, %v2099_v5  ;;  %v6041_v59 = vld [vmem:[#allocation4 + $0x224] ss:$8 sps:$4 sm:$0xff]   ;;  %v6063_v49 = vld [vmem:[#allocation4 + $0x2a0] ss:$8 sps:$4 sm:$0xff]   ;;  %v6068_v50 = vld [vmem:[#allocation4 + $0x294] ss:$8 sps:$4 sm:$0xff]  }
 0x348   :  { %2759 = vmatprep.mubr.bf16.mxu1 %v2128_v30  ;;  %v2120_v12 = vmul.f32 %v2116_v60, %v6909_v6  ;;  %v6042_v6 = vld [vmem:[#allocation4 + $0x210] ss:$8 sps:$4 sm:$0xff]   ;;  %v6065_v48 = vld [vmem:[#allocation4 + $0x2a4] ss:$8 sps:$4 sm:$0xff]   ;;  %v2112_v30 = vsel %vm1270_vm1, %v2108_v51, %v2110_v9  ;;  %v6069_v55 = vld [vmem:[#allocation4 + $0x280] ss:$8 sps:$4 sm:$0xff]  }
 0x349   :  { %2760 = vmatmul.mubr.bf16.vlgmr.msra.gmra.mxu1 %v2127_v57  ;;  %v6066_v41 = vld [vmem:[#allocation4 + $0x290] ss:$8 sps:$4 sm:$0xff]   ;;  %v6071_v56 = vld [vmem:[#allocation4 + $0x284] ss:$8 sps:$4 sm:$0xff]   ;;  %v2124_v22 = vmul.f32 %v2112_v30, %v6950_v33  ;;  %v2235_v44 = vld [vmem:[%s7533_s13] sm:$0x3] }
 0x34a   :  { %2834 = vmatpush1.bf16.msra.mxu1 %v6024_v52  ;;  %2769 = vmatprep.mubr.bf16.mxu1 %v2130_v31  ;;  %v2136_v16 = vpack.c.bf16 %v2122_v4, %v2120_v12  ;;  %v2118_v52 = vsel %vm1270_vm1, %v2110_v9, %v2104_v53  ;;  %v2244_v3 = vrot.slane %v2235_v44, %v6871_v63 }
 0x34b   :  { %2835 = vmatprep.subr.bf16.mxu1 %v6029_v10  ;;  %v2126_v25 = vmul.f32 %v2118_v52, %v6928_v18 }
 0x34d   :  { %v2138_v57 = vpack.c.bf16 %v2126_v25, %v2124_v22  ;;  %v2894_v22 = vld [vmem:[%s7522_s2] sm:$0xff] }
 0x34e   :  { %2836 = vmatpush1.bf16.msra.mxu1 %v6027_v61  ;;  %v5225_v25 = vld [vmem:[%s7522_s2 + $0x80] sm:$0xff] }
 0x34f   :  { %2837 = vmatprep.subr.bf16.mxu1 %v6032_v2 }
 0x351   :  { %2770 = vmatmul.mubr.bf16.gmra.mxu1 %v2129_v13 }
 0x352   :  { %2838 = vmatpush1.bf16.msra.mxu1 %v6030_v8  ;;  %2865 = vmatprep.mubr.bf16.mxu1 %v2136_v16 }
 0x353   :  { %2839 = vmatprep.subr.bf16.mxu1 %v6035_v15 }
 0x356   :  { %2840 = vmatpush1.bf16.msra.mxu1 %v6033_v34 }
 0x357   :  { %2841 = vmatprep.subr.bf16.mxu1 %v6038_v19 }
 0x35a   :  { %2842 = vmatpush1.bf16.msra.mxu1 %v6036_v20 }
 0x35b   :  { %2843 = vmatprep.subr.bf16.mxu1 %v6041_v59 }
 0x35e   :  { %2844 = vmatpush1.bf16.msra.mxu1 %v6039_v14 }
 0x35f   :  { %2845 = vmatprep.subr.bf16.mxu1 %v6044_v21 }
 0x362   :  { %2846 = vmatpush1.bf16.msra.mxu1 %v6042_v6 }
 0x363   :  { %2847 = vmatprep.subr.bf16.mxu1 %v6047_v24 }
 0x366   :  { %2848 = vmatpush1.bf16.msra.mxu1 %v6045_v27 }
 0x367   :  { %2849 = vmatprep.subr.bf16.mxu1 %v6050_v28 }
 0x36a   :  { %2850 = vmatpush2.bf16.msra.mxu1 %v6048_v29 }
 0x36b   :  { %2851 = vmatprep.subr.bf16.mxu1 %v6053_v32 }
 0x36e   :  { %2852 = vmatpush2.bf16.msra.mxu1 %v6051_v35 }
 0x36f   :  { %2853 = vmatprep.subr.bf16.mxu1 %v6056_v36 }
 0x372   :  { %2854 = vmatpush2.bf16.msra.mxu1 %v6054_v37 }
 0x373   :  { %2855 = vmatprep.subr.bf16.mxu1 %v6059_v39 }
 0x376   :  { %2856 = vmatpush2.bf16.msra.mxu1 %v6057_v40 }
 0x377   :  { %2857 = vmatprep.subr.bf16.mxu1 %v6062_v42 }
 0x37a   :  { %2858 = vmatpush2.bf16.msra.mxu1 %v6060_v45 }
 0x37b   :  { %2859 = vmatprep.subr.bf16.mxu1 %v6065_v48 }
 0x37e   :  { %2860 = vmatpush2.bf16.msra.mxu1 %v6063_v49 }
 0x37f   :  { %2861 = vmatprep.subr.bf16.mxu1 %v6068_v50 }
 0x382   :  { %2862 = vmatpush2.bf16.msra.mxu1 %v6066_v41 }
 0x383   :  { %2863 = vmatprep.subr.bf16.mxu1 %v6071_v56 }
 0x386   :  { %2864 = vmatpush2.bf16.msra.mxu1 %v6069_v55 }
 0x389   :  { %2866 = vmatmul.mubr.bf16.vlgmr.msra.gmra.mxu1 %v2135_v43 }
 0x38a   :  { %2875 = vmatprep.mubr.bf16.mxu1 %v2138_v57  ;;  %v2895_v57 = vld [vmem:[%s7522_s2 + $0x8] sm:$0xff] }
 0x391   :  { %2876 = vmatmul.mubr.bf16.gmra.mxu1 %v2137_v1  ;;  %v2240_v1 = vrot.slane %v2235_v44, %v6864_v58  ;;  %v6073_v44 = vld [vmem:[#allocation6 + $0x38] sm:$0xff]  }
 0x392   :  { %3299 = vmatprep.mubr.f32.mxu1 %v6315_v0 }
 0x3fc   :  { %v2814_v33 = vpop.f32.mrf.mxu0 }
 0x3fe   :  { %v2816_v18 = vpop.f32.mrf.mxu0 }
 0x400   :  { %v2818_v46 = vpop.f32.mrf.mxu0 }
 0x402   :  { %v2820_v47 = vpop.f32.mrf.mxu0 }
 0x404   :  { %v2824_v26 = vpop.f32.mrf.mxu0 }
 0x406   :  { %v2826_v38 = vpop.f32.mrf.mxu0 }
 0x408   :  { %v2828_v60 = vpop.f32.mrf.mxu0 }
 0x409   :  { %v2761_v11 = vpop.f32.mrf.mxu1 }
 0x40a   :  { %v2830_v34 = vpop.f32.mrf.mxu0  ;;  %v2762_v24 = vadd.f32 %v2761_v11, %v2240_v1  ;;  %v5226_v11 = vld [vmem:[%s7522_s2 + $0x88] sm:$0xff] }
 0x40b   :  { %v2763_v7 = vpop.f32.mrf.mxu1 }
 0x40c   :  { %v2764_v14 = vadd.f32 %v2763_v7, %v2244_v3  ;;  %v2815_v42 = vadd.f32 %v2814_v33, %v2762_v24  ;;  %v6072_v7 = vld [vmem:[#allocation6 + $0x78] sm:$0xff]   ;;  %v6087_v24 = vld [vmem:[#allocation6] sm:$0xff]  }
 0x40d   :  { %v2765_v51 = vpop.f32.mrf.mxu1  ;;  %v2897_v33 = vld [vmem:[%s7522_s2 + $0x18] sm:$0xff] }
 0x40e   :  { %v2766_v19 = vadd.f32 %v2765_v51, %v2240_v1  ;;  %v2817_v37 = vadd.f32 %v2816_v18, %v2764_v14  ;;  %v2896_v51 = vld [vmem:[%s7522_s2 + $0x10] sm:$0xff]  ;;  %v2898_v18 = vld [vmem:[%s7522_s2 + $0x20] sm:$0xff]  ;;  %v6084_v14 = vld [vmem:[#allocation6 + $0x48] sm:$0xff]  }
 0x40f   :  { %v2767_v10 = vpop.f32.mrf.mxu1 }
 0x410   :  { %v2768_v16 = vadd.f32 %v2767_v10, %v2244_v3  ;;  %v2819_v35 = vadd.f32 %v2818_v46, %v2766_v19  ;;  %v5227_v10 = vld [vmem:[%s7522_s2 + $0x90] sm:$0xff]  ;;  %v2899_v46 = vld [vmem:[%s7522_s2 + $0x28] sm:$0xff] }
 0x411   :  { %v2771_v17 = vpop.f32.mrf.mxu1  ;;  %v6083_v19 = vld [vmem:[#allocation6 + $0x10] sm:$0xff]  }
 0x412   :  { %v2772_v13 = vadd.f32 %v2771_v17, %v2240_v1  ;;  %v2821_v63 = vadd.f32 %v2820_v47, %v2768_v16  ;;  %v5228_v17 = vld [vmem:[%s7522_s2 + $0x98] sm:$0xff]  ;;  %v2900_v47 = vld [vmem:[%s7522_s2 + $0x30] sm:$0xff] }
 0x413   :  { %v2773_v31 = vpop.f32.mrf.mxu1  ;;  %v6082_v16 = vld [vmem:[#allocation6 + $0x50] sm:$0xff]  }
 0x414   :  { %v2774_v8 = vadd.f32 %v2773_v31, %v2244_v3  ;;  %v2825_v58 = vadd.f32 %v2824_v26, %v2772_v13  ;;  %v5229_v31 = vld [vmem:[%s7522_s2 + $0xa0] sm:$0xff]  ;;  %v2901_v26 = vld [vmem:[%s7522_s2 + $0x38] sm:$0xff] }
 0x415   :  { %v2775_v53 = vpop.f32.mrf.mxu1  ;;  %v5213_v13 = vld [vmem:[%s7522_s2 + $0x60] sm:$0xff] }
 0x416   :  { %v2776_v4 = vadd.f32 %v2775_v53, %v2240_v1  ;;  %v2827_v21 = vadd.f32 %v2826_v38, %v2774_v8  ;;  %v5230_v53 = vld [vmem:[%s7522_s2 + $0xa8] sm:$0xff]  ;;  %v6074_v38 = vld [vmem:[#allocation6 + $0x70] sm:$0xff]   ;;  %v6079_v8 = vld [vmem:[#allocation6 + $0x20] sm:$0xff]  }
 0x417   :  { %v2777_v23 = vpop.f32.mrf.mxu1  ;;  %v6075_v1 = vld [vmem:[#allocation6 + $0x30] sm:$0xff]  }
 0x418   :  { %v2778_v12 = vadd.f32 %v2777_v23, %v2244_v3  ;;  %v2829_v20 = vadd.f32 %v2828_v60, %v2776_v4  ;;  %v5231_v23 = vld [vmem:[%s7522_s2 + $0xb0] sm:$0xff]  ;;  %v6077_v60 = vld [vmem:[#allocation6 + $0x28] sm:$0xff]   ;;  %v6078_v4 = vld [vmem:[#allocation6 + $0x60] sm:$0xff]  }
 0x419   :  { %v5211_v3 = vld [vmem:[%s7522_s2 + $0x50] sm:$0xff] }
 0x41a   :  { %v2831_v6 = vadd.f32 %v2830_v34, %v2778_v12  ;;  %v6080_v12 = vld [vmem:[#allocation6 + $0x58] sm:$0xff]   ;;  %v5214_v34 = vld [vmem:[%s7522_s2 + $0x68] sm:$0xff] }
 0x449   :  { %v2867_v43 = vpop.f32.mrf.mxu1 }
 0x44a   :  { %v2868_v9 = vadd.f32 %v2867_v43, %v2815_v42  ;;  %v5232_v43 = vld [vmem:[%s7522_s2 + $0xb8] sm:$0xff]  ;;  %v6110_v42 = vld [vmem:[#allocation6 + $0x90] sm:$0xff]  }
 0x44b   :  { %v2869_v61 = vpop.f32.mrf.mxu1 }
 0x44c   :  { %v2870_v49 = vadd.f32 %v2869_v61, %v2817_v37  ;;  %v2886_v55 = vmax.f32 %v2868_v9, 0.0  ;;  %v5209_v61 = vld [vmem:[%s7522_s2 + $0x40] sm:$0xff]  ;;  %v6104_v37 = vld [vmem:[#allocation6 + $0xd8] sm:$0xff]  }
 0x44d   :  { %v2871_v62 = vpop.f32.mrf.mxu1 }
 0x44e   :  { %v2872_v45 = vadd.f32 %v2871_v62, %v2819_v35  ;;  %v2887_v52 = vmax.f32 %v2870_v49, 0.0  ;;  %v5210_v62 = vld [vmem:[%s7522_s2 + $0x48] sm:$0xff]  ;;  %v6100_v35 = vld [vmem:[#allocation6 + $0xe0] sm:$0xff]  }
 0x44f   :  { %v2873_v2 = vpop.f32.mrf.mxu1  ;;  %v6116_v49 = vld [vmem:[#allocation6 + $0xc0] sm:$0xff]  }
 0x450   :  { %v2874_v39 = vadd.f32 %v2873_v2, %v2821_v63  ;;  %v2888_v30 = vmax.f32 %v2872_v45, 0.0  ;;  %v6076_v2 = vld [vmem:[#allocation6 + $0x68] sm:$0xff]   ;;  %v6094_v63 = vld [vmem:[#allocation6 + $0xb0] sm:$0xff]  }
 0x451   :  { %v2877_v5 = vpop.f32.mrf.mxu1  ;;  %v6112_v45 = vld [vmem:[#allocation6 + $0xc8] sm:$0xff]  }
 0x452   :  { %v2878_v36 = vadd.f32 %v2877_v5, %v2825_v58  ;;  %v2889_v56 = vmax.f32 %v2874_v39, 0.0  ;;  %v5212_v5 = vld [vmem:[%s7522_s2 + $0x58] sm:$0xff] }
 0x453   :  { %v2879_v15 = vpop.f32.mrf.mxu1  ;;  %v6088_v58 = vld [vmem:[#allocation6 + $0xf8] sm:$0xff]  }
 0x454   :  { %v2880_v29 = vadd.f32 %v2879_v15, %v2827_v21  ;;  %v2890_v41 = vmax.f32 %v2878_v36, 0.0  ;;  %v6081_v15 = vld [vmem:[#allocation6 + $0x18] sm:$0xff]   ;;  %v6085_v21 = vld [vmem:[#allocation6 + $0x8] sm:$0xff]   ;;  %v6102_v36 = vld [vmem:[#allocation6 + $0xa0] sm:$0xff]  }
 0x455   :  { %v2881_v59 = vpop.f32.mrf.mxu1  ;;  %v6106_v39 = vld [vmem:[#allocation6 + $0x98] sm:$0xff]  }
 0x456   :  { %v2882_v27 = vadd.f32 %v2881_v59, %v2829_v20  ;;  %v2891_v50 = vmax.f32 %v2880_v29, 0.0  ;;  %v5215_v20 = vld [vmem:[%s7522_s2 + $0x70] sm:$0xff]  ;;  %v5216_v59 = vld [vmem:[%s7522_s2 + $0x78] sm:$0xff]  ;;  %v6096_v29 = vld [vmem:[#allocation6 + $0xe8] sm:$0xff]  }
 0x457   :  { %v2883_v28 = vpop.f32.mrf.mxu1 }
 0x458   :  { %v2884_v32 = vadd.f32 %v2883_v28, %v2831_v6  ;;  %v2892_v48 = vmax.f32 %v2882_v27, 0.0  ;;  %v6086_v6 = vld [vmem:[#allocation6 + $0x40] sm:$0xff]   ;;  %v6089_v27 = vld [vmem:[#allocation6 + $0x178] sm:$0xff]  }
 0x459   :  { %v6090_v28 = vld [vmem:[#allocation6 + $0xb8] sm:$0xff]  }
 0x45a   :  { %v2893_v40 = vmax.f32 %v2884_v32, 0.0  ;;  %v6098_v32 = vld [vmem:[#allocation6 + $0xa8] sm:$0xff]  }
 0x45c   :  { %2951 = vmatprep.subr.mxu0 %v2893_v40  ;;  %3259 = vmatprep.subr.mxu1 %v2893_v40 }
 0x45d   :  { %2952 = vmatpush1.msra.mxu0 %v2892_v48  ;;  %3260 = vmatpush1.msra.mxu1 %v2892_v48 }
 0x45e   :  { %2953 = vmatprep.subr.mxu0 %v2891_v50  ;;  %3261 = vmatprep.subr.mxu1 %v2891_v50 }
 0x45f   :  { %2954 = vmatpush1.msra.mxu0 %v2890_v41  ;;  %3262 = vmatpush1.msra.mxu1 %v2890_v41 }
 0x460   :  { %2955 = vmatprep.subr.mxu0 %v2889_v56  ;;  %3263 = vmatprep.subr.mxu1 %v2889_v56 }
 0x461   :  { %2956 = vmatpush1.msra.mxu0 %v2888_v30  ;;  %3264 = vmatpush1.msra.mxu1 %v2888_v30 }
 0x462   :  { %2957 = vmatprep.subr.mxu0 %v2887_v52  ;;  %3265 = vmatprep.subr.mxu1 %v2887_v52 }
 0x463   :  { %2958 = vmatpush1.msra.mxu0 %v2886_v55  ;;  %3266 = vmatpush1.msra.mxu1 %v2886_v55 }
 0x464   :  { %5201 = vmatmul.mubr.msk.f32.vlgmr.msra.gmra.mxu0 %vm2902_vm3, %v2894_v22  ;;  %3105 = vmatprep.subr.mxu0 %v2893_v40  ;;  %v6108_v40 = vld [vmem:[#allocation6 + $0xd0] sm:$0xff]  }
 0x465   :  { %3106 = vmatpush1.msra.mxu0 %v2892_v48  ;;  %2997 = vmatprep.mubr.f32.mxu0 %v6315_v0  ;;  %v6114_v48 = vld [vmem:[#allocation6 + $0x88] sm:$0xff]  }
 0x466   :  { %3107 = vmatprep.subr.mxu0 %v2891_v50  ;;  %5233 = vmatmul.mubr.msk.f32.vlgmr.msra.gmra.mxu1 %vm2902_vm3, %v5225_v25  ;;  %v6118_v50 = vld [vmem:[#allocation6 + $0x80] sm:$0xff]  }
 0x467   :  { %3108 = vmatpush1.msra.mxu0 %v2890_v41  ;;  %3305 = vmatprep.mubr.f32.mxu1 %v6315_v0 }
 0x468   :  { %5202 = vmatmul.mubr.msk.f32.gmra.mxu0 %vm2902_vm3, %v2895_v57  ;;  %3109 = vmatprep.subr.mxu0 %v2889_v56  ;;  %v6091_v57 = vld [vmem:[#allocation6 + $0x138] sm:$0xff]  }
 0x469   :  { %3110 = vmatpush1.msra.mxu0 %v2888_v30  ;;  %3003 = vmatprep.mubr.f32.mxu0 %v6315_v0 }
 0x46a   :  { %3111 = vmatprep.subr.mxu0 %v2887_v52  ;;  %5234 = vmatmul.mubr.msk.f32.gmra.mxu1 %vm2902_vm3, %v5226_v11 }
 0x46b   :  { %3112 = vmatpush1.msra.mxu0 %v2886_v55  ;;  %3311 = vmatprep.mubr.f32.mxu1 %v6315_v0 }
 0x46c   :  { %5203 = vmatmul.mubr.msk.f32.gmra.mxu0 %vm2902_vm3, %v2896_v51  ;;  %5355 = vmatprep.subr.bf16.mxu0 %v6072_v7  ;;  %v6093_v51 = vld [vmem:[#allocation6 + $0x170] sm:$0xff]  }
 0x46d   :  { %3009 = vmatprep.mubr.f32.mxu0 %v6315_v0  ;;  %5395 = vmatprep.subr.bf16.mxu1 %v6088_v58 }
 0x46e   :  { %5235 = vmatmul.mubr.msk.f32.gmra.mxu1 %vm2902_vm3, %v5227_v10 }
 0x46f   :  { %3317 = vmatprep.mubr.f32.mxu1 %v6315_v0  ;;  %5396 = vmatpush3.bf16.msra.mxu1 %v6090_v28 }
 0x470   :  { %5204 = vmatmul.mubr.msk.f32.gmra.mxu0 %vm2902_vm3, %v2897_v33 }
 0x471   :  { %3015 = vmatprep.mubr.f32.mxu0 %v6315_v0 }
 0x472   :  { %5236 = vmatmul.mubr.msk.f32.gmra.mxu1 %vm2902_vm3, %v5228_v17 }
 0x473   :  { %3323 = vmatprep.mubr.f32.mxu1 %v6315_v0 }
 0x474   :  { %5205 = vmatmul.mubr.msk.f32.gmra.mxu0 %vm2902_vm3, %v2898_v18  ;;  %v6095_v18 = vld [vmem:[#allocation6 + $0x130] sm:$0xff]  }
 0x475   :  { %3021 = vmatprep.mubr.f32.mxu0 %v6315_v0 }
 0x476   :  { %5237 = vmatmul.mubr.msk.f32.gmra.mxu1 %vm2902_vm3, %v5229_v31 }
 0x477   :  { %3329 = vmatprep.mubr.f32.mxu1 %v6315_v0 }
 0x478   :  { %5206 = vmatmul.mubr.msk.f32.gmra.mxu0 %vm2902_vm3, %v2899_v46  ;;  %v6097_v46 = vld [vmem:[#allocation6 + $0x168] sm:$0xff]  }
 0x479   :  { %3027 = vmatprep.mubr.f32.mxu0 %v6315_v0 }
 0x47a   :  { %5238 = vmatmul.mubr.msk.f32.gmra.mxu1 %vm2902_vm3, %v5230_v53 }
 0x47b   :  { %3335 = vmatprep.mubr.f32.mxu1 %v6315_v0 }
 0x47c   :  { %5207 = vmatmul.mubr.msk.f32.gmra.mxu0 %vm2902_vm3, %v2900_v47 }
 0x47d   :  { %3033 = vmatprep.mubr.f32.mxu0 %v6315_v0 }
 0x47e   :  { %5239 = vmatmul.mubr.msk.f32.gmra.mxu1 %vm2902_vm3, %v5231_v23 }
 0x47f   :  { %3341 = vmatprep.mubr.f32.mxu1 %v6315_v0 }
 0x480   :  { %5208 = vmatmul.mubr.msk.f32.gmra.mxu0 %vm2902_vm3, %v2901_v26  ;;  %v6099_v26 = vld [vmem:[#allocation6 + $0x128] sm:$0xff]  }
 0x481   :  { %3145 = vmatprep.mubr.f32.mxu0 %v6315_v0 }
 0x482   :  { %5240 = vmatmul.mubr.msk.f32.gmra.mxu1 %vm2902_vm3, %v5232_v43 }
 0x484   :  { %5217 = vmatmul.mubr.msk.f32.vlgmr.msra.gmra.mxu0 %vm2902_vm3, %v5209_v61 }
 0x485   :  { %3151 = vmatprep.mubr.f32.mxu0 %v6315_v0  ;;  %5356 = vmatpush3.bf16.msra.mxu0 %v6073_v44  ;;  %v6101_v44 = vld [vmem:[#allocation6 + $0x160] sm:$0xff]  }
 0x486   :  { %5357 = vmatprep.subr.bf16.mxu0 %v6074_v38 }
 0x488   :  { %5218 = vmatmul.mubr.msk.f32.gmra.mxu0 %vm2902_vm3, %v5210_v62 }
 0x489   :  { %3157 = vmatprep.mubr.f32.mxu0 %v6315_v0  ;;  %5358 = vmatpush3.bf16.msra.mxu0 %v6075_v1  ;;  %v6103_v1 = vld [vmem:[#allocation6 + $0x120] sm:$0xff]  }
 0x48a   :  { %5359 = vmatprep.subr.bf16.mxu0 %v6076_v2 }
 0x48c   :  { %5219 = vmatmul.mubr.msk.f32.gmra.mxu0 %vm2902_vm3, %v5211_v3  ;;  %v6105_v3 = vld [vmem:[#allocation6 + $0x158] sm:$0xff]  }
 0x48d   :  { %3163 = vmatprep.mubr.f32.mxu0 %v6315_v0  ;;  %5360 = vmatpush3.bf16.msra.mxu0 %v6077_v60 }
 0x48e   :  { %5361 = vmatprep.subr.bf16.mxu0 %v6078_v4 }
 0x490   :  { %5220 = vmatmul.mubr.msk.f32.gmra.mxu0 %vm2902_vm3, %v5212_v5 }
 0x491   :  { %3169 = vmatprep.mubr.f32.mxu0 %v6315_v0  ;;  %5362 = vmatpush3.bf16.msra.mxu0 %v6079_v8  ;;  %v6107_v8 = vld [vmem:[#allocation6 + $0x118] sm:$0xff]  }
 0x492   :  { %5363 = vmatprep.subr.bf16.mxu0 %v6080_v12 }
 0x494   :  { %5221 = vmatmul.mubr.msk.f32.gmra.mxu0 %vm2902_vm3, %v5213_v13 }
 0x495   :  { %3175 = vmatprep.mubr.f32.mxu0 %v6315_v0  ;;  %5364 = vmatpush3.bf16.msra.mxu0 %v6081_v15  ;;  %v6109_v15 = vld [vmem:[#allocation6 + $0x150] sm:$0xff]  }
 0x496   :  { %5365 = vmatprep.subr.bf16.mxu0 %v6082_v16 }
 0x498   :  { %5222 = vmatmul.mubr.msk.f32.gmra.mxu0 %vm2902_vm3, %v5214_v34 }
 0x499   :  { %3181 = vmatprep.mubr.f32.mxu0 %v6315_v0  ;;  %5366 = vmatpush3.bf16.msra.mxu0 %v6083_v19  ;;  %v6111_v19 = vld [vmem:[#allocation6 + $0x110] sm:$0xff]  }
 0x49a   :  { %5367 = vmatprep.subr.bf16.mxu0 %v6084_v14 }
 0x49c   :  { %5223 = vmatmul.mubr.msk.f32.gmra.mxu0 %vm2902_vm3, %v5215_v20 }
 0x49d   :  { %3187 = vmatprep.mubr.f32.mxu0 %v6315_v0  ;;  %5368 = vmatpush3.bf16.msra.mxu0 %v6085_v21  ;;  %v6092_v0 = vld [vmem:[#allocation6 + $0xf0] sm:$0xff]  }
 0x49e   :  { %5369 = vmatprep.subr.bf16.mxu0 %v6086_v6  ;;  %5397 = vmatprep.subr.bf16.mxu1 %v6092_v0  ;;  %v6117_v0 = vld [vmem:[#allocation6 + $0x140] sm:$0xff]  }
 0x49f   :  { %5398 = vmatpush3.bf16.msra.mxu1 %v6094_v63 }
 0x4a0   :  { %5224 = vmatmul.mubr.msk.f32.gmra.mxu0 %vm2902_vm3, %v5216_v59  ;;  %5399 = vmatprep.subr.bf16.mxu1 %v6096_v29  ;;  %v6113_v59 = vld [vmem:[#allocation6 + $0x148] sm:$0xff]  }
 0x4a1   :  { %5370 = vmatpush3.bf16.msra.mxu0 %v6087_v24  ;;  %v6115_v24 = vld [vmem:[#allocation6 + $0x108] sm:$0xff]  }
 0x4a2   :  { %5435 = vmatprep.subr.bf16.mxu0 %v6089_v27 }
 0x4a3   :  { %5400 = vmatpush3.bf16.msra.mxu1 %v6098_v32  ;;  %v6119_v32 = vld [vmem:[#allocation6 + $0x100] sm:$0xff]  }
 0x4a4   :  { %5401 = vmatprep.subr.bf16.mxu1 %v6100_v35 }
 0x4a7   :  { %5402 = vmatpush3.bf16.msra.mxu1 %v6102_v36 }
 0x4a8   :  { %5403 = vmatprep.subr.bf16.mxu1 %v6104_v37 }
 0x4ab   :  { %5404 = vmatpush3.bf16.msra.mxu1 %v6106_v39 }
 0x4ac   :  { %5405 = vmatprep.subr.bf16.mxu1 %v6108_v40 }
 0x4af   :  { %5406 = vmatpush3.bf16.msra.mxu1 %v6110_v42 }
 0x4b0   :  { %5407 = vmatprep.subr.bf16.mxu1 %v6112_v45 }
 0x4b3   :  { %5408 = vmatpush3.bf16.msra.mxu1 %v6114_v48 }
 0x4b4   :  { %5409 = vmatprep.subr.bf16.mxu1 %v6116_v49 }
 0x4b7   :  { %5410 = vmatpush3.bf16.msra.mxu1 %v6118_v50 }
 0x524   :  { %v2993_v9 = vpop.f32.mrf.mxu0 }
 0x526   :  { %v2995_v41 = vpop.f32.mrf.mxu0  ;;  %v7235_v56 = vpop.f32.mrf.mxu1 }
 0x528   :  { %v2999_v30 = vpop.f32.mrf.mxu0  ;;  %v7237_v52 = vpop.f32.mrf.mxu1 }
 0x529   :  { %v3040_v11 = vpack.c.bf16 %v2999_v30, %v2993_v9 }
 0x52a   :  { %v3001_v55 = vpop.f32.mrf.mxu0  ;;  %v7239_v22 = vpop.f32.mrf.mxu1 }
 0x52b   :  { %v3041_v25 = vpack.c.bf16 %v3001_v55, %v2995_v41  ;;  %v3348_v45 = vpack.c.bf16 %v7239_v22, %v7235_v56 }
 0x52c   :  { %v3005_v7 = vpop.f32.mrf.mxu0  ;;  %v3309_v10 = vpop.f32.mrf.mxu1 }
 0x52d   :  { %3779 = vmatprep.mubr.bf16.mxu0 %v3041_v25  ;;  %v3349_v58 = vpack.c.bf16 %v3309_v10, %v7237_v52 }
 0x52e   :  { %v3007_v33 = vpop.f32.mrf.mxu0  ;;  %3780 = vmatmul.mubr.bf16.vlgmr.msra.gmra.mxu0 %v3040_v11  ;;  %v7241_v17 = vpop.f32.mrf.mxu1 }
 0x52f   :  { %5436 = vmatpush3.bf16.msra.mxu0 %v6091_v57 }
 0x530   :  { %v3011_v31 = vpop.f32.mrf.mxu0  ;;  %5437 = vmatprep.subr.bf16.mxu0 %v6093_v51  ;;  %v7243_v53 = vpop.f32.mrf.mxu1 }
 0x531   :  { %v3042_v43 = vpack.c.bf16 %v3011_v31, %v3005_v7 }
 0x532   :  { %v3013_v47 = vpop.f32.mrf.mxu0  ;;  %v7245_v38 = vpop.f32.mrf.mxu1 }
 0x533   :  { %v3043_v23 = vpack.c.bf16 %v3013_v47, %v3007_v33  ;;  %5438 = vmatpush3.bf16.msra.mxu0 %v6095_v18  ;;  %v3350_v57 = vpack.c.bf16 %v7245_v38, %v7241_v17  ;;  %v6121_v38 = vld [vmem:[#allocation7 + $0xb0] sm:$0xff]  }
 0x534   :  { %v3017_v61 = vpop.f32.mrf.mxu0  ;;  %5439 = vmatprep.subr.bf16.mxu0 %v6097_v46  ;;  %v3321_v60 = vpop.f32.mrf.mxu1 }
 0x535   :  { %3787 = vmatprep.mubr.bf16.mxu0 %v3043_v23  ;;  %v3351_v40 = vpack.c.bf16 %v3321_v60, %v7243_v53  ;;  %v6126_v60 = vld [vmem:[#allocation7 + $0x70] sm:$0xff]  }
 0x536   :  { %v3019_v62 = vpop.f32.mrf.mxu0  ;;  %3788 = vmatmul.mubr.bf16.gmra.mxu0 %v3042_v43  ;;  %v7247_v16 = vpop.f32.mrf.mxu1 }
 0x537   :  { %5440 = vmatpush3.bf16.msra.mxu0 %v6099_v26 }
 0x538   :  { %v3023_v2 = vpop.f32.mrf.mxu0  ;;  %5441 = vmatprep.subr.bf16.mxu0 %v6101_v44  ;;  %v3327_v14 = vpop.f32.mrf.mxu1  ;;  %v6120_v44 = vld [vmem:[#allocation7 + $0xb8] sm:$0xff]  }
 0x539   :  { %v3044_v12 = vpack.c.bf16 %v3023_v2, %v3017_v61  ;;  %v6124_v2 = vld [vmem:[#allocation7 + $0xa0] sm:$0xff]  }
 0x53a   :  { %v3025_v4 = vpop.f32.mrf.mxu0  ;;  %v3331_v63 = vpop.f32.mrf.mxu1 }
 0x53b   :  { %v3045_v5 = vpack.c.bf16 %v3025_v4, %v3019_v62  ;;  %5442 = vmatpush3.bf16.msra.mxu0 %v6103_v1  ;;  %v3352_v46 = vpack.c.bf16 %v3331_v63, %v7247_v16  ;;  %v6122_v62 = vld [vmem:[#allocation7 + $0xa8] sm:$0xff]   ;;  %v6123_v1 = vld [vmem:[#allocation7 + $0x78] sm:$0xff]  }
 0x53c   :  { %v3029_v13 = vpop.f32.mrf.mxu0  ;;  %5443 = vmatprep.subr.bf16.mxu0 %v6105_v3  ;;  %v3333_v36 = vpop.f32.mrf.mxu1  ;;  %v6125_v3 = vld [vmem:[#allocation7 + $0x38] sm:$0xff]   ;;  %5475 = vmatprep.subr.bf16.mxu1 %v6123_v1  ;;  %v6133_v16 = vld [vmem:[#allocation7 + $0x88] sm:$0xff]  }
 0x53d   :  { %3795 = vmatprep.mubr.bf16.mxu0 %v3045_v5  ;;  %v3353_v55 = vpack.c.bf16 %v3333_v36, %v3327_v14  ;;  %v6127_v4 = vld [vmem:[#allocation7 + $0x98] sm:$0xff]   ;;  %v6128_v5 = vld [vmem:[#allocation7 + $0x30] sm:$0xff]  }
 0x53e   :  { %v3031_v34 = vpop.f32.mrf.mxu0  ;;  %3796 = vmatmul.mubr.bf16.gmra.mxu0 %v3044_v12  ;;  %v3337_v49 = vpop.f32.mrf.mxu1  ;;  %v6130_v12 = vld [vmem:[#allocation7 + $0x90] sm:$0xff]  }
 0x53f   :  { %5444 = vmatpush3.bf16.msra.mxu0 %v6107_v8  ;;  %v6129_v8 = vld [vmem:[#allocation7 + $0x68] sm:$0xff]   ;;  %v6138_v14 = vld [vmem:[#allocation7 + $0x50] sm:$0xff]  }
 0x540   :  { %v3035_v20 = vpop.f32.mrf.mxu0  ;;  %5445 = vmatprep.subr.bf16.mxu0 %v6109_v15  ;;  %v3339_v41 = vpop.f32.mrf.mxu1  ;;  %v6132_v15 = vld [vmem:[#allocation7 + $0x60] sm:$0xff]  }
 0x541   :  { %v3046_v27 = vpack.c.bf16 %v3035_v20, %v3029_v13  ;;  %v6131_v13 = vld [vmem:[#allocation7 + $0x28] sm:$0xff]   ;;  %v6136_v20 = vld [vmem:[#allocation7 + $0x80] sm:$0xff]  }
 0x542   :  { %v3037_v21 = vpop.f32.mrf.mxu0  ;;  %v3343_v7 = vpop.f32.mrf.mxu1 }
 0x543   :  { %v3047_v6 = vpack.c.bf16 %v3037_v21, %v3031_v34  ;;  %5446 = vmatpush3.bf16.msra.mxu0 %v6111_v19  ;;  %v3354_v61 = vpack.c.bf16 %v3343_v7, %v3337_v49  ;;  %v6134_v34 = vld [vmem:[#allocation7 + $0x20] sm:$0xff]   ;;  %v6135_v19 = vld [vmem:[#allocation7 + $0x58] sm:$0xff]   ;;  %v6139_v21 = vld [vmem:[#allocation7 + $0x10] sm:$0xff]  }
 0x544   :  { %v3147_v28 = vpop.f32.mrf.mxu0  ;;  %5447 = vmatprep.subr.bf16.mxu0 %v6113_v59  ;;  %v3345_v51 = vpop.f32.mrf.mxu1  ;;  %v6137_v59 = vld [vmem:[#allocation7 + $0x18] sm:$0xff]  }
 0x545   :  { %3803 = vmatprep.mubr.bf16.mxu0 %v3047_v6  ;;  %v3355_v18 = vpack.c.bf16 %v3345_v51, %v3339_v41  ;;  %v6140_v6 = vld [vmem:[#allocation7 + $0x48] sm:$0xff]   ;;  %v7268_v41 = vpop.permute.xlu0 %3976 }
 0x546   :  { %v3149_v29 = vpop.f32.mrf.mxu0  ;;  %3804 = vmatmul.mubr.bf16.gmra.mxu0 %v3046_v27  ;;  %v6143_v27 = vld [vmem:[#allocation7] sm:$0xff]  }
 0x547   :  { %5448 = vmatpush3.bf16.msra.mxu0 %v6115_v24  ;;  %3909 = vmatprep.mubr.bf16.mxu0 %v3349_v58  ;;  %v6141_v24 = vld [vmem:[#allocation7 + $0x8] sm:$0xff]   ;;  %v6142_v58 = vld [vmem:[#allocation7 + $0x40] sm:$0xff]  }
 0x548   :  { %v3153_v35 = vpop.f32.mrf.mxu0  ;;  %5449 = vmatprep.subr.bf16.mxu0 %v6117_v0 }
 0x549   :  { %v3194_v42 = vpack.c.bf16 %v3153_v35, %v3147_v28 }
 0x54a   :  { %v3155_v37 = vpop.f32.mrf.mxu0 }
 0x54b   :  { %v3195_v39 = vpack.c.bf16 %v3155_v37, %v3149_v29  ;;  %5450 = vmatpush3.bf16.msra.mxu0 %v6119_v32 }
 0x54c   :  { %v3159_v48 = vpop.f32.mrf.mxu0  ;;  %5579 = vmatprep.subr.bf16.mxu0 %v6120_v44 }
 0x54d   :  { %3844 = vmatprep.mubr.bf16.mxu1 %v3195_v39 }
 0x54e   :  { %v3161_v50 = vpop.f32.mrf.mxu0  ;;  %3845 = vmatmul.mubr.bf16.vlgmr.msra.gmra.mxu1 %v3194_v42  ;;  %3910 = vmatmul.mubr.bf16.vlgmr.msra.gmra.mxu0 %v3348_v45 }
 0x54f   :  { %3917 = vmatprep.mubr.bf16.mxu0 %v3351_v40  ;;  %5580 = vmatpush3.bf16.msra.mxu0 %v6120_v44 }
 0x550   :  { %v3165_v9 = vpop.f32.mrf.mxu0  ;;  %5581 = vmatprep.subr.bf16.mxu0 %v6121_v38  ;;  %5476 = vmatpush3.bf16.msra.mxu1 %v6125_v3 }
 0x551   :  { %v3196_v25 = vpack.c.bf16 %v3165_v9, %v3159_v48  ;;  %5477 = vmatprep.subr.bf16.mxu1 %v6126_v60 }
 0x552   :  { %v3167_v30 = vpop.f32.mrf.mxu0 }
 0x553   :  { %v3197_v52 = vpack.c.bf16 %v3167_v30, %v3161_v50  ;;  %5582 = vmatpush3.bf16.msra.mxu0 %v6121_v38  ;;  %v7270_v30 = vpop.permute.xlu1 %3981 }
 0x554   :  { %v3171_v11 = vpop.f32.mrf.mxu0  ;;  %5583 = vmatprep.subr.bf16.mxu0 %v6122_v62  ;;  %5478 = vmatpush3.bf16.msra.mxu1 %v6128_v5 }
 0x555   :  { %3852 = vmatprep.mubr.bf16.mxu1 %v3197_v52  ;;  %5479 = vmatprep.subr.bf16.mxu1 %v6129_v8 }
 0x556   :  { %v3173_v56 = vpop.f32.mrf.mxu0  ;;  %3853 = vmatmul.mubr.bf16.gmra.mxu1 %v3196_v25  ;;  %3918 = vmatmul.mubr.bf16.gmra.mxu0 %v3350_v57 }
 0x557   :  { %3925 = vmatprep.mubr.bf16.mxu0 %v3353_v55  ;;  %5584 = vmatpush3.bf16.msra.mxu0 %v6122_v62  ;;  %v7275_v55 = vld [vmem:[%s7534_s14] ss:$0 sm:$0xff] }
 0x558   :  { %v3177_v22 = vpop.f32.mrf.mxu0  ;;  %5585 = vmatprep.subr.bf16.mxu0 %v6124_v2  ;;  %5480 = vmatpush3.bf16.msra.mxu1 %v6131_v13 }
 0x559   :  { %v3198_v31 = vpack.c.bf16 %v3177_v22, %v3171_v11  ;;  %5481 = vmatprep.subr.bf16.mxu1 %v6132_v15 }
 0x55a   :  { %v3179_v10 = vpop.f32.mrf.mxu0 }
 0x55b   :  { %v3199_v33 = vpack.c.bf16 %v3179_v10, %v3173_v56  ;;  %5586 = vmatpush3.bf16.msra.mxu0 %v6124_v2 }
 0x55c   :  { %v3183_v53 = vpop.f32.mrf.mxu0  ;;  %5587 = vmatprep.subr.bf16.mxu0 %v6127_v4  ;;  %5482 = vmatpush3.bf16.msra.mxu1 %v6134_v34 }
 0x55d   :  { %3860 = vmatprep.mubr.bf16.mxu1 %v3199_v33  ;;  %5483 = vmatprep.subr.bf16.mxu1 %v6135_v19 }
 0x55e   :  { %v3185_v47 = vpop.f32.mrf.mxu0  ;;  %3861 = vmatmul.mubr.bf16.gmra.mxu1 %v3198_v31  ;;  %3926 = vmatmul.mubr.bf16.gmra.mxu0 %v3352_v46  ;;  %v7280_v31 = vpop.permute.xlu1 %3991 }
 0x55f   :  { %3933 = vmatprep.mubr.bf16.mxu0 %v3355_v18  ;;  %5588 = vmatpush3.bf16.msra.mxu0 %v6127_v4  ;;  %v7278_v18 = vpop.permute.xlu0 %3986 }
 0x560   :  { %v3189_v17 = vpop.f32.mrf.mxu0  ;;  %5589 = vmatprep.subr.bf16.mxu0 %v6130_v12  ;;  %5484 = vmatpush3.bf16.msra.mxu1 %v6137_v59 }
 0x561   :  { %v3200_v43 = vpack.c.bf16 %v3189_v17, %v3183_v53  ;;  %5485 = vmatprep.subr.bf16.mxu1 %v6138_v14 }
 0x562   :  { %v3191_v23 = vpop.f32.mrf.mxu0  ;;  %v7285_v4 = vpop.permute.xlu1 %4001 }
 0x563   :  { %v3201_v26 = vpack.c.bf16 %v3191_v23, %v3185_v47  ;;  %5590 = vmatpush3.bf16.msra.mxu0 %v6130_v12  ;;  %v7283_v60 = vpop.permute.xlu0 %3996 }
 0x564   :  { %5591 = vmatprep.subr.bf16.mxu0 %v6133_v16  ;;  %5486 = vmatpush3.bf16.msra.mxu1 %v6139_v21 }
 0x565   :  { %3868 = vmatprep.mubr.bf16.mxu1 %v3201_v26  ;;  %5487 = vmatprep.subr.bf16.mxu1 %v6140_v6 }
 0x566   :  { %3869 = vmatmul.mubr.bf16.gmra.mxu1 %v3200_v43  ;;  %3934 = vmatmul.mubr.bf16.gmra.mxu0 %v3354_v61 }
 0x567   :  { %5592 = vmatpush3.bf16.msra.mxu0 %v6133_v16 }
 0x568   :  { %5593 = vmatprep.subr.bf16.mxu0 %v6136_v20  ;;  %5488 = vmatpush3.bf16.msra.mxu1 %v6141_v24 }
 0x569   :  { %5489 = vmatprep.subr.bf16.mxu1 %v6142_v58 }
 0x56b   :  { %5594 = vmatpush3.bf16.msra.mxu0 %v6136_v20 }
 0x56c   :  { %5490 = vmatpush3.bf16.msra.mxu1 %v6143_v27 }
 0x5ee   :  { %v5371_v28 = vpop.f32.mrf.mxu0 }
 0x5f0   :  { %v5372_v0 = vpop.f32.mrf.mxu0 }
 0x5f1   :  { %v5373_v52 = vadd.f32 %v5372_v0, %v5371_v28 }
 0x5f2   :  { %v5374_v63 = vpop.f32.mrf.mxu0 }
 0x5f3   :  { %v3782_v56 = vadd.f32 %v5373_v52, %v7275_v55 }
 0x5f4   :  { %v5375_v29 = vpop.f32.mrf.mxu0 }
 0x5f5   :  { %v5376_v22 = vadd.f32 %v5375_v29, %v5374_v63 }
 0x5f6   :  { %v5377_v32 = vpop.f32.mrf.mxu0 }
 0x5f7   :  { %v3785_v17 = vadd.f32 %v5376_v22, %v7275_v55 }
 0x5f8   :  { %v5378_v35 = vpop.f32.mrf.mxu0 }
 0x5f9   :  { %v5379_v23 = vadd.f32 %v5378_v35, %v5377_v32  ;;  %v7296_v32 = vpop.permute.xlu0 %4049  ;;  %v7298_v35 = vpop.permute.xlu1 %4054 }
 0x5fa   :  { %v5380_v36 = vpop.f32.mrf.mxu0 }
 0x5fb   :  { %v3790_v5 = vadd.f32 %v5379_v23, %v7275_v55 }
 0x5fc   :  { %v5381_v37 = vpop.f32.mrf.mxu0 }
 0x5fd   :  { %v5382_v8 = vadd.f32 %v5381_v37, %v5380_v36 }
 0x5fe   :  { %v5383_v39 = vpop.f32.mrf.mxu0 }
 0x5ff   :  { %v3793_v24 = vadd.f32 %v5382_v8, %v7275_v55 }
 0x600   :  { %v5384_v40 = vpop.f32.mrf.mxu0 }
 0x601   :  { %v5385_v14 = vadd.f32 %v5384_v40, %v5383_v39 }
 0x602   :  { %v7256_v42 = vpop.f32.mrf.mxu0 }
 0x603   :  { %v3798_v52 = vadd.f32 %v5385_v14, %v7275_v55 }
 0x604   :  { %v7258_v45 = vpop.f32.mrf.mxu0 }
 0x606   :  { %v7260_v48 = vpop.f32.mrf.mxu0 }
 0x608   :  { %v7262_v49 = vpop.f32.mrf.mxu0 }
 0x60a   :  { %v7264_v50 = vpop.f32.mrf.mxu0 }
 0x60c   :  { %v7266_v9 = vpop.f32.mrf.mxu0 }
 0x60e   :  { %v5411_v25 = vpop.f32.mrf.mxu1  ;;  %v5451_v57 = vpop.f32.mrf.mxu0 }
 0x610   :  { %v5412_v11 = vpop.f32.mrf.mxu1  ;;  %v5452_v7 = vpop.f32.mrf.mxu0 }
 0x611   :  { %v5413_v51 = vadd.f32 %v5412_v11, %v5411_v25  ;;  %v5453_v26 = vadd.f32 %v5452_v7, %v5451_v57  ;;  %v5388_v25 = vadd.f32 %v7258_v45, %v7256_v42  ;;  %v5391_v45 = vadd.f32 %v7262_v49, %v7260_v48 }
 0x612   :  { %v5414_v10 = vpop.f32.mrf.mxu1  ;;  %v5454_v33 = vpop.f32.mrf.mxu0 }
 0x613   :  { %v3847_v46 = vadd.f32 %v5413_v51, %v3782_v56 }
 0x614   :  { %v5415_v53 = vpop.f32.mrf.mxu1  ;;  %v5455_v47 = vpop.f32.mrf.mxu0 }
 0x615   :  { %v5416_v43 = vadd.f32 %v5415_v53, %v5414_v10  ;;  %v3912_v38 = vadd.f32 %v5453_v26, %v3847_v46  ;;  %v5456_v1 = vadd.f32 %v5455_v47, %v5454_v33 }
 0x616   :  { %v5417_v61 = vpop.f32.mrf.mxu1  ;;  %v5457_v44 = vpop.f32.mrf.mxu0 }
 0x617   :  { %v3850_v62 = vadd.f32 %v5416_v43, %v3785_v17  ;;  %v7288_v34 = vmax.f32 %v3912_v38, 0.0  ;;  %v3801_v38 = vadd.f32 %v5388_v25, %v7275_v55 }
 0x618   :  { %v5418_v2 = vpop.f32.mrf.mxu1  ;;  %v5458_v3 = vpop.f32.mrf.mxu0 }
 0x619   :  { %v3915_v12 = vadd.f32 %v5456_v1, %v3850_v62  ;;  %v5419_v13 = vadd.f32 %v5418_v2, %v5417_v61  ;;  %v5459_v59 = vadd.f32 %v5458_v3, %v5457_v44  ;;  %v4022_v36 = vrot.slane %v7288_v34, 1  ;;  %v7319_v61 = vpop.permute.xlu0 %4059  ;;  %v7321_v44 = vpop.permute.xlu1 %4064 }
 0x61a   :  { %v5420_v15 = vpop.f32.mrf.mxu1  ;;  %v5460_v16 = vpop.f32.mrf.mxu0 }
 0x61b   :  { %v7290_v19 = vmax.f32 %v3915_v12, 0.0  ;;  %v3855_v20 = vadd.f32 %v5419_v13, %v3790_v5  ;;  %v3806_v13 = vadd.f32 %v5391_v45, %v7275_v55 }
 0x61c   :  { %v5421_v21 = vpop.f32.mrf.mxu1  ;;  %v5461_v6 = vpop.f32.mrf.mxu0 }
 0x61d   :  { %v4023_v58 = vrot.slane %v7290_v19, 1  ;;  %v3920_v27 = vadd.f32 %v5459_v59, %v3855_v20  ;;  %v5422_v28 = vadd.f32 %v5421_v21, %v5420_v15  ;;  %v4099_v29 = vpack.c.bf16 %v7290_v19, %v7288_v34 }
 0x61e   :  { %v5423_v0 = vpop.f32.mrf.mxu1  ;;  %v5463_v63 = vpop.f32.mrf.mxu0  ;;  %v5462_v40 = vadd.f32 %v5461_v6, %v5460_v16  ;;  %v5394_v15 = vadd.f32 %v7266_v9, %v7264_v50 }
 0x61f   :  { %v7301_v37 = vmax.f32 %v3920_v27, 0.0  ;;  %v3858_v39 = vadd.f32 %v5422_v28, %v3793_v24  ;;  %4338 = vmatprep.mubr.bf16.mxu1 %v4099_v29  ;;  %v4036_v51 = vsel %vm1270_vm1, %v4022_v36, %v4023_v58  ;;  %v7333_v27 = vpop.permute.xlu0 %4006  ;;  %v7335_v28 = vpop.permute.xlu1 %4011 }
 0x620   :  { %v5424_v57 = vpop.f32.mrf.mxu1  ;;  %v5464_v11 = vpop.f32.mrf.mxu0  ;;  %v4087_v26 = vmul.f32 %v7296_v32, %v4036_v51  ;;  %v3809_v25 = vadd.f32 %v5394_v15, %v7275_v55 }
 0x621   :  { %v4024_v7 = vrot.slane %v7301_v37, 1  ;;  %v3923_v56 = vadd.f32 %v5462_v40, %v3858_v39  ;;  %v5425_v22 = vadd.f32 %v5424_v57, %v5423_v0  ;;  %v5465_v47 = vadd.f32 %v5464_v11, %v5463_v63 }
 0x622   :  { %v5426_v10 = vpop.f32.mrf.mxu1  ;;  %v5466_v33 = vpop.f32.mrf.mxu0 }
 0x623   :  { %v7311_v46 = vmax.f32 %v3923_v56, 0.0  ;;  %v3863_v53 = vadd.f32 %v5425_v22, %v3798_v52  ;;  %v4035_v42 = vsel %vm1270_vm1, %v4023_v58, %v4024_v7 }
 0x624   :  { %v5427_v17 = vpop.f32.mrf.mxu1  ;;  %v5467_v23 = vpop.f32.mrf.mxu0  ;;  %v4088_v43 = vmul.f32 %v7298_v35, %v4035_v42 }
 0x625   :  { %v4025_v62 = vrot.slane %v7311_v46, 1  ;;  %v3928_v1 = vadd.f32 %v5465_v47, %v3863_v53  ;;  %v5428_v2 = vadd.f32 %v5427_v17, %v5426_v10  ;;  %v5468_v12 = vadd.f32 %v5467_v23, %v5466_v33  ;;  %v7345_v33 = vpop.permute.xlu0 %4069  ;;  %v7347_v53 = vpop.permute.xlu1 %4074 }
 0x626   :  { %v5429_v3 = vpop.f32.mrf.mxu1  ;;  %v5469_v5 = vpop.f32.mrf.mxu0  ;;  %v4103_v8 = vpack.c.bf16 %v4088_v43, %v4087_v26  ;;  %v3951_v47 = vrot.slane %v7290_v19, 7  ;;  %v3950_v17 = vrot.slane %v7288_v34, 7 }
 0x627   :  { %v7325_v48 = vmax.f32 %v3928_v1, 0.0  ;;  %v3866_v49 = vadd.f32 %v5428_v2, %v3801_v38  ;;  %v4034_v59 = vsel %vm1270_vm1, %v4024_v7, %v4025_v62 }
 0x628   :  { %v5430_v16 = vpop.f32.mrf.mxu1  ;;  %v5470_v20 = vpop.f32.mrf.mxu0  ;;  %5595 = vmatprep.mubr.bf16.mxu0 %v4103_v8  ;;  %v4089_v29 = vmul.f32 %v7319_v61, %v4034_v59  ;;  %v3953_v8 = vrot.slane %v7311_v46, 7 }
 0x629   :  { %v4026_v14 = vrot.slane %v7325_v48, 1  ;;  %v3931_v21 = vadd.f32 %v5468_v12, %v3866_v49  ;;  %v5431_v6 = vadd.f32 %v5430_v16, %v5429_v3  ;;  %v5471_v63 = vadd.f32 %v5470_v20, %v5469_v5  ;;  %v7359_v3 = vpop.permute.xlu0 %4079  ;;  %v7361_v5 = vpop.permute.xlu1 %4084 }
 0x62a   :  { %v5432_v24 = vpop.f32.mrf.mxu1  ;;  %v5472_v58 = vpop.f32.mrf.mxu0 }
 0x62b   :  { %v4033_v0 = vsel %vm1270_vm1, %v4025_v62, %v4026_v14  ;;  %v7339_v50 = vmax.f32 %v3931_v21, 0.0  ;;  %v3871_v9 = vadd.f32 %v5431_v6, %v3806_v13  ;;  %v3964_v62 = vsel %vm1221_vm2, %v3950_v17, %v3951_v47 }
 0x62c   :  { %v4090_v39 = vmul.f32 %v7321_v44, %v4033_v0  ;;  %v5433_v40 = vpop.f32.mrf.mxu1  ;;  %v5473_v52 = vpop.f32.mrf.mxu0  ;;  %v4015_v15 = vmul.f32 %v7270_v30, %v3964_v62  ;;  %v6155_v62 = vld [vmem:[#allocation9 + $0x28] sm:$0xff]  }
 0x62d   :  { %v4027_v57 = vrot.slane %v7339_v50, 1  ;;  %v3936_v11 = vadd.f32 %v5471_v63, %v3871_v9  ;;  %v5434_v7 = vadd.f32 %v5433_v40, %v5432_v24  ;;  %v5474_v10 = vadd.f32 %v5473_v52, %v5472_v58 }
 0x62e   :  { %v4104_v56 = vpack.c.bf16 %v4090_v39, %v4089_v29  ;;  %v4100_v24 = vpack.c.bf16 %v7311_v46, %v7301_v37  ;;  %v3955_v0 = vrot.slane %v7339_v50, 7  ;;  %v3954_v63 = vrot.slane %v7325_v48, 7 }
 0x62f   :  { %v3948_v22 = vmax.f32 %v3936_v11, 0.0  ;;  %v3874_v51 = vadd.f32 %v5434_v7, %v3809_v25  ;;  %v4032_v55 = vsel %vm1270_vm1, %v4026_v14, %v4027_v57  ;;  %v3952_v14 = vrot.slane %v7301_v37, 7 }
 0x630   :  { %5596 = vmatmul.mubr.bf16.vlgmr.msra.gmra.mxu0 %v4104_v56  ;;  %v4091_v43 = vmul.f32 %v7345_v33, %v4032_v55  ;;  %v4101_v37 = vpack.c.bf16 %v7339_v50, %v7325_v48  ;;  %v3960_v46 = vsel %vm1221_vm2, %v3954_v63, %v3955_v0  ;;  %v3961_v39 = vsel %vm1221_vm2, %v3953_v8, %v3954_v63  ;;  %v6149_v55 = vld [vmem:[#allocation9 + $0x38] sm:$0xff]  }
 0x631   :  { %v4028_v42 = vrot.slane %v3948_v22, 1  ;;  %v3939_v45 = vadd.f32 %v5474_v10, %v3874_v51  ;;  %v3962_v34 = vsel %vm1221_vm2, %v3952_v14, %v3953_v8  ;;  %v4019_v40 = vmul.f32 %v7285_v4, %v3960_v46  ;;  %v6144_v10 = vld [vmem:[#allocation9 + $0xb8] sm:$0xff]  }
 0x632   :  { %v4017_v58 = vmul.f32 %v7280_v31, %v3962_v34  ;;  %v4018_v52 = vmul.f32 %v7283_v60, %v3961_v39  ;;  %v3956_v25 = vrot.slane %v3948_v22, 7  ;;  %5603 = vmatprep.subr.bf16.mxu0 %v6144_v10  ;;  %v6159_v8 = vld [vmem:[#allocation9 + $0x58] sm:$0xff]   ;;  %v7404_v34 = vld [vmem:[%s7535_s15] ss:$0 sm:$0xff] }
 0x633   :  { %v3949_v23 = vmax.f32 %v3939_v45, 0.0  ;;  %v4031_v26 = vsel %vm1270_vm1, %v4027_v57, %v4028_v42  ;;  %5604 = vmatpush3.bf16.msra.mxu0 %v6144_v10  ;;  %v6148_v45 = vld [vmem:[#allocation9 + $0xa0] sm:$0xff]  }
 0x634   :  { %v4092_v38 = vmul.f32 %v7347_v53, %v4031_v26  ;;  %v4097_v57 = vpack.c.bf16 %v4019_v40, %v4018_v52  ;;  %v3959_v48 = vsel %vm1221_vm2, %v3955_v0, %v3956_v25  ;;  %v6152_v26 = vld [vmem:[#allocation9 + $0x30] sm:$0xff]  }
 0x635   :  { %v3957_v1 = vrot.slane %v3949_v23, 7  ;;  %v4029_v19 = vrot.slane %v3949_v23, 1  ;;  %v4102_v11 = vpack.c.bf16 %v3949_v23, %v3948_v22  ;;  %v4020_v56 = vmul.f32 %v7333_v27, %v3959_v48  ;;  %v6146_v22 = vld [vmem:[#allocation9 + $0xa8] sm:$0xff]   ;;  %v6151_v23 = vld [vmem:[#allocation9 + $0x98] sm:$0xff]  }
 0x636   :  { %v4105_v2 = vpack.c.bf16 %v4092_v38, %v4091_v43  ;;  %v6153_v43 = vld [vmem:[#allocation9 + $0x68] sm:$0xff]   ;;  %v6154_v38 = vld [vmem:[#allocation9 + $0x90] sm:$0xff]  }
 0x637   :  { %v3965_v49 = vsel %vm1221_vm2, %v3957_v1, %v3950_v17  ;;  %v4030_v12 = vsel %vm1270_vm1, %v4028_v42, %v4029_v19  ;;  %v4037_v13 = vsel %vm1270_vm1, %v4029_v19, %v4022_v36  ;;  %v3963_v36 = vsel %vm1221_vm2, %v3951_v47, %v3952_v14  ;;  %v6145_v47 = vld [vmem:[#allocation9 + $0xb0] sm:$0xff]   ;;  %v6147_v42 = vld [vmem:[#allocation9 + $0x78] sm:$0xff]   ;;  %v6157_v19 = vld [vmem:[#allocation9 + $0x88] sm:$0xff]  }
 0x638   :  { %v4014_v16 = vmul.f32 %v7268_v41, %v3965_v49  ;;  %5599 = vmatprep.mubr.bf16.mxu0 %v4105_v2  ;;  %v4093_v20 = vmul.f32 %v7359_v3, %v4030_v12  ;;  %v4094_v59 = vmul.f32 %v7361_v5, %v4037_v13  ;;  %v4016_v9 = vmul.f32 %v7278_v18, %v3963_v36  ;;  %v6150_v17 = vld [vmem:[#allocation9 + $0x70] sm:$0xff]   ;;  %v6158_v2 = vld [vmem:[#allocation9 + $0x20] sm:$0xff]   ;;  %v6161_v12 = vld [vmem:[#allocation9 + $0x18] sm:$0xff]  }
 0x639   :  { %v3958_v7 = vsel %vm1221_vm2, %v3956_v25, %v3957_v1  ;;  %5605 = vmatprep.subr.bf16.mxu0 %v6145_v47  ;;  %5527 = vmatprep.subr.bf16.mxu1 %v6147_v42  ;;  %v6156_v1 = vld [vmem:[#allocation9 + $0x60] sm:$0xff]   ;;  %v6162_v13 = vld [vmem:[#allocation9 + $0x50] sm:$0xff]  }
 0x63a   :  { %v4095_v21 = vpack.c.bf16 %v4015_v15, %v4014_v16  ;;  %v4106_v6 = vpack.c.bf16 %v4094_v59, %v4093_v20  ;;  %v4096_v29 = vpack.c.bf16 %v4017_v58, %v4016_v9  ;;  %v4021_v50 = vmul.f32 %v7335_v28, %v3958_v7  ;;  %5606 = vmatpush3.bf16.msra.mxu0 %v6145_v47  ;;  %v6160_v49 = vld [vmem:[#allocation9 + $0x80] sm:$0xff]   ;;  %v6163_v15 = vld [vmem:[#allocation9 + $0x10] sm:$0xff]   ;;  %v6164_v16 = vld [vmem:[#allocation9 + $0x48] sm:$0xff]  }
 0x63b   :  { %5607 = vmatprep.subr.bf16.mxu0 %v6146_v22  ;;  %v6165_v20 = vld [vmem:[#allocation9 + $0x8] sm:$0xff]   ;;  %v6166_v59 = vld [vmem:[#allocation9 + $0x40] sm:$0xff]  }
 0x63c   :  { %4339 = vmatmul.mubr.bf16.vlgmr.msra.gmra.mxu1 %v4095_v21  ;;  %5600 = vmatmul.mubr.bf16.gmra.mxu0 %v4106_v6  ;;  %v4098_v51 = vpack.c.bf16 %v4021_v50, %v4020_v56  ;;  %v6167_v14 = vld [vmem:[#allocation9] sm:$0xff]  }
 0x63d   :  { %4346 = vmatprep.mubr.bf16.mxu1 %v4100_v24  ;;  %5528 = vmatpush3.bf16.msra.mxu1 %v6149_v55 }
 0x63e   :  { %5608 = vmatpush3.bf16.msra.mxu0 %v6146_v22  ;;  %5529 = vmatprep.subr.bf16.mxu1 %v6150_v17 }
 0x63f   :  { %5609 = vmatprep.subr.bf16.mxu0 %v6148_v45 }
 0x641   :  { %5530 = vmatpush3.bf16.msra.mxu1 %v6152_v26 }
 0x642   :  { %5610 = vmatpush3.bf16.msra.mxu0 %v6148_v45  ;;  %5531 = vmatprep.subr.bf16.mxu1 %v6153_v43 }
 0x643   :  { %5611 = vmatprep.subr.bf16.mxu0 %v6151_v23 }
 0x644   :  { %4347 = vmatmul.mubr.bf16.gmra.mxu1 %v4096_v29 }
 0x645   :  { %4354 = vmatprep.mubr.bf16.mxu1 %v4101_v37  ;;  %5532 = vmatpush3.bf16.msra.mxu1 %v6155_v62 }
 0x646   :  { %5612 = vmatpush3.bf16.msra.mxu0 %v6151_v23  ;;  %5533 = vmatprep.subr.bf16.mxu1 %v6156_v1 }
 0x647   :  { %5613 = vmatprep.subr.bf16.mxu0 %v6154_v38 }
 0x649   :  { %5534 = vmatpush3.bf16.msra.mxu1 %v6158_v2 }
 0x64a   :  { %5614 = vmatpush3.bf16.msra.mxu0 %v6154_v38  ;;  %5535 = vmatprep.subr.bf16.mxu1 %v6159_v8 }
 0x64b   :  { %5615 = vmatprep.subr.bf16.mxu0 %v6157_v19 }
 0x64c   :  { %4355 = vmatmul.mubr.bf16.gmra.mxu1 %v4097_v57 }
 0x64d   :  { %4362 = vmatprep.mubr.bf16.mxu1 %v4102_v11  ;;  %5536 = vmatpush3.bf16.msra.mxu1 %v6161_v12 }
 0x64e   :  { %5616 = vmatpush3.bf16.msra.mxu0 %v6157_v19  ;;  %5537 = vmatprep.subr.bf16.mxu1 %v6162_v13 }
 0x64f   :  { %5617 = vmatprep.subr.bf16.mxu0 %v6160_v49 }
 0x651   :  { %5538 = vmatpush3.bf16.msra.mxu1 %v6163_v15 }
 0x652   :  { %5618 = vmatpush3.bf16.msra.mxu0 %v6160_v49  ;;  %5539 = vmatprep.subr.bf16.mxu1 %v6164_v16 }
 0x654   :  { %4363 = vmatmul.mubr.bf16.gmra.mxu1 %v4098_v51 }
 0x655   :  { %5540 = vmatpush3.bf16.msra.mxu1 %v6165_v20 }
 0x656   :  { %5541 = vmatprep.subr.bf16.mxu1 %v6166_v59 }
 0x659   :  { %5542 = vmatpush3.bf16.msra.mxu1 %v6167_v14 }
 0x6f0   :  { %v5597_v21 = vpop.f32.mrf.mxu0 }
 0x6f2   :  { %v4405_v24 = vpop.f32.mrf.mxu0 }
 0x6f4   :  { %v5598_v63 = vpop.f32.mrf.mxu0 }
 0x6f6   :  { %v4408_v52 = vpop.f32.mrf.mxu0 }
 0x6fc   :  { %v5491_v6 = vpop.f32.mrf.mxu1  ;;  %v5601_v51 = vpop.f32.mrf.mxu0 }
 0x6fe   :  { %v5492_v36 = vpop.f32.mrf.mxu1  ;;  %v4421_v43 = vpop.f32.mrf.mxu0 }
 0x6ff   :  { %v5493_v58 = vadd.f32 %v5492_v36, %v5491_v6 }
 0x700   :  { %v5494_v0 = vpop.f32.mrf.mxu1  ;;  %v5602_v15 = vpop.f32.mrf.mxu0 }
 0x701   :  { %v4341_v9 = vadd.f32 %v5493_v58, %v7404_v34 }
 0x702   :  { %v5495_v29 = vpop.f32.mrf.mxu1 }
 0x703   :  { %v5496_v37 = vadd.f32 %v5495_v29, %v5494_v0  ;;  %v4406_v39 = vadd.f32 %v4405_v24, %v4341_v9  ;;  %v4424_v9 = vpop.f32.mrf.mxu0 }
 0x704   :  { %v5497_v46 = vpop.f32.mrf.mxu1 }
 0x705   :  { %v4344_v40 = vadd.f32 %v5496_v37, %v7404_v34  ;;  %v7408_v48 = vmax.f32 %v4406_v39, 0.0 }
 0x706   :  { %v5498_v25 = vpop.f32.mrf.mxu1 }
 0x707   :  { %v4409_v57 = vadd.f32 %v4408_v52, %v4344_v40  ;;  %v5499_v11 = vadd.f32 %v5498_v25, %v5497_v46  ;;  %v4468_v17 = vrot.slane %v7408_v48, 1 }
 0x708   :  { %v5500_v7 = vpop.f32.mrf.mxu1 }
 0x709   :  { %v7410_v50 = vmax.f32 %v4409_v57, 0.0  ;;  %v4349_v56 = vadd.f32 %v5499_v11, %v7404_v34 }
 0x70a   :  { %v5501_v10 = vpop.f32.mrf.mxu1 }
 0x70b   :  { %v4469_v47 = vrot.slane %v7410_v50, 1  ;;  %v4414_v22 = vadd.f32 %v5597_v21, %v4349_v56  ;;  %v5502_v42 = vadd.f32 %v5501_v10, %v5500_v7  ;;  %v4496_v55 = vpack.c.bf16 %v7410_v50, %v7408_v48 }
 0x70c   :  { %v5503_v45 = vpop.f32.mrf.mxu1 }
 0x70d   :  { %v7417_v23 = vmax.f32 %v4414_v22, 0.0  ;;  %v4352_v26 = vadd.f32 %v5502_v42, %v7404_v34  ;;  %4728 = vmatprep.mubr.bf16.mxu1 %v4496_v55  ;;  %v4482_v2 = vsel %vm1270_vm1, %v4468_v17, %v4469_v47 }
 0x70e   :  { %v5504_v38 = vpop.f32.mrf.mxu1  ;;  %v4484_v20 = vmul.f32 %v4482_v2, %v7296_v32 }
 0x70f   :  { %v4470_v62 = vrot.slane %v7417_v23, 1  ;;  %v4417_v1 = vadd.f32 %v5598_v63, %v4352_v26  ;;  %v5505_v19 = vadd.f32 %v5504_v38, %v5503_v45  ;;  %v4445_v45 = vrot.slane %v7410_v50, 7 }
 0x710   :  { %v5506_v8 = vpop.f32.mrf.mxu1 }
 0x711   :  { %v7425_v49 = vmax.f32 %v4417_v1, 0.0  ;;  %v4357_v12 = vadd.f32 %v5505_v19, %v7404_v34  ;;  %v4481_v13 = vsel %vm1270_vm1, %v4469_v47, %v4470_v62 }
 0x712   :  { %v5507_v16 = vpop.f32.mrf.mxu1  ;;  %v4485_v59 = vmul.f32 %v4481_v13, %v7298_v35 }
 0x713   :  { %v4471_v14 = vrot.slane %v7425_v49, 1  ;;  %v4422_v21 = vadd.f32 %v4421_v43, %v4357_v12  ;;  %v5508_v6 = vadd.f32 %v5507_v16, %v5506_v8  ;;  %v4447_v2 = vrot.slane %v7425_v49, 7 }
 0x714   :  { %v5509_v24 = vpop.f32.mrf.mxu1  ;;  %v4500_v36 = vpack.c.bf16 %v4485_v59, %v4484_v20  ;;  %v4446_v20 = vrot.slane %v7417_v23, 7 }
 0x715   :  { %v7433_v58 = vmax.f32 %v4422_v21, 0.0  ;;  %v4360_v0 = vadd.f32 %v5508_v6, %v7404_v34  ;;  %v4480_v29 = vsel %vm1270_vm1, %v4470_v62, %v4471_v14  ;;  %v4497_v21 = vpack.c.bf16 %v7425_v49, %v7417_v23 }
 0x716   :  { %v5510_v63 = vpop.f32.mrf.mxu1  ;;  %5619 = vmatprep.mubr.bf16.mxu0 %v4500_v36  ;;  %v4486_v25 = vmul.f32 %v4480_v29, %v7319_v61  ;;  %v4444_v61 = vrot.slane %v7408_v48, 7  ;;  %v4456_v48 = vsel %vm1221_vm2, %v4446_v20, %v4447_v2 }
 0x717   :  { %v4472_v32 = vrot.slane %v7433_v58, 1  ;;  %v4425_v37 = vadd.f32 %v4424_v9, %v4360_v0  ;;  %v5511_v35 = vadd.f32 %v5510_v63, %v5509_v24 }
 0x718   :  { %v5512_v46 = vpop.f32.mrf.mxu1 }
 0x719   :  { %v4479_v39 = vsel %vm1270_vm1, %v4471_v14, %v4472_v32  ;;  %v7441_v40 = vmax.f32 %v4425_v37, 0.0  ;;  %v4365_v52 = vadd.f32 %v5511_v35, %v7404_v34 }
 0x71a   :  { %v4487_v57 = vmul.f32 %v4479_v39, %v7321_v44  ;;  %v5513_v11 = vpop.f32.mrf.mxu1 }
 0x71b   :  { %v4473_v7 = vrot.slane %v7441_v40, 1  ;;  %v4430_v56 = vadd.f32 %v5601_v51, %v4365_v52  ;;  %v5514_v10 = vadd.f32 %v5513_v11, %v5512_v46  ;;  %v4498_v23 = vpack.c.bf16 %v7441_v40, %v7433_v58 }
 0x71c   :  { %v4501_v47 = vpack.c.bf16 %v4487_v57, %v4486_v25 }
 0x71d   :  { %v4442_v22 = vmax.f32 %v4430_v56, 0.0  ;;  %v4368_v42 = vadd.f32 %v5514_v10, %v7404_v34  ;;  %v4478_v43 = vsel %vm1270_vm1, %v4472_v32, %v4473_v7  ;;  %v4458_v34 = vsel %vm1221_vm2, %v4444_v61, %v4445_v45 }
 0x71e   :  { %5620 = vmatmul.mubr.bf16.vlgmr.msra.gmra.mxu0 %v4501_v47  ;;  %v4488_v51 = vmul.f32 %v4478_v43, %v7345_v33  ;;  %v4461_v13 = vmul.f32 %v4458_v34, %v7270_v30  ;;  %v4463_v30 = vmul.f32 %v4456_v48, %v7280_v31 }
 0x71f   :  { %v4474_v55 = vrot.slane %v4442_v22, 1  ;;  %v4433_v26 = vadd.f32 %v5602_v15, %v4368_v42  ;;  %v4450_v0 = vrot.slane %v4442_v22, 7 }
 0x721   :  { %v4443_v44 = vmax.f32 %v4433_v26, 0.0  ;;  %v4477_v38 = vsel %vm1270_vm1, %v4473_v7, %v4474_v55 }
 0x722   :  { %v4489_v62 = vmul.f32 %v4477_v38, %v7347_v53 }
 0x723   :  { %v4451_v1 = vrot.slane %v4443_v44, 7  ;;  %v4475_v50 = vrot.slane %v4443_v44, 1  ;;  %v4499_v9 = vpack.c.bf16 %v4443_v44, %v4442_v22 }
 0x724   :  { %v4502_v19 = vpack.c.bf16 %v4489_v62, %v4488_v51 }
 0x725   :  { %v4459_v8 = vsel %vm1221_vm2, %v4451_v1, %v4444_v61  ;;  %v4476_v12 = vsel %vm1270_vm1, %v4474_v55, %v4475_v50  ;;  %v4483_v33 = vsel %vm1270_vm1, %v4475_v50, %v4468_v17  ;;  %v4448_v17 = vrot.slane %v7433_v58, 7 }
 0x726   :  { %5623 = vmatprep.mubr.bf16.mxu0 %v4502_v19  ;;  %v4460_v53 = vmul.f32 %v4459_v8, %v7268_v41  ;;  %v4490_v15 = vmul.f32 %v4476_v12, %v7359_v3  ;;  %v4491_v16 = vmul.f32 %v4483_v33, %v7361_v5  ;;  %v4457_v41 = vsel %vm1221_vm2, %v4445_v45, %v4446_v20 }
 0x727   :  { %v4449_v3 = vrot.slane %v7441_v40, 7  ;;  %v4462_v5 = vmul.f32 %v4457_v41, %v7278_v18  ;;  %v4455_v24 = vsel %vm1221_vm2, %v4447_v2, %v4448_v17  ;;  %v4452_v63 = vsel %vm1221_vm2, %v4450_v0, %v4451_v1 }
 0x728   :  { %v4492_v59 = vpack.c.bf16 %v4461_v13, %v4460_v53  ;;  %v4503_v14 = vpack.c.bf16 %v4491_v16, %v4490_v15  ;;  %v4464_v36 = vmul.f32 %v4455_v24, %v7283_v60  ;;  %v4467_v29 = vmul.f32 %v4452_v63, %v7335_v28 }
 0x729   :  { %v4493_v6 = vpack.c.bf16 %v4463_v30, %v4462_v5  ;;  %v4454_v49 = vsel %vm1221_vm2, %v4448_v17, %v4449_v3  ;;  %v4453_v58 = vsel %vm1221_vm2, %v4449_v3, %v4450_v0 }
 0x72a   :  { %4729 = vmatmul.mubr.bf16.vlgmr.msra.gmra.mxu1 %v4492_v59  ;;  %5624 = vmatmul.mubr.bf16.gmra.mxu0 %v4503_v14  ;;  %v4465_v31 = vmul.f32 %v4454_v49, %v7285_v4  ;;  %v4466_v32 = vmul.f32 %v4453_v58, %v7333_v27 }
 0x72b   :  { %4736 = vmatprep.mubr.bf16.mxu1 %v4497_v21 }
 0x72c   :  { %v4494_v18 = vpack.c.bf16 %v4465_v31, %v4464_v36  ;;  %v4495_v37 = vpack.c.bf16 %v4467_v29, %v4466_v32 }
 0x732   :  { %4737 = vmatmul.mubr.bf16.gmra.mxu1 %v4493_v6 }
 0x733   :  { %4744 = vmatprep.mubr.bf16.mxu1 %v4498_v23 }
 0x73a   :  { %4745 = vmatmul.mubr.bf16.gmra.mxu1 %v4494_v18 }
 0x73b   :  { %4752 = vmatprep.mubr.bf16.mxu1 %v4499_v9 }
 0x742   :  { %4753 = vmatmul.mubr.bf16.gmra.mxu1 %v4495_v37 }
 0x7de   :  { %v5621_v4 = vpop.f32.mrf.mxu0 }
 0x7e0   :  { %v4795_v35 = vpop.f32.mrf.mxu0 }
 0x7e2   :  { %v5622_v40 = vpop.f32.mrf.mxu0 }
 0x7e4   :  { %v4798_v56 = vpop.f32.mrf.mxu0 }
 0x7ea   :  { %v5543_v60 = vpop.f32.mrf.mxu1  ;;  %v5625_v22 = vpop.f32.mrf.mxu0 }
 0x7ec   :  { %v5544_v46 = vpop.f32.mrf.mxu1  ;;  %v4811_v61 = vpop.f32.mrf.mxu0 }
 0x7ed   :  { %v5545_v39 = vadd.f32 %v5544_v46, %v5543_v60 }
 0x7ee   :  { %v5546_v52 = vpop.f32.mrf.mxu1  ;;  %v5626_v1 = vpop.f32.mrf.mxu0 }
 0x7ef   :  { %v4796_v25 = vadd.f32 %v5545_v39, %v4795_v35 }
 0x7f0   :  { %v5547_v57 = vpop.f32.mrf.mxu1  ;;  %v4814_v13 = vpop.f32.mrf.mxu0 }
 0x7f1   :  { %v5347_v11 = vmul.f32 -1.442695, %v4796_v25  ;;  %v5548_v7 = vadd.f32 %v5547_v57, %v5546_v52 }
 0x7f2   :  { %v5549_v54 = vpop.f32.mrf.mxu1 }
 0x7f3   :  { %6168 = vpow2.f32 %v5347_v11  ;;  %v4799_v10 = vadd.f32 %v5548_v7, %v4798_v56 }
 0x7f4   :  { %v5550_v28 = vpop.f32.mrf.mxu1 }
 0x7f5   :  { %v5348_v47 = vmul.f32 -1.442695, %v4799_v10  ;;  %v5551_v27 = vadd.f32 %v5550_v28, %v5549_v54 }
 0x7f6   :  { %v5552_v42 = vpop.f32.mrf.mxu1 }
 0x7f7   :  { %6170 = vpow2.f32 %v5348_v47  ;;  %v4804_v45 = vadd.f32 %v5621_v4, %v5551_v27 }
 0x7f8   :  { %v5553_v55 = vpop.f32.mrf.mxu1 }
 0x7f9   :  { %v5349_v26 = vmul.f32 -1.442695, %v4804_v45  ;;  %v5554_v43 = vadd.f32 %v5553_v55, %v5552_v42 }
 0x7fa   :  { %v5555_v44 = vpop.f32.mrf.mxu1 }
 0x7fb   :  { %6172 = vpow2.f32 %v5349_v26  ;;  %v4807_v38 = vadd.f32 %v5622_v40, %v5554_v43 }
 0x7fc   :  { %v5556_v51 = vpop.f32.mrf.mxu1 }
 0x7fd   :  { %v5350_v62 = vmul.f32 -1.442695, %v4807_v38  ;;  %v5557_v34 = vadd.f32 %v5556_v51, %v5555_v44 }
 0x7fe   :  { %v5558_v50 = vpop.f32.mrf.mxu1 }
 0x7ff   :  { %6174 = vpow2.f32 %v5350_v62  ;;  %v4812_v19 = vadd.f32 %v5557_v34, %v4811_v61 }
 0x800   :  { %v6169_v2 = vpop.eup %6168  ;;  %v5559_v8 = vpop.f32.mrf.mxu1 }
 0x801   :  { %v4850_v12 = vadd.f32 1.0, %v6169_v2  ;;  %v5351_v33 = vmul.f32 -1.442695, %v4812_v19  ;;  %v5560_v53 = vadd.f32 %v5559_v8, %v5558_v50 }
 0x802   :  { %v5561_v15 = vpop.f32.mrf.mxu1 }
 0x803   :  { %6176 = vrcp.f32 %v4850_v12  ;;  %v4815_v16 = vadd.f32 %v5560_v53, %v4814_v13 }
 0x804   :  { %v6171_v20 = vpop.eup %6170  ;;  %6178 = vpow2.f32 %v5351_v33  ;;  %v5562_v59 = vpop.f32.mrf.mxu1 }
 0x805   :  { %v4851_v14 = vadd.f32 1.0, %v6171_v20  ;;  %v5352_v21 = vmul.f32 -1.442695, %v4815_v16  ;;  %v5563_v48 = vadd.f32 %v5562_v59, %v5561_v15 }
 0x806   :  { %v5564_v41 = vpop.f32.mrf.mxu1 }
 0x807   :  { %6180 = vrcp.f32 %v4851_v14  ;;  %v4820_v30 = vadd.f32 %v5625_v22, %v5563_v48 }
 0x808   :  { %v6173_v3 = vpop.eup %6172  ;;  %6182 = vpow2.f32 %v5352_v21  ;;  %v5565_v5 = vpop.f32.mrf.mxu1 }
 0x809   :  { %v4852_v17 = vadd.f32 1.0, %v6173_v3  ;;  %v5353_v6 = vmul.f32 -1.442695, %v4820_v30  ;;  %v5566_v23 = vadd.f32 %v5565_v5, %v5564_v41 }
 0x80b   :  { %6184 = vrcp.f32 %v4852_v17  ;;  %v4823_v49 = vadd.f32 %v5626_v1, %v5566_v23 }
 0x80c   :  { %v6175_v24 = vpop.eup %6174  ;;  %6186 = vpow2.f32 %v5353_v6 }
 0x80d   :  { %v4853_v31 = vadd.f32 1.0, %v6175_v24  ;;  %v5354_v36 = vmul.f32 -1.442695, %v4823_v49 }
 0x80f   :  { %6188 = vrcp.f32 %v4853_v31 }
 0x810   :  { %v6177_v0 = vpop.eup %6176  ;;  %6190 = vpow2.f32 %v5354_v36 }
 0x811   :  { %v6179_v18 = vpop.eup %6178  ;;  %4874 = vst [vmem:[%s7536_s16] sm:$0xff] %v6177_v0 }
 0x812   :  { %v4854_v9 = vadd.f32 1.0, %v6179_v18 }
 0x814   :  { %v6181_v63 = vpop.eup %6180  ;;  %6192 = vrcp.f32 %v4854_v9 }
 0x815   :  { %v6183_v58 = vpop.eup %6182  ;;  %4875 = vst [vmem:[%s7536_s16 + $0x8] sm:$0xff] %v6181_v63 }
 0x816   :  { %v4855_v29 = vadd.f32 1.0, %v6183_v58 }
 0x818   :  { %v6185_v32 = vpop.eup %6184  ;;  %6194 = vrcp.f32 %v4855_v29 }
 0x819   :  { %v6187_v37 = vpop.eup %6186  ;;  %4876 = vst [vmem:[%s7536_s16 + $0x10] sm:$0xff] %v6185_v32 }
 0x81a   :  { %v4856_v4 = vadd.f32 1.0, %v6187_v37 }
 0x81c   :  { %v6189_v35 = vpop.eup %6188  ;;  %6196 = vrcp.f32 %v4856_v4 }
 0x81d   :  { %v6191_v60 = vpop.eup %6190  ;;  %4877 = vst [vmem:[%s7536_s16 + $0x18] sm:$0xff] %v6189_v35 }
 0x81e   :  { %v4857_v46 = vadd.f32 1.0, %v6191_v60 }
 0x820   :  { %6198 = vrcp.f32 %v4857_v46 }
 0x821   :  { %v6193_v39 = vpop.eup %6192 }
 0x822   :  { %4878 = vst [vmem:[%s7536_s16 + $0x20] sm:$0xff] %v6193_v39 }
 0x825   :  { %v6195_v40 = vpop.eup %6194 }
 0x826   :  { %4879 = vst [vmem:[%s7536_s16 + $0x28] sm:$0xff] %v6195_v40 }
 0x829   :  { %v6197_v52 = vpop.eup %6196 }
 0x82a   :  { %4880 = vst [vmem:[%s7536_s16 + $0x30] sm:$0xff] %v6197_v52 }
 0x82d   :  { %v6199_v25 = vpop.eup %6198 }
 0x82e   :  { %4881 = vst [vmem:[%s7536_s16 + $0x38] sm:$0xff] %v6199_v25 }
 0x82f   :  { %4886 = vsyncpa [#allocation3], 1 }
 0x830   :  { %4887 = vsyncpa [#allocation5], 1 }
 0x831   :  { %4888 = vsyncpa [#allocation8], 1 }

</bundles_post_ra>
